<compile_context>
chip_gen: v6e
topology: v6e:2x2x1
jax: 0.10.0
libtpu: 0.0.40
codegen_flags: <defaults>
</compile_context>

<pallas_src>
import jax
import jax.numpy as jnp
from jax.experimental import pallas as pl
from jax.experimental.pallas import tpu as pltpu

# Sizes: channels fixed by the module spec, small spatial/batch for the example.
C = 256                  # channels
H = 8                    # spatial height
W = 8                    # spatial width
N = 2                    # batch
EPS = 1e-5               # nn.BatchNorm2d default eps

HP, WP = H + 2, W + 2    # zero-padded spatial dims (padding=1)
WIDE = H * WP            # 80: rows of "wide" conv output per image (the 2 pad cols kept)
S = 104                  # per-image slab rows: 1 leading zero + HP*WP (=100) padded rows
                         #   + 3 trailing zero rows (multiple of 8, >= 2*WP+2+WIDE so every
                         #   tap window stays in-bounds)
TOP = WP + 1             # 11: zero/pad rows above the interior rows of a slab
BOT = S - TOP - WIDE     # 13: zero/pad rows below the interior rows

assert S % 8 == 0 and WIDE % 8 == 0 and S >= 2 * WP + 2 + WIDE and S >= HP * WP + 2


def _res_block_kernel(xflat_ref, w_ref, sb_ref, out_ref, xbf, ypad):
    """One image per grid step.

    xflat_ref: (S, C)      f32   flat zero-padded input slab
    w_ref    : (2, 9*C, C) bf16  im2col-ordered weights for conv1 / conv2
    sb_ref   : (4, C)      f32   rows: scale1, bias1, scale2, bias2 (conv bias + BN folded)
    out_ref  : (WIDE, C)   f32   "wide" output rows (pad columns dropped by the wrapper)
    xbf      : (S, C)      bf16  scratch: bf16 copy of the input slab
    ypad     : (S, C)      bf16  scratch: flat zero-padded conv1 activation
    """
    # Pad-column mask for the wide rows (cols 0 and WP-1 of each spatial row are pad).
    wcol = jax.lax.broadcasted_iota(jnp.int32, (WIDE, 1), 0) % WP
    mask = jnp.logical_and(wcol >= 1, wcol <= W).astype(jnp.float32)

    # Folded BN scale/bias (hoisted; broadcast happens once per conv epilogue).
    scale1, bias1 = sb_ref[0:1, :], sb_ref[1:2, :]
    scale2, bias2 = sb_ref[2:3, :], sb_ref[3:4, :]

    # Zero border of the padded intermediate.  Done every step on purpose: with a
    # "parallel" grid axis the scratch is per-core and a core may never run step 0.
    ypad[pl.ds(0, TOP), :] = jnp.zeros((TOP, C), jnp.bfloat16)
    ypad[pl.ds(TOP + WIDE, BOT), :] = jnp.zeros((BOT, C), jnp.bfloat16)

    # Cast the input slab to bf16 once; the 9 overlapping conv1 taps reuse it.
    xbf[...] = xflat_ref[...].astype(jnp.bfloat16)

    def conv3x3(src_ref, widx):
        # 9 accumulating MXU dots straight from shifted contiguous tap windows.
        acc = None
        for t in range(9):
            off = (t // 3) * WP + (t % 3)
            d = jnp.dot(src_ref[pl.ds(off, WIDE), :],
                        w_ref[widx, t * C:(t + 1) * C, :],
                        preferred_element_type=jnp.float32)
            acc = d if acc is None else acc + d
        return acc

    # conv1 -> BN1 -> ReLU, zero the pad columns, store as the padded conv2 input.
    y1 = jnp.maximum(conv3x3(xbf, 0) * scale1 + bias1, 0.0) * mask
    ypad[pl.ds(TOP, WIDE), :] = y1.astype(jnp.bfloat16)

    # conv2 -> BN2 -> residual (f32 input) -> ReLU.
    y2 = conv3x3(ypad, 1) * scale2 + bias2 + xflat_ref[pl.ds(TOP, WIDE), :]
    out_ref[...] = jnp.maximum(y2, 0.0).astype(out_ref.dtype)


def _fold_bn(conv_bias, gamma, beta, mean, var):
    scale = gamma * jax.lax.rsqrt(var + EPS)
    bias = (conv_bias - mean) * scale + beta
    return scale, bias


def _im2col_weight(w_oihw):
    # (Cout, Cin, 3, 3) -> (kh, kw, Cin, Cout) -> (9*Cin, Cout)
    return jnp.transpose(w_oihw, (2, 3, 1, 0)).reshape(9 * C, C)


def _to_flat_padded(x_nchw):
    n = x_nchw.shape[0]
    x = jnp.transpose(x_nchw, (0, 2, 3, 1)).astype(jnp.float32)      # NHWC
    x = jnp.pad(x, ((0, 0), (1, 1), (1, 1), (0, 0)))                 # (N, HP, WP, C)
    x = x.reshape(n, HP * WP, C)
    x = jnp.pad(x, ((0, 0), (1, S - HP * WP - 1), (0, 0)))           # (N, S, C)
    return x.reshape(n * S, C)


def resnet_block_forward(x_nchw, params):
    """Pallas implementation of ResNet.forward. Input/output are NCHW (PyTorch convention)."""
    n, c, h, w = x_nchw.shape
    assert (c, h, w) == (C, H, W)

    xflat = _to_flat_padded(x_nchw)                                   # (n*S, C) f32
    wmat = jnp.stack([_im2col_weight(params["w1"]),
                      _im2col_weight(params["w2"])]).astype(jnp.bfloat16)  # (2, 9C, C) bf16
    s1, b1 = _fold_bn(params["b1"], params["g1"], params["be1"], params["m1"], params["v1"])
    s2, b2 = _fold_bn(params["b2"], params["g2"], params["be2"], params["m2"], params["v2"])
    sb = jnp.stack([s1, b1, s2, b2]).astype(jnp.float32)              # (4, C)

    out_wide = pl.pallas_call(
        _res_block_kernel,
        out_shape=jax.ShapeDtypeStruct((n * WIDE, C), jnp.float32),
        grid_spec=pltpu.PrefetchScalarGridSpec(
            num_scalar_prefetch=0,
            grid=(n,),                                                # one image per step
            in_specs=[
                pl.BlockSpec((S, C), lambda g: (g, 0)),               # flat padded input slab
                pl.BlockSpec((2, 9 * C, C), lambda g: (0, 0, 0)),     # fused bf16 weights
                pl.BlockSpec((4, C), lambda g: (0, 0)),               # folded BN scale/bias
            ],
            out_specs=pl.BlockSpec((WIDE, C), lambda g: (g, 0)),
            scratch_shapes=[
                pltpu.VMEM((S, C), jnp.bfloat16),                     # bf16 input slab
                pltpu.VMEM((S, C), jnp.bfloat16),                     # padded conv1 activation
            ],
        ),
        compiler_params=pltpu.CompilerParams(
            dimension_semantics=("parallel",),   # images are independent (megacore on v7x)
            vmem_limit_bytes=32 << 20,
        ),
    )(xflat, wmat, sb)

    out = out_wide.reshape(n, H, WP, C)[:, :, 1:1 + W, :]             # drop the pad columns
    return jnp.transpose(out, (0, 3, 1, 2))                           # NHWC -> NCHW


def make_params(key):
    """Deterministic synthetic parameters matching the PyTorch module's shapes."""
    ks = jax.random.split(key, 10)
    p = {}
    # conv weights in PyTorch layout (Cout, Cin, 3, 3), conv biases (Cout,)
    p["w1"] = jax.random.normal(ks[0], (C, C, 3, 3), jnp.float32) * 0.02
    p["b1"] = jax.random.normal(ks[1], (C,), jnp.float32) * 0.01
    p["w2"] = jax.random.normal(ks[2], (C, C, 3, 3), jnp.float32) * 0.02
    p["b2"] = jax.random.normal(ks[3], (C,), jnp.float32) * 0.01
    # BatchNorm2d params (eval mode): gamma, beta, running_mean, running_var
    p["g1"] = 1.0 + 0.1 * jax.random.normal(ks[4], (C,), jnp.float32)
    p["be1"] = 0.05 * jax.random.normal(ks[5], (C,), jnp.float32)
    p["m1"] = 0.1 * jax.random.normal(ks[6], (C,), jnp.float32)
    p["v1"] = 1.0 + 0.1 * jnp.abs(jax.random.normal(ks[7], (C,), jnp.float32))
    p["g2"] = 1.0 + 0.1 * jax.random.normal(ks[8], (C,), jnp.float32)
    p["be2"] = 0.05 * jax.random.normal(ks[9], (C,), jnp.float32)
    p["m2"] = 0.1 * jax.random.normal(ks[4], (C,), jnp.float32) * 0.5
    p["v2"] = 1.0 + 0.1 * jnp.abs(jax.random.normal(ks[5], (C,), jnp.float32))
    return p


def resnet_block_reference(x_nchw, params):
    """Pure-JAX (XLA, f32 HIGHEST) reference of the same forward pass, NCHW."""
    def conv(x, wt, b):
        y = jax.lax.conv_general_dilated(
            x, wt, window_strides=(1, 1), padding=((1, 1), (1, 1)),
            dimension_numbers=("NCHW", "OIHW", "NCHW"),
            precision=jax.lax.Precision.HIGHEST)
        return y + b[None, :, None, None]

    def bn(x, g, be, m, v):
        return (x - m[None, :, None, None]) / jnp.sqrt(v[None, :, None, None] + EPS) \
            * g[None, :, None, None] + be[None, :, None, None]

    x = x_nchw.astype(jnp.float32)
    y = jax.nn.relu(bn(conv(x, params["w1"], params["b1"]),
                       params["g1"], params["be1"], params["m1"], params["v1"]))
    y = bn(conv(y, params["w2"], params["b2"]),
           params["g2"], params["be2"], params["m2"], params["v2"])
    return jax.nn.relu(y + x)


if __name__ == "__main__":
    key = jax.random.PRNGKey(0)
    k_x, k_p = jax.random.split(key)
    x = jax.random.normal(k_x, (N, C, H, W), jnp.float32)   # NCHW, like PyTorch
    params = make_params(k_p)

    out = jax.block_until_ready(resnet_block_forward(x, params))
    ref = jax.block_until_ready(resnet_block_reference(x, params))

    assert out.shape == (N, C, H, W)
    max_diff = float(jnp.max(jnp.abs(out - ref)))
    # bf16 matmul inputs with f32 accumulation over K = 9*256: ~2e-3 RMS deviation expected
    # from the f32-HIGHEST reference, so validate at 2e-2.
    assert jnp.allclose(out, ref, rtol=2e-2, atol=2e-2), f"max abs diff = {max_diff}"

    print("KERNEL_OK")
</pallas_src>

<mosaic_0001>
module attributes {stable_mosaic.version = 11 : i64} {
  func.func @_res_block_kernel(%arg0: i32, %arg1: memref<104x256xf32, #tpu.memory_space<vmem>>, %arg2: memref<2x2304x256xbf16, #tpu.memory_space<vmem>>, %arg3: memref<4x256xf32, #tpu.memory_space<vmem>>, %arg4: memref<80x256xf32, #tpu.memory_space<vmem>>, %arg5: memref<104x256xbf16, #tpu.memory_space<vmem>>, %arg6: memref<104x256xbf16, #tpu.memory_space<vmem>>) attributes {dimension_semantics = [#tpu.dimension_semantics<parallel>], iteration_bounds = array<i64: 2>, scalar_prefetch = 0 : i64, scratch_operands = 2 : i64, tpu.core_type = #tpu.core_type<tc>, window_params = [{transform_indices = @transform_0, window_bounds = array<i64: 104, 256>}, {pipeline_mode = #tpu.pipeline_mode<synchronous>, transform_indices = @transform_1, window_bounds = array<i64: 2, 2304, 256>}, {pipeline_mode = #tpu.pipeline_mode<synchronous>, transform_indices = @transform_2, window_bounds = array<i64: 4, 256>}, {transform_indices = @transform_3, window_bounds = array<i64: 80, 256>}]} {
    %0 = tpu.iota {dimensions = array<i32: 0>} : vector<80x1xi32>
    %c10_i32 = arith.constant 10 : i32
    %c0_i32 = arith.constant 0 : i32
    %1 = arith.cmpi eq, %c10_i32, %c0_i32 : i32
    %c1_i32 = arith.constant 1 : i32
    %2 = arith.select %1, %c1_i32, %c10_i32 : i32
    %3 = vector.broadcast %2 : i32 to vector<80x1xi32>
    %4 = arith.remsi %0, %3 : vector<80x1xi32>
    %c0_i32_0 = arith.constant 0 : i32
    %5 = vector.broadcast %c0_i32_0 : i32 to vector<80x1xi32>
    %6 = arith.cmpi ne, %4, %5 : vector<80x1xi32>
    %c0_i32_1 = arith.constant 0 : i32
    %7 = vector.broadcast %c0_i32_1 : i32 to vector<80x1xi32>
    %8 = arith.cmpi slt, %4, %7 : vector<80x1xi32>
    %c0_i32_2 = arith.constant 0 : i32
    %9 = arith.cmpi slt, %2, %c0_i32_2 : i32
    %10 = vector.broadcast %9 : i1 to vector<80x1xi1>
    %11 = vector.broadcast %10 : vector<80x1xi1> to vector<80x1xi1>
    %12 = arith.xori %8, %11 : vector<80x1xi1>
    %13 = arith.andi %12, %6 : vector<80x1xi1>
    %14 = vector.broadcast %2 : i32 to vector<80x1xi32>
    %15 = arith.addi %4, %14 : vector<80x1xi32>
    %16 = arith.select %13, %15, %4 : vector<80x1xi1>, vector<80x1xi32>
    %c1_i32_3 = arith.constant 1 : i32
    %17 = vector.broadcast %c1_i32_3 : i32 to vector<80x1xi32>
    %18 = arith.cmpi sge, %16, %17 : vector<80x1xi32>
    %c8_i32 = arith.constant 8 : i32
    %19 = vector.broadcast %c8_i32 : i32 to vector<80x1xi32>
    %20 = arith.cmpi sle, %16, %19 : vector<80x1xi32>
    %21 = arith.andi %18, %20 : vector<80x1xi1>
    %22 = arith.extui %21 : vector<80x1xi1> to vector<80x1xi32>
    %23 = arith.sitofp %22 : vector<80x1xi32> to vector<80x1xf32>
    %c0 = arith.constant 0 : index
    %c0_4 = arith.constant 0 : index
    %24 = vector.load %arg3[%c0, %c0_4] : memref<4x256xf32, #tpu.memory_space<vmem>>, vector<1x256xf32>
    %c1 = arith.constant 1 : index
    %c0_5 = arith.constant 0 : index
    %25 = vector.load %arg3[%c1, %c0_5] : memref<4x256xf32, #tpu.memory_space<vmem>>, vector<1x256xf32>
    %c2 = arith.constant 2 : index
    %c0_6 = arith.constant 0 : index
    %26 = vector.load %arg3[%c2, %c0_6] : memref<4x256xf32, #tpu.memory_space<vmem>>, vector<1x256xf32>
    %c3 = arith.constant 3 : index
    %c0_7 = arith.constant 0 : index
    %27 = vector.load %arg3[%c3, %c0_7] : memref<4x256xf32, #tpu.memory_space<vmem>>, vector<1x256xf32>
    %cst = arith.constant 0.000000e+00 : bf16
    %28 = vector.broadcast %cst : bf16 to vector<11x256xbf16>
    %c0_8 = arith.constant 0 : index
    %c0_9 = arith.constant 0 : index
    %29 = vector.load %arg6[%c0_8, %c0_9] : memref<104x256xbf16, #tpu.memory_space<vmem>>, vector<11x256xbf16>
    tpu.vector_store %arg6[%c0_8, %c0_9], %28 {strides = array<i32>} : memref<104x256xbf16, #tpu.memory_space<vmem>>, vector<11x256xbf16>,
    %cst_10 = arith.constant 0.000000e+00 : bf16
    %30 = vector.broadcast %cst_10 : bf16 to vector<13x256xbf16>
    %c91 = arith.constant 91 : index
    %c0_11 = arith.constant 0 : index
    %31 = vector.load %arg6[%c91, %c0_11] : memref<104x256xbf16, #tpu.memory_space<vmem>>, vector<13x256xbf16>
    tpu.vector_store %arg6[%c91, %c0_11], %30 {strides = array<i32>} : memref<104x256xbf16, #tpu.memory_space<vmem>>, vector<13x256xbf16>,
    %c0_12 = arith.constant 0 : index
    %c0_13 = arith.constant 0 : index
    %32 = vector.load %arg1[%c0_12, %c0_13] : memref<104x256xf32, #tpu.memory_space<vmem>>, vector<104x256xf32>
    %33 = arith.truncf %32 : vector<104x256xf32> to vector<104x256xbf16>
    %c0_14 = arith.constant 0 : index
    %c0_15 = arith.constant 0 : index
    %34 = vector.load %arg5[%c0_14, %c0_15] : memref<104x256xbf16, #tpu.memory_space<vmem>>, vector<104x256xbf16>
    tpu.vector_store %arg5[%c0_14, %c0_15], %33 {strides = array<i32>} : memref<104x256xbf16, #tpu.memory_space<vmem>>, vector<104x256xbf16>,
    %c0_16 = arith.constant 0 : index
    %c0_17 = arith.constant 0 : index
    %35 = vector.load %arg5[%c0_16, %c0_17] : memref<104x256xbf16, #tpu.memory_space<vmem>>, vector<80x256xbf16>
    %c0_18 = arith.constant 0 : index
    %c0_19 = arith.constant 0 : index
    %c0_20 = arith.constant 0 : index
    %36 = vector.load %arg2[%c0_18, %c0_19, %c0_20] : memref<2x2304x256xbf16, #tpu.memory_space<vmem>>, vector<1x256x256xbf16>
    %37 = vector.shape_cast %36 : vector<1x256x256xbf16> to vector<256x256xbf16>
    %cst_21 = arith.constant dense<0.000000e+00> : vector<80x256xf32>
    %38 = tpu.matmul %35, %37, %cst_21 {dimension_numbers = #tpu.dot_dimension_numbers<[1], [0], [0], [1], [0, 0, 1, 1], [], []>} : vector<80x256xbf16>, vector<256x256xbf16>, vector<80x256xf32> -> vector<80x256xf32>
    %c1_22 = arith.constant 1 : index
    %c0_23 = arith.constant 0 : index
    %39 = vector.load %arg5[%c1_22, %c0_23] : memref<104x256xbf16, #tpu.memory_space<vmem>>, vector<80x256xbf16>
    %c0_24 = arith.constant 0 : index
    %c256 = arith.constant 256 : index
    %c0_25 = arith.constant 0 : index
    %40 = vector.load %arg2[%c0_24, %c256, %c0_25] : memref<2x2304x256xbf16, #tpu.memory_space<vmem>>, vector<1x256x256xbf16>
    %41 = vector.shape_cast %40 : vector<1x256x256xbf16> to vector<256x256xbf16>
    %cst_26 = arith.constant dense<0.000000e+00> : vector<80x256xf32>
    %42 = tpu.matmul %39, %41, %cst_26 {dimension_numbers = #tpu.dot_dimension_numbers<[1], [0], [0], [1], [0, 0, 1, 1], [], []>} : vector<80x256xbf16>, vector<256x256xbf16>, vector<80x256xf32> -> vector<80x256xf32>
    %43 = arith.addf %38, %42 : vector<80x256xf32>
    %c2_27 = arith.constant 2 : index
    %c0_28 = arith.constant 0 : index
    %44 = vector.load %arg5[%c2_27, %c0_28] : memref<104x256xbf16, #tpu.memory_space<vmem>>, vector<80x256xbf16>
    %c0_29 = arith.constant 0 : index
    %c512 = arith.constant 512 : index
    %c0_30 = arith.constant 0 : index
    %45 = vector.load %arg2[%c0_29, %c512, %c0_30] : memref<2x2304x256xbf16, #tpu.memory_space<vmem>>, vector<1x256x256xbf16>
    %46 = vector.shape_cast %45 : vector<1x256x256xbf16> to vector<256x256xbf16>
    %cst_31 = arith.constant dense<0.000000e+00> : vector<80x256xf32>
    %47 = tpu.matmul %44, %46, %cst_31 {dimension_numbers = #tpu.dot_dimension_numbers<[1], [0], [0], [1], [0, 0, 1, 1], [], []>} : vector<80x256xbf16>, vector<256x256xbf16>, vector<80x256xf32> -> vector<80x256xf32>
    %48 = arith.addf %43, %47 : vector<80x256xf32>
    %c10 = arith.constant 10 : index
    %c0_32 = arith.constant 0 : index
    %49 = vector.load %arg5[%c10, %c0_32] : memref<104x256xbf16, #tpu.memory_space<vmem>>, vector<80x256xbf16>
    %c0_33 = arith.constant 0 : index
    %c768 = arith.constant 768 : index
    %c0_34 = arith.constant 0 : index
    %50 = vector.load %arg2[%c0_33, %c768, %c0_34] : memref<2x2304x256xbf16, #tpu.memory_space<vmem>>, vector<1x256x256xbf16>
    %51 = vector.shape_cast %50 : vector<1x256x256xbf16> to vector<256x256xbf16>
    %cst_35 = arith.constant dense<0.000000e+00> : vector<80x256xf32>
    %52 = tpu.matmul %49, %51, %cst_35 {dimension_numbers = #tpu.dot_dimension_numbers<[1], [0], [0], [1], [0, 0, 1, 1], [], []>} : vector<80x256xbf16>, vector<256x256xbf16>, vector<80x256xf32> -> vector<80x256xf32>
    %53 = arith.addf %48, %52 : vector<80x256xf32>
    %c11 = arith.constant 11 : index
    %c0_36 = arith.constant 0 : index
    %54 = vector.load %arg5[%c11, %c0_36] : memref<104x256xbf16, #tpu.memory_space<vmem>>, vector<80x256xbf16>
    %c0_37 = arith.constant 0 : index
    %c1024 = arith.constant 1024 : index
    %c0_38 = arith.constant 0 : index
    %55 = vector.load %arg2[%c0_37, %c1024, %c0_38] : memref<2x2304x256xbf16, #tpu.memory_space<vmem>>, vector<1x256x256xbf16>
    %56 = vector.shape_cast %55 : vector<1x256x256xbf16> to vector<256x256xbf16>
    %cst_39 = arith.constant dense<0.000000e+00> : vector<80x256xf32>
    %57 = tpu.matmul %54, %56, %cst_39 {dimension_numbers = #tpu.dot_dimension_numbers<[1], [0], [0], [1], [0, 0, 1, 1], [], []>} : vector<80x256xbf16>, vector<256x256xbf16>, vector<80x256xf32> -> vector<80x256xf32>
    %58 = arith.addf %53, %57 : vector<80x256xf32>
    %c12 = arith.constant 12 : index
    %c0_40 = arith.constant 0 : index
    %59 = vector.load %arg5[%c12, %c0_40] : memref<104x256xbf16, #tpu.memory_space<vmem>>, vector<80x256xbf16>
    %c0_41 = arith.constant 0 : index
    %c1280 = arith.constant 1280 : index
    %c0_42 = arith.constant 0 : index
    %60 = vector.load %arg2[%c0_41, %c1280, %c0_42] : memref<2x2304x256xbf16, #tpu.memory_space<vmem>>, vector<1x256x256xbf16>
    %61 = vector.shape_cast %60 : vector<1x256x256xbf16> to vector<256x256xbf16>
    %cst_43 = arith.constant dense<0.000000e+00> : vector<80x256xf32>
    %62 = tpu.matmul %59, %61, %cst_43 {dimension_numbers = #tpu.dot_dimension_numbers<[1], [0], [0], [1], [0, 0, 1, 1], [], []>} : vector<80x256xbf16>, vector<256x256xbf16>, vector<80x256xf32> -> vector<80x256xf32>
    %63 = arith.addf %58, %62 : vector<80x256xf32>
    %c20 = arith.constant 20 : index
    %c0_44 = arith.constant 0 : index
    %64 = vector.load %arg5[%c20, %c0_44] : memref<104x256xbf16, #tpu.memory_space<vmem>>, vector<80x256xbf16>
    %c0_45 = arith.constant 0 : index
    %c1536 = arith.constant 1536 : index
    %c0_46 = arith.constant 0 : index
    %65 = vector.load %arg2[%c0_45, %c1536, %c0_46] : memref<2x2304x256xbf16, #tpu.memory_space<vmem>>, vector<1x256x256xbf16>
    %66 = vector.shape_cast %65 : vector<1x256x256xbf16> to vector<256x256xbf16>
    %cst_47 = arith.constant dense<0.000000e+00> : vector<80x256xf32>
    %67 = tpu.matmul %64, %66, %cst_47 {dimension_numbers = #tpu.dot_dimension_numbers<[1], [0], [0], [1], [0, 0, 1, 1], [], []>} : vector<80x256xbf16>, vector<256x256xbf16>, vector<80x256xf32> -> vector<80x256xf32>
    %68 = arith.addf %63, %67 : vector<80x256xf32>
    %c21 = arith.constant 21 : index
    %c0_48 = arith.constant 0 : index
    %69 = vector.load %arg5[%c21, %c0_48] : memref<104x256xbf16, #tpu.memory_space<vmem>>, vector<80x256xbf16>
    %c0_49 = arith.constant 0 : index
    %c1792 = arith.constant 1792 : index
    %c0_50 = arith.constant 0 : index
    %70 = vector.load %arg2[%c0_49, %c1792, %c0_50] : memref<2x2304x256xbf16, #tpu.memory_space<vmem>>, vector<1x256x256xbf16>
    %71 = vector.shape_cast %70 : vector<1x256x256xbf16> to vector<256x256xbf16>
    %cst_51 = arith.constant dense<0.000000e+00> : vector<80x256xf32>
    %72 = tpu.matmul %69, %71, %cst_51 {dimension_numbers = #tpu.dot_dimension_numbers<[1], [0], [0], [1], [0, 0, 1, 1], [], []>} : vector<80x256xbf16>, vector<256x256xbf16>, vector<80x256xf32> -> vector<80x256xf32>
    %73 = arith.addf %68, %72 : vector<80x256xf32>
    %c22 = arith.constant 22 : index
    %c0_52 = arith.constant 0 : index
    %74 = vector.load %arg5[%c22, %c0_52] : memref<104x256xbf16, #tpu.memory_space<vmem>>, vector<80x256xbf16>
    %c0_53 = arith.constant 0 : index
    %c2048 = arith.constant 2048 : index
    %c0_54 = arith.constant 0 : index
    %75 = vector.load %arg2[%c0_53, %c2048, %c0_54] : memref<2x2304x256xbf16, #tpu.memory_space<vmem>>, vector<1x256x256xbf16>
    %76 = vector.shape_cast %75 : vector<1x256x256xbf16> to vector<256x256xbf16>
    %cst_55 = arith.constant dense<0.000000e+00> : vector<80x256xf32>
    %77 = tpu.matmul %74, %76, %cst_55 {dimension_numbers = #tpu.dot_dimension_numbers<[1], [0], [0], [1], [0, 0, 1, 1], [], []>} : vector<80x256xbf16>, vector<256x256xbf16>, vector<80x256xf32> -> vector<80x256xf32>
    %78 = arith.addf %73, %77 : vector<80x256xf32>
    %79 = vector.broadcast %24 : vector<1x256xf32> to vector<80x256xf32>
    %80 = arith.mulf %78, %79 : vector<80x256xf32>
    %81 = vector.broadcast %25 : vector<1x256xf32> to vector<80x256xf32>
    %82 = arith.addf %80, %81 : vector<80x256xf32>
    %cst_56 = arith.constant 0.000000e+00 : f32
    %83 = vector.broadcast %cst_56 : f32 to vector<80x256xf32>
    %84 = arith.maximumf %82, %83 : vector<80x256xf32>
    %85 = vector.broadcast %23 : vector<80x1xf32> to vector<80x256xf32>
    %86 = arith.mulf %84, %85 : vector<80x256xf32>
    %87 = arith.truncf %86 : vector<80x256xf32> to vector<80x256xbf16>
    %c11_57 = arith.constant 11 : index
    %c0_58 = arith.constant 0 : index
    %88 = vector.load %arg6[%c11_57, %c0_58] : memref<104x256xbf16, #tpu.memory_space<vmem>>, vector<80x256xbf16>
    tpu.vector_store %arg6[%c11_57, %c0_58], %87 {strides = array<i32>} : memref<104x256xbf16, #tpu.memory_space<vmem>>, vector<80x256xbf16>,
    %c0_59 = arith.constant 0 : index
    %c0_60 = arith.constant 0 : index
    %89 = vector.load %arg6[%c0_59, %c0_60] : memref<104x256xbf16, #tpu.memory_space<vmem>>, vector<80x256xbf16>
    %c1_61 = arith.constant 1 : index
    %c0_62 = arith.constant 0 : index
    %c0_63 = arith.constant 0 : index
    %90 = vector.load %arg2[%c1_61, %c0_62, %c0_63] : memref<2x2304x256xbf16, #tpu.memory_space<vmem>>, vector<1x256x256xbf16>
    %91 = vector.shape_cast %90 : vector<1x256x256xbf16> to vector<256x256xbf16>
    %cst_64 = arith.constant dense<0.000000e+00> : vector<80x256xf32>
    %92 = tpu.matmul %89, %91, %cst_64 {dimension_numbers = #tpu.dot_dimension_numbers<[1], [0], [0], [1], [0, 0, 1, 1], [], []>} : vector<80x256xbf16>, vector<256x256xbf16>, vector<80x256xf32> -> vector<80x256xf32>
    %c1_65 = arith.constant 1 : index
    %c0_66 = arith.constant 0 : index
    %93 = vector.load %arg6[%c1_65, %c0_66] : memref<104x256xbf16, #tpu.memory_space<vmem>>, vector<80x256xbf16>
    %c1_67 = arith.constant 1 : index
    %c256_68 = arith.constant 256 : index
    %c0_69 = arith.constant 0 : index
    %94 = vector.load %arg2[%c1_67, %c256_68, %c0_69] : memref<2x2304x256xbf16, #tpu.memory_space<vmem>>, vector<1x256x256xbf16>
    %95 = vector.shape_cast %94 : vector<1x256x256xbf16> to vector<256x256xbf16>
    %cst_70 = arith.constant dense<0.000000e+00> : vector<80x256xf32>
    %96 = tpu.matmul %93, %95, %cst_70 {dimension_numbers = #tpu.dot_dimension_numbers<[1], [0], [0], [1], [0, 0, 1, 1], [], []>} : vector<80x256xbf16>, vector<256x256xbf16>, vector<80x256xf32> -> vector<80x256xf32>
    %97 = arith.addf %92, %96 : vector<80x256xf32>
    %c2_71 = arith.constant 2 : index
    %c0_72 = arith.constant 0 : index
    %98 = vector.load %arg6[%c2_71, %c0_72] : memref<104x256xbf16, #tpu.memory_space<vmem>>, vector<80x256xbf16>
    %c1_73 = arith.constant 1 : index
    %c512_74 = arith.constant 512 : index
    %c0_75 = arith.constant 0 : index
    %99 = vector.load %arg2[%c1_73, %c512_74, %c0_75] : memref<2x2304x256xbf16, #tpu.memory_space<vmem>>, vector<1x256x256xbf16>
    %100 = vector.shape_cast %99 : vector<1x256x256xbf16> to vector<256x256xbf16>
    %cst_76 = arith.constant dense<0.000000e+00> : vector<80x256xf32>
    %101 = tpu.matmul %98, %100, %cst_76 {dimension_numbers = #tpu.dot_dimension_numbers<[1], [0], [0], [1], [0, 0, 1, 1], [], []>} : vector<80x256xbf16>, vector<256x256xbf16>, vector<80x256xf32> -> vector<80x256xf32>
    %102 = arith.addf %97, %101 : vector<80x256xf32>
    %c10_77 = arith.constant 10 : index
    %c0_78 = arith.constant 0 : index
    %103 = vector.load %arg6[%c10_77, %c0_78] : memref<104x256xbf16, #tpu.memory_space<vmem>>, vector<80x256xbf16>
    %c1_79 = arith.constant 1 : index
    %c768_80 = arith.constant 768 : index
    %c0_81 = arith.constant 0 : index
    %104 = vector.load %arg2[%c1_79, %c768_80, %c0_81] : memref<2x2304x256xbf16, #tpu.memory_space<vmem>>, vector<1x256x256xbf16>
    %105 = vector.shape_cast %104 : vector<1x256x256xbf16> to vector<256x256xbf16>
    %cst_82 = arith.constant dense<0.000000e+00> : vector<80x256xf32>
    %106 = tpu.matmul %103, %105, %cst_82 {dimension_numbers = #tpu.dot_dimension_numbers<[1], [0], [0], [1], [0, 0, 1, 1], [], []>} : vector<80x256xbf16>, vector<256x256xbf16>, vector<80x256xf32> -> vector<80x256xf32>
    %107 = arith.addf %102, %106 : vector<80x256xf32>
    %c11_83 = arith.constant 11 : index
    %c0_84 = arith.constant 0 : index
    %108 = vector.load %arg6[%c11_83, %c0_84] : memref<104x256xbf16, #tpu.memory_space<vmem>>, vector<80x256xbf16>
    %c1_85 = arith.constant 1 : index
    %c1024_86 = arith.constant 1024 : index
    %c0_87 = arith.constant 0 : index
    %109 = vector.load %arg2[%c1_85, %c1024_86, %c0_87] : memref<2x2304x256xbf16, #tpu.memory_space<vmem>>, vector<1x256x256xbf16>
    %110 = vector.shape_cast %109 : vector<1x256x256xbf16> to vector<256x256xbf16>
    %cst_88 = arith.constant dense<0.000000e+00> : vector<80x256xf32>
    %111 = tpu.matmul %108, %110, %cst_88 {dimension_numbers = #tpu.dot_dimension_numbers<[1], [0], [0], [1], [0, 0, 1, 1], [], []>} : vector<80x256xbf16>, vector<256x256xbf16>, vector<80x256xf32> -> vector<80x256xf32>
    %112 = arith.addf %107, %111 : vector<80x256xf32>
    %c12_89 = arith.constant 12 : index
    %c0_90 = arith.constant 0 : index
    %113 = vector.load %arg6[%c12_89, %c0_90] : memref<104x256xbf16, #tpu.memory_space<vmem>>, vector<80x256xbf16>
    %c1_91 = arith.constant 1 : index
    %c1280_92 = arith.constant 1280 : index
    %c0_93 = arith.constant 0 : index
    %114 = vector.load %arg2[%c1_91, %c1280_92, %c0_93] : memref<2x2304x256xbf16, #tpu.memory_space<vmem>>, vector<1x256x256xbf16>
    %115 = vector.shape_cast %114 : vector<1x256x256xbf16> to vector<256x256xbf16>
    %cst_94 = arith.constant dense<0.000000e+00> : vector<80x256xf32>
    %116 = tpu.matmul %113, %115, %cst_94 {dimension_numbers = #tpu.dot_dimension_numbers<[1], [0], [0], [1], [0, 0, 1, 1], [], []>} : vector<80x256xbf16>, vector<256x256xbf16>, vector<80x256xf32> -> vector<80x256xf32>
    %117 = arith.addf %112, %116 : vector<80x256xf32>
    %c20_95 = arith.constant 20 : index
    %c0_96 = arith.constant 0 : index
    %118 = vector.load %arg6[%c20_95, %c0_96] : memref<104x256xbf16, #tpu.memory_space<vmem>>, vector<80x256xbf16>
    %c1_97 = arith.constant 1 : index
    %c1536_98 = arith.constant 1536 : index
    %c0_99 = arith.constant 0 : index
    %119 = vector.load %arg2[%c1_97, %c1536_98, %c0_99] : memref<2x2304x256xbf16, #tpu.memory_space<vmem>>, vector<1x256x256xbf16>
    %120 = vector.shape_cast %119 : vector<1x256x256xbf16> to vector<256x256xbf16>
    %cst_100 = arith.constant dense<0.000000e+00> : vector<80x256xf32>
    %121 = tpu.matmul %118, %120, %cst_100 {dimension_numbers = #tpu.dot_dimension_numbers<[1], [0], [0], [1], [0, 0, 1, 1], [], []>} : vector<80x256xbf16>, vector<256x256xbf16>, vector<80x256xf32> -> vector<80x256xf32>
    %122 = arith.addf %117, %121 : vector<80x256xf32>
    %c21_101 = arith.constant 21 : index
    %c0_102 = arith.constant 0 : index
    %123 = vector.load %arg6[%c21_101, %c0_102] : memref<104x256xbf16, #tpu.memory_space<vmem>>, vector<80x256xbf16>
    %c1_103 = arith.constant 1 : index
    %c1792_104 = arith.constant 1792 : index
    %c0_105 = arith.constant 0 : index
    %124 = vector.load %arg2[%c1_103, %c1792_104, %c0_105] : memref<2x2304x256xbf16, #tpu.memory_space<vmem>>, vector<1x256x256xbf16>
    %125 = vector.shape_cast %124 : vector<1x256x256xbf16> to vector<256x256xbf16>
    %cst_106 = arith.constant dense<0.000000e+00> : vector<80x256xf32>
    %126 = tpu.matmul %123, %125, %cst_106 {dimension_numbers = #tpu.dot_dimension_numbers<[1], [0], [0], [1], [0, 0, 1, 1], [], []>} : vector<80x256xbf16>, vector<256x256xbf16>, vector<80x256xf32> -> vector<80x256xf32>
    %127 = arith.addf %122, %126 : vector<80x256xf32>
    %c22_107 = arith.constant 22 : index
    %c0_108 = arith.constant 0 : index
    %128 = vector.load %arg6[%c22_107, %c0_108] : memref<104x256xbf16, #tpu.memory_space<vmem>>, vector<80x256xbf16>
    %c1_109 = arith.constant 1 : index
    %c2048_110 = arith.constant 2048 : index
    %c0_111 = arith.constant 0 : index
    %129 = vector.load %arg2[%c1_109, %c2048_110, %c0_111] : memref<2x2304x256xbf16, #tpu.memory_space<vmem>>, vector<1x256x256xbf16>
    %130 = vector.shape_cast %129 : vector<1x256x256xbf16> to vector<256x256xbf16>
    %cst_112 = arith.constant dense<0.000000e+00> : vector<80x256xf32>
    %131 = tpu.matmul %128, %130, %cst_112 {dimension_numbers = #tpu.dot_dimension_numbers<[1], [0], [0], [1], [0, 0, 1, 1], [], []>} : vector<80x256xbf16>, vector<256x256xbf16>, vector<80x256xf32> -> vector<80x256xf32>
    %132 = arith.addf %127, %131 : vector<80x256xf32>
    %133 = vector.broadcast %26 : vector<1x256xf32> to vector<80x256xf32>
    %134 = arith.mulf %132, %133 : vector<80x256xf32>
    %135 = vector.broadcast %27 : vector<1x256xf32> to vector<80x256xf32>
    %136 = arith.addf %134, %135 : vector<80x256xf32>
    %c11_113 = arith.constant 11 : index
    %c0_114 = arith.constant 0 : index
    %137 = vector.load %arg1[%c11_113, %c0_114] : memref<104x256xf32, #tpu.memory_space<vmem>>, vector<80x256xf32>
    %138 = arith.addf %136, %137 : vector<80x256xf32>
    %cst_115 = arith.constant 0.000000e+00 : f32
    %139 = vector.broadcast %cst_115 : f32 to vector<80x256xf32>
    %140 = arith.maximumf %138, %139 : vector<80x256xf32>
    %c0_116 = arith.constant 0 : index
    %c0_117 = arith.constant 0 : index
    %141 = vector.load %arg4[%c0_116, %c0_117] : memref<80x256xf32, #tpu.memory_space<vmem>>, vector<80x256xf32>
    tpu.vector_store %arg4[%c0_116, %c0_117], %140 {strides = array<i32>} : memref<80x256xf32, #tpu.memory_space<vmem>>, vector<80x256xf32>,
    return
  }
  func.func @transform_0(%arg0: i32) -> (i32, i32) {
    %c0_i32 = arith.constant 0 : i32
    %c0_i32_0 = arith.constant 0 : i32
    return %arg0, %c0_i32 : i32, i32
  }
  func.func @transform_1(%arg0: i32) -> (i32, i32, i32) {
    %c0_i32 = arith.constant 0 : i32
    %c0_i32_0 = arith.constant 0 : i32
    %c0_i32_1 = arith.constant 0 : i32
    %c0_i32_2 = arith.constant 0 : i32
    return %c0_i32, %c0_i32_0, %c0_i32_1 : i32, i32, i32
  }
  func.func @transform_2(%arg0: i32) -> (i32, i32) {
    %c0_i32 = arith.constant 0 : i32
    %c0_i32_0 = arith.constant 0 : i32
    %c0_i32_1 = arith.constant 0 : i32
    return %c0_i32, %c0_i32_0 : i32, i32
  }
  func.func @transform_3(%arg0: i32) -> (i32, i32) {
    %c0_i32 = arith.constant 0 : i32
    %c0_i32_0 = arith.constant 0 : i32
    return %arg0, %c0_i32 : i32, i32
  }
}

</mosaic_0001>

<bundles_post_ra>
// kernel: tpu_custom_call.1
= control target key start
LH: loop header
LB: loop body
LE: loop exit
PB: predicated region body
PF: predicated region fallthrough
CT: control target
= control target key end

     0   :  { %8 = vsyncpa [#allocation5], 0  ;;  %s12440_s0 = inlined_call_operand.hbm [shape: f32[208,256], index: 0, kind: input, shape index: {}]   ;;  %s12441_s1 = inlined_call_operand.hbm [shape: bf16[2,2304,256], index: 1, kind: input, shape index: {}]   ;;  %s12442_s2 = inlined_call_operand.hbm [shape: f32[4,256], index: 2, kind: input, shape index: {}]   ;;  %s12443_s3 = inlined_call_operand.hbm [shape: f32[160,256], index: 3, kind: output, shape index: {}]  }
   0x1   :  { %10 = vsyncpa [#allocation5 + $0x1], 0 }
   0x2   :  { %11 = vsyncpa [#allocation8], 0 }
   0x3   :  { %12 = vsyncpa [#allocation6], 0 }
   0x4   :  { %14 = vsyncpa [#allocation6 + $0x1], 0  ;;  %s9790_s12 = smov 0   ;;  %s9792_s13 = smov 0  }
   0x5   :  { %s9794_s14 = smov 0   ;;  %s9796_s15 = smov 0  }
   0x6 LB: > { %s9811_s16 = sadd.s32 4294967295, %s9756_s15   ;;  %s7836_s17 = sadd.s32 4294967294, %s9756_s15   ;;  %s9756_s15 = sphi %s9796_s15, %s12793_s15   ;;  %s9752_s14 = sphi %s9794_s14, %s12792_s14   ;;  %s9748_s13 = sphi %s9792_s13, %s12791_s13   ;;  %s9744_s12 = sphi %s9790_s12, %s12790_s12  }
   0x7   : > { %p40_p0 = scmp.ne.s32.totalorder %s9748_s13, %s9744_s12  ;;  %p12444_p1 = scmp.eq.s32.totalorder %s9811_s16, 0 }
   0x8   : > { %p112_p3 = scmp.eq.s32.totalorder %s7836_s17, 1  ;;  %p7837_p5 = scmp.ge.s32.totalorder %s9756_s15, 1 }
   0x9   : > { %p9820_p4 = por %p12444_p1, %p40_p0  ;;  %p119_p7 = scmp.lt.s32.totalorder %s9756_s15, 3 }
   0xa   : > { %p9825_p6 = por %p112_p3, %p40_p0  ;;  %s9758_s21 = smov [#allocation7]  }
   0xb   : > { %s12478_s18 = scalar_select %p9820_p4, 1, 0 }
   0xc   : > { %s12479_s19 = scalar_select %p9825_p6, 1, 0 }
   0xd   : > { %p9830_p8 = pnand %p7837_p5, %p119_p7  ;;  %s131_s22 = sshll.u32 %s9758_s21, 4  ;;  %s132_s22 = int_to_ptr.vmem [resolvable:$true] %s131_s22 }
   0xe   : > { %s9759_s24 = smov [#allocation9]   ;;  %s9619_s26 = scalar_lea.vmem %s132_s22, 73728 }
   0xf   : > { %s12480_s20 = scalar_select %p9830_p8, 1, 0 }
  0x10   : > { %p8615_p9 = pneg %p9830_p8  ;;  %s145_s25 = sshll.u32 %s9759_s24, 4  ;;  %s146_s25 = int_to_ptr.vmem [resolvable:$true] %s145_s25 }
  0x11   : > { %p9620_p13 = scmp.ne.s32.totalorder %s132_s22, %s9619_s26  ;;  %p9627_p5 = scmp.lt.s32.totalorder %s132_s22, %s132_s22 }
  0x12   : > { %p9839_p11 = pnand %p8615_p9, %p12444_p1  ;;  %p9628_p7 = scmp.lt.s32.totalorder %s9619_s26, %s9619_s26 }
  0x14   : > { %p9610_p12 = pneg %p9839_p11  ;;  %p9629_p10 = por %p9628_p7, %p9627_p5 }
  0x16   : > { %p9622_p0 = pnand %p9620_p13, %p9610_p12 }
  0x18   : > { %p9623_p3 = pneg %p9622_p0 }
  0x1a   : > { %p9630_p9 = pnand %p9629_p10, %p9623_p3 }
  0x1c   : > { %9633 = shalt.err (!%p9630_p9)
}
  0x1d   : > { %s9760_s27 = smov 128   ;;  %s9761_s28 = smov 8  }
  0x1e   : > { %8618 = dma.hbm_to_vmem [thread:$0]  (!%p9839_p11), %s12441_s1, 73728, %s132_s22, [#allocation8], %s9760_s27, %s9760_s27, %s9761_s28  }
  0x1f   : > { %s9645_s4 = scalar_lea.vmem %s146_s25, 128  ;;  %p9653_p2 = scmp.lt.s32.totalorder %s146_s25, %s146_s25 }
  0x20   : > { %p9646_p1 = scmp.ne.s32.totalorder %s146_s25, %s9645_s4  ;;  %p9654_p6 = scmp.lt.s32.totalorder %s9645_s4, %s9645_s4 }
  0x22   : > { %p9648_p13 = pnand %p9646_p1, %p9610_p12  ;;  %p9655_p5 = por %p9654_p6, %p9653_p2 }
  0x24   : > { %p9649_p0 = pneg %p9648_p13 }
  0x26   : > { %p9656_p10 = pnand %p9655_p5, %p9649_p0 }
  0x28   : > { %9659 = shalt.err (!%p9656_p10)
}
  0x29   : > { %8621 = dma.hbm_to_vmem [thread:$0]  (!%p9839_p11), %s12442_s2, 128, %s146_s25, [#allocation8]  }
  0x2a   : > { %s9862_s7 = sadd.s32 1, %s9756_s15   ;;  %s27_s8 = sadd.s32 1, %s9752_s14 }
  0x2b   : > { %s24_s9 = ssub.s32 %s9756_s15, %s9862_s7  ;;  %p34_p1 = scmp.ne.s32.totalorder %s9752_s14, %s9748_s13 }
  0x2c   : > { %p25_p2 = scmp.eq.s32.totalorder %s24_s9, 0  ;;  %p35_p6 = scmp.eq.s32.totalorder %s9756_s15, 0 }
  0x2d   : > { %p12482_p12 = scmp.eq.s32.totalorder %s9811_s16, 1  ;;  %p8632_p7 = scmp.lt.s32.totalorder %s9756_s15, 2 }
  0x2e   : > { %s9878_s11 = scalar_select %p25_p2, %s9752_s14, %s27_s8  }
  0x2f   : > { %p9872_p3 = por %p12482_p12, %p34_p1  ;;  %p36_p9 = por %p35_p6, %p34_p1 }
  0x30   : > { %s156_s17 = sand.u32 1, %s9752_s14   ;;  %s8578_s22 = smul.u32 3328, %s9756_s15 }
  0x31   : > { %s12483_s10 = scalar_select %p9872_p3, 1, 0 }
  0x32   : > { %s8580_s21 = smul.u32 208, %s156_s17  ;;  %p9882_p11 = pnand %p8632_p7, %p36_p9 }
  0x33   : > { %s9889_s26 = scalar_lea.hbm %s12440_s0, %s8578_s22  ;;  %s9893_s29 = scalar_lea.sflag [#allocation5], %s156_s17 }
  0x34   : > { %s160_s27 = scalar_lea.vmem [#allocation4], %s8580_s21  ;;  %s9660_s30 = scalar_lea.hbm %s9889_s26, 3328 }
  0x35   : > { %s168_s28 = sshll.u32 %s160_s27, 4  ;;  %p9661_p13 = scmp.ne.s32.totalorder %s9889_s26, %s9660_s30  ;;  %s9891_s28 = int_to_ptr.vmem [resolvable:$true] %s168_s28 }
  0x36   : > { %p9662_p0 = pneg %p9882_p11  ;;  %s9665_s6 = scalar_lea.hbm %s12440_s0, 6656 }
  0x37   : > { %p9666_p1 = scmp.lt.s32.totalorder %s9889_s26, %s12440_s0  ;;  %p9667_p2 = scmp.lt.s32.totalorder %s9665_s6, %s9660_s30 }
  0x38   : > { %p9663_p5 = pnand %p9662_p0, %p9661_p13 }
  0x39   : > { %p9668_p6 = por %p9667_p2, %p9666_p1 }
  0x3a   : > { %p9664_p10 = pneg %p9663_p5 }
  0x3c   : > { %p9669_p12 = pnand %p9668_p6, %p9664_p10 }
  0x3e   : > { %9672 = shalt.err (!%p9669_p12)
}
  0x3f   : > { %s9673_s17 = scalar_lea.vmem %s9891_s28, 3328  ;;  %s9762_s21 = smov [#allocation4]  }
  0x40   : > { %p9674_p7 = scmp.ne.s32.totalorder %s9891_s28, %s9673_s17  ;;  %s9678_s22 = sshll.u32 %s9762_s21, 4  ;;  %s9679_s22 = int_to_ptr.vmem [resolvable:$false] %s9678_s22 }
  0x41   : > { %s9680_s24 = scalar_lea.vmem %s9679_s22, 6656  ;;  %p9681_p5 = scmp.lt.s32.totalorder %s9891_s28, %s9679_s22 }
  0x42   : > { %p9676_p9 = pnand %p9674_p7, %p9662_p0  ;;  %p9682_p3 = scmp.lt.s32.totalorder %s9680_s24, %s9673_s17 }
  0x44   : > { %p9677_p13 = pneg %p9676_p9  ;;  %p9683_p4 = por %p9682_p3, %p9681_p5 }
  0x46   : > { %p9684_p8 = pnand %p9683_p4, %p9677_p13 }
  0x48   : > { %9687 = shalt.err (!%p9684_p8)
}
  0x49   : > { %s9763_s25 = smov 256   ;;  %s9764_s27 = smov 16  }
  0x4a   : > { %8625 = dma.hbm_to_vmem [thread:$0]  (!%p9882_p11), %s9889_s26, 3328, %s9891_s28, %s9893_s29, %s9763_s25, %s9763_s25, %s9764_s27  }
  0x4b   : > { %p12485_p0 = scmp.ne.s32.totalorder %s12480_s20, 0 }
  0x4d   : > { %180 = sbr.rel (%p12485_p0) target bundleno = 1172 (0x494), region = 32 }
  0x52   : > { %s9917_s30 = sand.u32 1, %s9748_s13   ;;  %p12486_p4 = scmp.ne.s32.totalorder %s12478_s18, 0 }
  0x53   : > { %s8581_s4 = smul.u32 208, %s9917_s30  ;;  %s183_s5 = scalar_lea.sflag [#allocation5], %s9917_s30 }
  0x55   : > { %s9921_s6 = scalar_lea.vmem [#allocation4], %s8581_s4 }
  0x56   : > { %9731 = dma.done.wait (%p12486_p4), %s183_s5, 3328  }
  0x57   : > { %9733 = vsyncadd (%p12486_p4), %s183_s5, 4294963968  ;;  %p12487_p8 = scmp.eq.s32.totalorder %s9811_s16, 0 }
  0x59   : > { %9735 = dma.done.wait (%p12487_p8), [#allocation8], 73856   ;;  %p12488_p3 = pmov %p12487_p8 }
  0x5a   : > { %v8678_v0 = vld [vmem:[#allocation7 + $0x174] ss:$8 sps:$4 sm:$0xff]   ;;  %v8682_v2 = vld [vmem:[#allocation7 + $0x170] ss:$8 sps:$4 sm:$0xff]   ;;  %v8684_v4 = vld [vmem:[#allocation7 + $0x164] ss:$8 sps:$4 sm:$0xff]  }
  0x5b   : > { %9737 = vsyncadd (%p12488_p3), [#allocation8], 4294893440  ;;  %v8680_v1 = vld [vmem:[#allocation7 + $0x74] ss:$8 sps:$4 sm:$0xff]   ;;  %968 = vmatprep.subr.bf16.mxu0 %v8678_v0  ;;  %v8683_v3 = vld [vmem:[#allocation7 + $0x70] ss:$8 sps:$4 sm:$0xff]  }
  0x5c   : > { %1221 = vmatprep.subr.bf16.mxu1 %v8680_v1  ;;  %969 = vmatpush1.bf16.msra.mxu0 %v8682_v2  ;;  %v8686_v5 = vld [vmem:[#allocation7 + $0x64] ss:$8 sps:$4 sm:$0xff]   ;;  %v8688_v6 = vld [vmem:[#allocation7 + $0x160] ss:$8 sps:$4 sm:$0xff]   ;;  %v8690_v8 = vld [vmem:[#allocation7 + $0x154] ss:$8 sps:$4 sm:$0xff]  }
  0x5d   : > { %1222 = vmatpush1.bf16.msra.mxu1 %v8683_v3  ;;  %970 = vmatprep.subr.bf16.mxu0 %v8684_v4  ;;  %v8689_v7 = vld [vmem:[#allocation7 + $0x60] ss:$8 sps:$4 sm:$0xff]   ;;  %v8692_v9 = vld [vmem:[#allocation7 + $0x54] ss:$8 sps:$4 sm:$0xff]   ;;  %v8694_v10 = vld [vmem:[#allocation7 + $0x150] ss:$8 sps:$4 sm:$0xff]  }
  0x5e   : > { %1223 = vmatprep.subr.bf16.mxu1 %v8686_v5  ;;  %v8695_v11 = vld [vmem:[#allocation7 + $0x50] ss:$8 sps:$4 sm:$0xff]   ;;  %v8696_v12 = vld [vmem:[#allocation7 + $0x144] ss:$8 sps:$4 sm:$0xff]   ;;  %v8700_v14 = vld [vmem:[#allocation7 + $0x140] ss:$8 sps:$4 sm:$0xff]  }
  0x5f   : > { %v8698_v13 = vld [vmem:[#allocation7 + $0x44] ss:$8 sps:$4 sm:$0xff]   ;;  %v8701_v15 = vld [vmem:[#allocation7 + $0x40] ss:$8 sps:$4 sm:$0xff]   ;;  %v8702_v16 = vld [vmem:[#allocation7 + $0x134] ss:$8 sps:$4 sm:$0xff]  }
  0x60   : > { %971 = vmatpush1.bf16.msra.mxu0 %v8688_v6  ;;  %v8704_v17 = vld [vmem:[#allocation7 + $0x34] ss:$8 sps:$4 sm:$0xff]   ;;  %v8706_v18 = vld [vmem:[#allocation7 + $0x130] ss:$8 sps:$4 sm:$0xff]   ;;  %v8708_v20 = vld [vmem:[#allocation7 + $0x124] ss:$8 sps:$4 sm:$0xff]  }
  0x61   : > { %1224 = vmatpush1.bf16.msra.mxu1 %v8689_v7  ;;  %972 = vmatprep.subr.bf16.mxu0 %v8690_v8  ;;  %v8707_v19 = vld [vmem:[#allocation7 + $0x30] ss:$8 sps:$4 sm:$0xff]   ;;  %v8710_v21 = vld [vmem:[#allocation7 + $0x24] ss:$8 sps:$4 sm:$0xff]   ;;  %v8712_v22 = vld [vmem:[#allocation7 + $0x120] ss:$8 sps:$4 sm:$0xff]  }
  0x62   : > { %1225 = vmatprep.subr.bf16.mxu1 %v8692_v9  ;;  %v8713_v23 = vld [vmem:[#allocation7 + $0x20] ss:$8 sps:$4 sm:$0xff]   ;;  %v8714_v24 = vld [vmem:[#allocation7 + $0x114] ss:$8 sps:$4 sm:$0xff]   ;;  %v8718_v26 = vld [vmem:[#allocation7 + $0x110] ss:$8 sps:$4 sm:$0xff]  }
  0x63   : > { %v8716_v25 = vld [vmem:[#allocation7 + $0x14] ss:$8 sps:$4 sm:$0xff]   ;;  %v8719_v27 = vld [vmem:[#allocation7 + $0x10] ss:$8 sps:$4 sm:$0xff]   ;;  %v8720_v28 = vld [vmem:[#allocation7 + $0x104] ss:$8 sps:$4 sm:$0xff]  }
  0x64   : > { %973 = vmatpush1.bf16.msra.mxu0 %v8694_v10  ;;  %v8722_v29 = vld [vmem:[#allocation7 + $0x4] ss:$8 sps:$4 sm:$0xff]   ;;  %v8724_v30 = vld [vmem:[#allocation7 + $0x100] ss:$8 sps:$4 sm:$0xff]   ;;  %v8726_v32 = vld [vmem:[#allocation7 + $0x1f4] ss:$8 sps:$4 sm:$0xff]  }
  0x65   : > { %1226 = vmatpush1.bf16.msra.mxu1 %v8695_v11  ;;  %974 = vmatprep.subr.bf16.mxu0 %v8696_v12  ;;  %v8725_v31 = vld [vmem:[#allocation7] ss:$8 sps:$4 sm:$0xff]   ;;  %v8728_v33 = vld [vmem:[#allocation7 + $0xf4] ss:$8 sps:$4 sm:$0xff]   ;;  %v8730_v34 = vld [vmem:[#allocation7 + $0x1f0] ss:$8 sps:$4 sm:$0xff]  }
  0x66   : > { %1227 = vmatprep.subr.bf16.mxu1 %v8698_v13  ;;  %v8731_v35 = vld [vmem:[#allocation7 + $0xf0] ss:$8 sps:$4 sm:$0xff]   ;;  %v8732_v36 = vld [vmem:[#allocation7 + $0x1e4] ss:$8 sps:$4 sm:$0xff]   ;;  %v8736_v38 = vld [vmem:[#allocation7 + $0x1e0] ss:$8 sps:$4 sm:$0xff]  }
  0x67   : > { %v8734_v37 = vld [vmem:[#allocation7 + $0xe4] ss:$8 sps:$4 sm:$0xff]   ;;  %v8737_v39 = vld [vmem:[#allocation7 + $0xe0] ss:$8 sps:$4 sm:$0xff]   ;;  %v8738_v40 = vld [vmem:[#allocation7 + $0x1d4] ss:$8 sps:$4 sm:$0xff]  }
  0x68   : > { %975 = vmatpush1.bf16.msra.mxu0 %v8700_v14  ;;  %v8740_v41 = vld [vmem:[#allocation7 + $0xd4] ss:$8 sps:$4 sm:$0xff]   ;;  %v8742_v42 = vld [vmem:[#allocation7 + $0x1d0] ss:$8 sps:$4 sm:$0xff]   ;;  %v8744_v44 = vld [vmem:[#allocation7 + $0x1c4] ss:$8 sps:$4 sm:$0xff]  }
  0x69   : > { %1228 = vmatpush1.bf16.msra.mxu1 %v8701_v15  ;;  %976 = vmatprep.subr.bf16.mxu0 %v8702_v16  ;;  %v8743_v43 = vld [vmem:[#allocation7 + $0xd0] ss:$8 sps:$4 sm:$0xff]   ;;  %v8746_v45 = vld [vmem:[#allocation7 + $0xc4] ss:$8 sps:$4 sm:$0xff]   ;;  %v8748_v46 = vld [vmem:[#allocation7 + $0x1c0] ss:$8 sps:$4 sm:$0xff]  }
  0x6a   : > { %1229 = vmatprep.subr.bf16.mxu1 %v8704_v17  ;;  %v8749_v47 = vld [vmem:[#allocation7 + $0xc0] ss:$8 sps:$4 sm:$0xff]   ;;  %v8750_v49 = vld [vmem:[#allocation7 + $0x1b4] ss:$8 sps:$4 sm:$0xff]   ;;  %v8754_v63 = vld [vmem:[#allocation7 + $0x1b0] ss:$8 sps:$4 sm:$0xff]  }
  0x6b   : > { %v470_v48 = vld [vmem:[%s9921_s6] sm:$0xff]  ;;  %v471_v51 = vld [vmem:[%s9921_s6 + $0x8] sm:$0xff]  ;;  %v472_v52 = vld [vmem:[%s9921_s6 + $0x10] sm:$0xff]  ;;  %vm12462_vm0 = vsmask.f32 7424  ;;  %vm12460_vm1 = vcmask 1046528  }
  0x6c   : > { %977 = vmatpush1.bf16.msra.mxu0 %v8706_v18  ;;  %v8752_v50 = vld [vmem:[#allocation7 + $0xb4] ss:$8 sps:$4 sm:$0xff]   ;;  %v8553_v57 = vpack.c.bf16 %v471_v51, %v470_v48  ;;  %v8755_v0 = vld [vmem:[#allocation7 + $0xb0] ss:$8 sps:$4 sm:$0xff]   ;;  %v8756_v1 = vld [vmem:[#allocation7 + $0x1a4] ss:$8 sps:$4 sm:$0xff]   ;;  %v9592_v5 = vpack.c.bf16 %v472_v52, %v470_v48 }
  0x6d   : > { %1230 = vmatpush1.bf16.msra.mxu1 %v8707_v19  ;;  %978 = vmatprep.subr.bf16.mxu0 %v8708_v20  ;;  %v473_v53 = vld [vmem:[%s9921_s6 + $0x18] sm:$0xff]  ;;  %v474_v54 = vld [vmem:[%s9921_s6 + $0x20] sm:$0xff]  ;;  %v475_v55 = vld [vmem:[%s9921_s6 + $0x28] sm:$0xff]  ;;  %vm12457_vm2 = vcmask 1045504   ;;  %vm12456_vm3 = vsmask.f32 6400 }
  0x6e   : > { %1231 = vmatprep.subr.bf16.mxu1 %v8710_v21  ;;  %v9938_v56 = vld [vmem:[%s9921_s6 + $0x30] sm:$0xff]  ;;  %v9940_v58 = vpack.c.bf16 %v473_v53, %v472_v52  ;;  %v9943_v59 = vld [vmem:[%s9921_s6 + $0x38] sm:$0xff]  ;;  %v9945_v60 = vpack.c.bf16 %v475_v55, %v474_v54  ;;  %576 = vst [vmem:[#allocation2 + $0x30] sm:$0xff] %v8553_v57  ;;  %v9590_v62 = vpack.c.bf16 %v473_v53, %v471_v51  ;;  %v713_v14 = vshll.u32 %v9592_v5, 16  ;;  %v9992_v57 = vld [vmem:[%s9921_s6 + $0x68] sm:$0xff]  ;;  %s8582_s18 = smul.u32 160, %s9917_s30 }
  0x6f   : > { %v8556_v61 = vpack.c.bf16 %v9943_v59, %v9938_v56  ;;  %v9952_v2 = vpack.c.bf16 %v9943_v59, %v475_v55  ;;  %v8758_v6 = vld [vmem:[#allocation7 + $0xa4] ss:$8 sps:$4 sm:$0xff]   ;;  %v8760_v9 = vld [vmem:[#allocation7 + $0x1a0] ss:$8 sps:$4 sm:$0xff]   ;;  %v9956_v13 = vpack.c.bf16 %v9938_v56, %v474_v54  ;;  %v8762_v15 = vld [vmem:[#allocation7 + $0x194] ss:$8 sps:$4 sm:$0xff]  }
  0x70   : > { %979 = vmatpush1.bf16.msra.mxu0 %v8712_v22  ;;  %577 = vst [vmem:[#allocation2] sm:$0xff] %v9940_v58  ;;  %578 = vst [vmem:[#allocation2 + $0x58] sm:$0xff] %v9945_v60  ;;  %v723_v3 = vshrl.u32 %v9590_v62, 16  ;;  %v725_v4 = vshll.u32 %v9590_v62, 16  ;;  %1253 = vmatprep.mubr.bf16.mxu1 %v9590_v62  ;;  %v8761_v10 = vld [vmem:[#allocation7 + $0xa0] ss:$8 sps:$4 sm:$0xff]  }
  0x71   : > { %1232 = vmatpush1.bf16.msra.mxu1 %v8713_v23  ;;  %980 = vmatprep.subr.bf16.mxu0 %v8714_v24  ;;  %579 = vst [vmem:[#allocation2 + $0x18] sm:$0xff] %v8556_v61  ;;  %v730_v8 = vshll.u32 %v9952_v2, 16  ;;  %v8764_v16 = vld [vmem:[#allocation7 + $0x94] ss:$8 sps:$4 sm:$0xff]   ;;  %v8766_v17 = vld [vmem:[#allocation7 + $0x190] ss:$8 sps:$4 sm:$0xff]  }
  0x72   : > { %1233 = vmatprep.subr.bf16.mxu1 %v8716_v25  ;;  %v727_v7 = vrot.slane %v725_v4, 1  ;;  %v8767_v19 = vld [vmem:[#allocation7 + $0x90] ss:$8 sps:$4 sm:$0xff]   ;;  %v711_v20 = vshrl.u32 %v9592_v5, 16  ;;  %v715_v21 = vrot.slane %v713_v14, 1  ;;  %v718_v22 = vshll.u32 %v9956_v13, 16 }
  0x73   : > { %v732_v12 = vrot.slane %v730_v8, 1  ;;  %v8768_v23 = vld [vmem:[#allocation7 + $0x184] ss:$8 sps:$4 sm:$0xff]   ;;  %v8772_v25 = vld [vmem:[#allocation7 + $0x180] ss:$8 sps:$4 sm:$0xff]   ;;  %v1344_v8 = vrot.slane %v9956_v13, 1 }
  0x74   : > { %981 = vmatpush1.bf16.msra.mxu0 %v8718_v26  ;;  %v728_v11 = vor.u32 %v727_v7, %v723_v3  ;;  %v8770_v24 = vld [vmem:[#allocation7 + $0x84] ss:$8 sps:$4 sm:$0xff]   ;;  %v8773_v26 = vld [vmem:[#allocation7 + $0x80] ss:$8 sps:$4 sm:$0xff]   ;;  %v8788_v48 = vld [vmem:[#allocation7 + $0x254] ss:$8 sps:$4 sm:$0xff]  }
  0x75   : > { %1234 = vmatpush1.bf16.msra.mxu1 %v8719_v27  ;;  %982 = vmatprep.subr.bf16.mxu0 %v8720_v28  ;;  %v716_v27 = vor.u32 %v715_v21, %v711_v20  ;;  %v720_v28 = vrot.slane %v718_v22, 1  ;;  %v8786_v54 = vld [vmem:[#allocation7 + $0x250] ss:$8 sps:$4 sm:$0xff]   ;;  %v8792_v14 = vld [vmem:[#allocation7 + $0x240] ss:$8 sps:$4 sm:$0xff]   ;;  %vm12455_vm4 = vcmask 1044480  }
  0x76   : > { %1235 = vmatprep.subr.bf16.mxu1 %v8722_v29  ;;  %v733_v18 = vsel %vm12462_vm0, %v728_v11, %v732_v12  ;;  %v8776_v29 = vld [vmem:[#allocation7 + $0x274] ss:$8 sps:$4 sm:$0xff]   ;;  %v8789_v4 = vld [vmem:[#allocation7 + $0x350] ss:$8 sps:$4 sm:$0xff]   ;;  %vm12454_vm5 = vsmask.f32 5376 }
  0x77   : > { %1000 = vmatprep.mubr.bf16.mxu0 %v733_v18  ;;  %v482_v55 = vld [vmem:[%s9921_s6 + $0x60] sm:$0xff]  ;;  %v9995_v61 = vld [vmem:[%s9921_s6 + $0x70] sm:$0xff]  ;;  %vm449_vm6 = vcmask 1041408   ;;  %vm12463_vm7 = vsmask.f32 1280  ;;  %vm452_vm9 = vcmask 1045508  }
  0x78   : > { %983 = vmatpush1.bf16.msra.mxu0 %v8724_v30  ;;  %v8779_v30 = vld [vmem:[#allocation7 + $0x374] ss:$8 sps:$4 sm:$0xff]   ;;  %v8795_v18 = vld [vmem:[#allocation7 + $0x340] ss:$8 sps:$4 sm:$0xff]   ;;  %vm10627_vm8 = vmand %vm449_vm6, %vm12463_vm7  ;;  %vm459_vm10 = vcmask 1043457   ;;  %vm462_vm13 = vcmask 1047557  }
  0x79   : > { %1236 = vmatpush1.bf16.msra.mxu1 %v8725_v31  ;;  %984 = vmatprep.subr.bf16.mxu0 %v8726_v32  ;;  %v8774_v31 = vld [vmem:[#allocation7 + $0x270] ss:$8 sps:$4 sm:$0xff]   ;;  %v8800_v21 = vld [vmem:[#allocation7 + $0x234] ss:$8 sps:$4 sm:$0xff]   ;;  %vm460_vm11 = vsmask.f32 7942  ;;  %vm10637_vm12 = vmand %vm452_vm9, %vm12454_vm5 }
  0x7a   : > { %1237 = vmatprep.subr.bf16.mxu1 %v8728_v33  ;;  %v8777_v32 = vld [vmem:[#allocation7 + $0x370] ss:$8 sps:$4 sm:$0xff]   ;;  %v8782_v33 = vld [vmem:[#allocation7 + $0x264] ss:$8 sps:$4 sm:$0xff]   ;;  %v8803_v22 = vld [vmem:[#allocation7 + $0x334] ss:$8 sps:$4 sm:$0xff]  }
  0x7b   : > { %vm463_vm14 = vsmask.f32 7958  ;;  %vm12461_vm15 = vmor %vm10637_vm12, %vm10627_vm8  ;;  %s12236_s20 = scalar_lea.vmem [#allocation10], %s8582_s18  ;;  %s8579_s23 = smul.u32 2560, %s9811_s16 }
  0x7c   : > { %985 = vmatpush2.bf16.msra.mxu0 %v8730_v34  ;;  %v9961_v34 = vld [vmem:[%s9921_s6 + $0x40] sm:$0xff]  ;;  %vm10653_vm6 = vmand %vm459_vm10, %vm460_vm11  ;;  %s7744_s26 = sshll.u32 %s12236_s20, 4  ;;  %s7730_s16 = scalar_lea.sflag [#allocation6], %s9917_s30  ;;  %s12396_s26 = int_to_ptr.vmem [resolvable:$true] %s7744_s26 }
  0x7d   : > { %1238 = vmatpush2.bf16.msra.mxu1 %v8731_v35  ;;  %986 = vmatprep.subr.bf16.mxu0 %v8732_v36  ;;  %v9964_v35 = vld [vmem:[%s9921_s6 + $0x48] sm:$0xff]  ;;  %v9967_v36 = vld [vmem:[%s9921_s6 + $0x50] sm:$0xff]  ;;  %vm10659_vm9 = vmand %vm462_vm13, %vm463_vm14  ;;  %s12394_s8 = scalar_lea.hbm %s12443_s3, %s8579_s23  ;;  %s9688_s9 = scalar_lea.vmem %s12396_s26, 2560 }
  0x7e   : > { %1239 = vmatprep.subr.bf16.mxu1 %v8734_v37  ;;  %v721_v37 = vsel %vm12462_vm0, %v716_v27, %v720_v28  ;;  %v10029_v20 = vpack.c.bf16 %v482_v55, %v9967_v36  ;;  %v486_v27 = vld [vmem:[%s9921_s6 + $0x80] sm:$0xff]  ;;  %vm12464_vm10 = vmor %vm10659_vm9, %vm10653_vm6  ;;  %p9689_p11 = scmp.ne.s32.totalorder %s12396_s26, %s9688_s9  ;;  %p12787_p10 = scmp.ne.s32.totalorder %s12483_s10, 0 }
  0x7f   : > { %s9767_s17 = smov [#allocation10]  }
  0x80   : > { %987 = vmatpush2.bf16.msra.mxu0 %v8736_v38  ;;  %v9971_v38 = vld [vmem:[%s9921_s6 + $0x58] sm:$0xff]  ;;  %p9690_p1 = pnand %p9689_p11, %p12787_p10  ;;  %s9692_s21 = sshll.u32 %s9767_s17, 4  ;;  %s9693_s21 = int_to_ptr.vmem [resolvable:$false] %s9692_s21 }
  0x81   : > { %1240 = vmatpush2.bf16.msra.mxu1 %v8737_v39  ;;  %988 = vmatprep.subr.bf16.mxu0 %v8738_v40  ;;  %v8557_v39 = vpack.c.bf16 %v9964_v35, %v9961_v34  ;;  %v8785_v40 = vld [vmem:[#allocation7 + $0x364] ss:$8 sps:$4 sm:$0xff]   ;;  %s9694_s22 = scalar_lea.vmem %s9693_s21, 5120  ;;  %p9695_p6 = scmp.lt.s32.totalorder %s12396_s26, %s9693_s21 }
  0x82   : > { %1241 = vmatprep.subr.bf16.mxu1 %v8740_v41  ;;  %v8558_v41 = vpack.c.bf16 %v9971_v38, %v9967_v36  ;;  %p9691_p2 = pneg %p9690_p1  ;;  %p9696_p12 = scmp.lt.s32.totalorder %s9694_s22, %s9688_s9 }
  0x83   : > { %580 = vst [vmem:[#allocation2 + $0x50] sm:$0xff] %v8557_v39 }
  0x84   : > { %989 = vmatpush2.bf16.msra.mxu0 %v8742_v42  ;;  %v742_v42 = vshrl.u32 %v9952_v2, 16  ;;  %581 = vst [vmem:[#allocation2 + $0x20] sm:$0xff] %v8558_v41  ;;  %v8806_v41 = vld [vmem:[#allocation7 + $0x224] ss:$8 sps:$4 sm:$0xff]   ;;  %p9697_p7 = por %p9696_p12, %p9695_p6 }
  0x85   : > { %1242 = vmatpush2.bf16.msra.mxu1 %v8743_v43  ;;  %990 = vmatprep.subr.bf16.mxu0 %v8744_v44  ;;  %v734_v43 = vshrl.u32 %v9956_v13, 16  ;;  %v8780_v44 = vld [vmem:[#allocation7 + $0x260] ss:$8 sps:$4 sm:$0xff]  }
  0x86   : > { %1243 = vmatprep.subr.bf16.mxu1 %v8746_v45  ;;  %v9981_v45 = vpack.c.bf16 %v9971_v38, %v9964_v35  ;;  %p9698_p9 = pnand %p9697_p7, %p9691_p2 }
  0x87   : > { %v736_v52 = vor.u32 %v734_v43, %v720_v28  ;;  %v487_v28 = vld [vmem:[%s9921_s6 + $0x88] sm:$0xff] }
  0x88   : > { %991 = vmatpush2.bf16.msra.mxu0 %v8748_v46  ;;  %v9985_v46 = vpack.c.bf16 %v9967_v36, %v9961_v34  ;;  %v746_v51 = vshll.u32 %v9981_v45, 16  ;;  %v8798_v36 = vld [vmem:[#allocation7 + $0x230] ss:$8 sps:$4 sm:$0xff]  }
  0x89   : > { %1244 = vmatpush2.bf16.msra.mxu1 %v8749_v47  ;;  %992 = vmatprep.subr.bf16.mxu0 %v8750_v49  ;;  %v8783_v47 = vld [vmem:[#allocation7 + $0x360] ss:$8 sps:$4 sm:$0xff]   ;;  %v8791_v49 = vld [vmem:[#allocation7 + $0x354] ss:$8 sps:$4 sm:$0xff]  }
  0x8a   : > { %1245 = vmatprep.subr.bf16.mxu1 %v8752_v50  ;;  %v744_v50 = vor.u32 %v742_v42, %v732_v12  ;;  %v738_v53 = vshll.u32 %v9985_v46, 16  ;;  %v748_v62 = vrot.slane %v746_v51, 1  ;;  %v1349_v3 = vrot.slane %v9985_v46, 1  ;;  %v8804_v51 = vld [vmem:[#allocation7 + $0x220] ss:$8 sps:$4 sm:$0xff]  }
  0x8b   : > { %v750_v7 = vshrl.u32 %v9985_v46, 16 }
  0x8c   : > { %993 = vmatpush2.bf16.msra.mxu0 %v8754_v63  ;;  %v740_v63 = vrot.slane %v738_v53, 1  ;;  %v749_v11 = vsel %vm12462_vm0, %v744_v50, %v748_v62 }
  0x8d   : > { %1246 = vmatpush2.bf16.msra.mxu1 %v8755_v0  ;;  %994 = vmatprep.subr.bf16.mxu0 %v8756_v1  ;;  %v9998_v0 = vld [vmem:[%s9921_s6 + $0x78] sm:$0xff]  ;;  %v8559_v1 = vpack.c.bf16 %v9992_v57, %v482_v55 }
  0x8e   : > { %1247 = vmatprep.subr.bf16.mxu1 %v8758_v6  ;;  %v758_v6 = vshrl.u32 %v9981_v45, 16  ;;  %v741_v12 = vsel %vm12462_vm0, %v736_v52, %v740_v63 }
  0x8f   : > { %582 = vst [vmem:[#allocation2 + $0x8] sm:$0xff] %v8559_v1 }
  0x90   : > { %995 = vmatpush2.bf16.msra.mxu0 %v8760_v9  ;;  %v8794_v9 = vld [vmem:[#allocation7 + $0x244] ss:$8 sps:$4 sm:$0xff]  }
  0x91   : > { %1248 = vmatpush2.bf16.msra.mxu1 %v8761_v10  ;;  %996 = vmatprep.subr.bf16.mxu0 %v8762_v15  ;;  %v8797_v10 = vld [vmem:[#allocation7 + $0x344] ss:$8 sps:$4 sm:$0xff]   ;;  %v10011_v15 = vpack.c.bf16 %v9998_v0, %v9992_v57 }
  0x92   : > { %1249 = vmatprep.subr.bf16.mxu1 %v8764_v16  ;;  %v10014_v16 = vpack.c.bf16 %v9995_v61, %v482_v55  ;;  %v8807_v55 = vld [vmem:[#allocation7 + $0x320] ss:$8 sps:$4 sm:$0xff]  }
  0x94   : > { %997 = vmatpush2.bf16.msra.mxu0 %v8766_v17  ;;  %v10021_v17 = vsel %vm12460_vm1, %v1344_v8, %v1349_v3 }
  0x95   : > { %1250 = vmatpush2.bf16.msra.mxu1 %v8767_v19  ;;  %998 = vmatprep.subr.bf16.mxu0 %v8768_v23  ;;  %v10026_v19 = vpack.c.bf16 %v9961_v34, %v9938_v56  ;;  %v760_v23 = vor.u32 %v758_v6, %v748_v62  ;;  %v488_v56 = vld [vmem:[%s9921_s6 + $0x90] sm:$0xff]  ;;  %v1732_v34 = vrot.slane %v10029_v20, 1  ;;  %v490_v6 = vld [vmem:[%s9921_s6 + $0xa0] sm:$0xff] }
  0x96   : > { %1251 = vmatprep.subr.bf16.mxu1 %v8770_v24  ;;  %v762_v24 = vshll.u32 %v10011_v15, 16  ;;  %v10047_v50 = vpack.c.bf16 %v488_v56, %v486_v27  ;;  %v8812_v62 = vld [vmem:[#allocation7 + $0x214] ss:$8 sps:$4 sm:$0xff]  }
  0x98   : > { %999 = vmatpush2.bf16.msra.mxu0 %v8772_v25  ;;  %v752_v25 = vor.u32 %v750_v7, %v740_v63  ;;  %v491_v7 = vld [vmem:[%s9921_s6 + $0xa8] sm:$0xff] }
  0x99   : > { %1252 = vmatpush2.bf16.msra.mxu1 %v8773_v26  ;;  %1535 = vmatprep.subr.bf16.mxu0 %v8776_v29  ;;  %v754_v26 = vshll.u32 %v10014_v16, 16  ;;  %v774_v29 = vshrl.u32 %v10011_v15, 16 }
  0x9a   : > { %1918 = vmatprep.subr.bf16.mxu1 %v8779_v30  ;;  %v764_v30 = vrot.slane %v762_v24, 1  ;;  %v10079_v24 = vpack.c.bf16 %v490_v6, %v488_v56 }
  0x9b   : > { %1001 = vmatmul.mubr.bf16.vlgmr.msra.gmra.mxu0 %v721_v37  ;;  %v8801_v37 = vld [vmem:[#allocation7 + $0x330] ss:$8 sps:$4 sm:$0xff]  }
  0x9c   : > { %1254 = vmatmul.mubr.bf16.vlgmr.msra.gmra.mxu1 %v9592_v5  ;;  %1536 = vmatpush1.bf16.msra.mxu0 %v8774_v31  ;;  %v8560_v5 = vpack.c.bf16 %v9998_v0, %v9995_v61  ;;  %v756_v31 = vrot.slane %v754_v26, 1  ;;  %v765_v42 = vsel %vm12462_vm0, %v760_v23, %v764_v30  ;;  %v776_v52 = vor.u32 %v774_v29, %v764_v30  ;;  %v8816_v30 = vld [vmem:[#allocation7 + $0x200] ss:$8 sps:$4 sm:$0xff]  }
  0x9d   : > { %1919 = vmatpush1.bf16.msra.mxu1 %v8777_v32  ;;  %1537 = vmatprep.subr.bf16.mxu0 %v8782_v33  ;;  %v489_v32 = vld [vmem:[%s9921_s6 + $0x98] sm:$0xff]  ;;  %v8561_v33 = vpack.c.bf16 %v487_v28, %v486_v27  ;;  %v1357_v26 = vrot.slane %v10047_v50, 1  ;;  %v1740_v29 = vrot.slane %v10079_v24, 1 }
  0x9e   : > { %1920 = vmatprep.subr.bf16.mxu1 %v8785_v40  ;;  %1263 = vmatprep.mubr.bf16.mxu1 %v9952_v2  ;;  %583 = vst [vmem:[#allocation2 + $0x38] sm:$0xff] %v8560_v5  ;;  %v8562_v39 = vpack.c.bf16 %v489_v32, %v488_v56  ;;  %v766_v40 = vshrl.u32 %v10014_v16, 16  ;;  %v757_v43 = vsel %vm12462_vm0, %v752_v25, %v756_v31  ;;  %v8821_v25 = vld [vmem:[#allocation7 + $0x304] ss:$8 sps:$4 sm:$0xff]  }
  0x9f   : > { %1010 = vmatprep.mubr.bf16.mxu0 %v749_v11  ;;  %584 = vst [vmem:[#allocation2 + $0x28] sm:$0xff] %v8561_v33  ;;  %v10063_v5 = vpack.c.bf16 %v486_v27, %v9995_v61  ;;  %v8563_v11 = vpack.c.bf16 %v491_v7, %v490_v6  ;;  %v10077_v23 = vpack.c.bf16 %v491_v7, %v489_v32  ;;  %v8828_v7 = vld [vmem:[#allocation7 + $0x2e0] ss:$8 sps:$4 sm:$0xff]  }
  0xa0   : > { %1538 = vmatpush1.bf16.msra.mxu0 %v8780_v44  ;;  %v1727_v44 = vrot.slane %v10026_v19, 1  ;;  %585 = vst [vmem:[#allocation2 + $0x48] sm:$0xff] %v8562_v39  ;;  %v768_v1 = vor.u32 %v766_v40, %v756_v31  ;;  %v8819_v31 = vld [vmem:[#allocation7 + $0x300] ss:$8 sps:$4 sm:$0xff]   ;;  %v8822_v39 = vld [vmem:[#allocation7 + $0x2f0] ss:$8 sps:$4 sm:$0xff]  }
  0xa1   : > { %1921 = vmatpush1.bf16.msra.mxu1 %v8783_v47  ;;  %1539 = vmatprep.subr.bf16.mxu0 %v8788_v48  ;;  %v1353_v47 = vrot.slane %v10014_v16, 1  ;;  %v8809_v48 = vld [vmem:[#allocation7 + $0x324] ss:$8 sps:$4 sm:$0xff]   ;;  %586 = vst [vmem:[#allocation2 + $0x10] sm:$0xff] %v8563_v11  ;;  %v8831_v11 = vld [vmem:[#allocation7 + $0x3e0] ss:$8 sps:$4 sm:$0xff]  }
  0xa2   : > { %1922 = vmatprep.subr.bf16.mxu1 %v8791_v49  ;;  %v10045_v49 = vpack.c.bf16 %v489_v32, %v487_v28  ;;  %v10052_v53 = vsel %vm12460_vm1, %v1727_v44, %v1732_v34 }
  0xa3   : > { %1011 = vmatmul.mubr.bf16.gmra.mxu0 %v741_v12  ;;  %v1736_v12 = vrot.slane %v10063_v5, 1  ;;  %v10089_v56 = vsel %vm12460_vm1, %v1353_v47, %v1357_v26 }
  0xa4   : > { %1264 = vmatmul.mubr.bf16.gmra.mxu1 %v9956_v13  ;;  %1540 = vmatpush1.bf16.msra.mxu0 %v8786_v54  ;;  %v10057_v54 = vsel %vm12460_vm1, %v1349_v3, %v1353_v47  ;;  %v778_v63 = vshll.u32 %v10045_v49, 16  ;;  %v8815_v3 = vld [vmem:[#allocation7 + $0x314] ss:$8 sps:$4 sm:$0xff]   ;;  %v790_v32 = vshrl.u32 %v10045_v49, 16  ;;  %v8830_v47 = vld [vmem:[#allocation7 + $0x2e4] ss:$8 sps:$4 sm:$0xff]  }
  0xa5   : > { %1923 = vmatpush1.bf16.msra.mxu1 %v8789_v4  ;;  %1541 = vmatprep.subr.bf16.mxu0 %v8794_v9  ;;  %v770_v4 = vshll.u32 %v10047_v50, 16 }
  0xa6   : > { %1924 = vmatprep.subr.bf16.mxu1 %v8797_v10  ;;  %1273 = vmatprep.mubr.bf16.mxu1 %v9981_v45  ;;  %v780_v9 = vrot.slane %v778_v63, 1  ;;  %v10116_v63 = vld [vmem:[#allocation2] sm:$0xee] }
  0xa7   : > { %1020 = vmatprep.mubr.bf16.mxu0 %v765_v42  ;;  %v772_v10 = vrot.slane %v770_v4, 1  ;;  %v10108_v42 = vpack.c.bf16 %v9964_v35, %v9943_v59 }
  0xa8   : > { %1542 = vmatpush1.bf16.msra.mxu0 %v8792_v14  ;;  %v781_v61 = vsel %vm12462_vm0, %v776_v52, %v780_v9  ;;  %v631_v40 = vld [vmem:[#allocation2 + $0x10] sm:$0x11] }
  0xa9   : > { %1925 = vmatpush1.bf16.msra.mxu1 %v8795_v18  ;;  %1543 = vmatprep.subr.bf16.mxu0 %v8800_v21  ;;  %v773_v14 = vsel %vm12462_vm0, %v768_v1, %v772_v10  ;;  %v8810_v18 = vld [vmem:[#allocation7 + $0x210] ss:$8 sps:$4 sm:$0xff]   ;;  %v8833_v1 = vld [vmem:[#allocation7 + $0x3e4] ss:$8 sps:$4 sm:$0xff]  }
  0xaa   : > { %1926 = vmatprep.subr.bf16.mxu1 %v8803_v22  ;;  %v8813_v21 = vld [vmem:[#allocation7 + $0x310] ss:$8 sps:$4 sm:$0xff]   ;;  %v10075_v22 = vsel %vm12460_vm1, %v1732_v34, %v1736_v12  ;;  %v8824_v34 = vld [vmem:[#allocation7 + $0x2f4] ss:$8 sps:$4 sm:$0xff]  }
  0xab   : > { %1021 = vmatmul.mubr.bf16.gmra.mxu0 %v757_v43  ;;  %v8825_v43 = vld [vmem:[#allocation7 + $0x3f0] ss:$8 sps:$4 sm:$0xff]  }
  0xac   : > { %1274 = vmatmul.mubr.bf16.gmra.mxu1 %v9985_v46  ;;  %1544 = vmatpush1.bf16.msra.mxu0 %v8798_v36  ;;  %v10069_v46 = vpack.c.bf16 %v487_v28, %v9998_v0  ;;  %v8818_v0 = vld [vmem:[#allocation7 + $0x204] ss:$8 sps:$4 sm:$0xff]   ;;  %v1742_v28 = vrot.slane %v10077_v23, 1  ;;  %v8827_v36 = vld [vmem:[#allocation7 + $0x3f4] ss:$8 sps:$4 sm:$0xff]  }
  0xad   : > { %1927 = vmatpush1.bf16.msra.mxu1 %v8801_v37  ;;  %1545 = vmatprep.subr.bf16.mxu0 %v8806_v41  ;;  %v782_v37 = vshrl.u32 %v10047_v50, 16  ;;  %v1304_v41 = vld [vmem:[#allocation2 + $0x30] sm:$0xee] }
  0xae   : > { %1928 = vmatprep.subr.bf16.mxu1 %v8809_v48  ;;  %1283 = vmatprep.mubr.bf16.mxu1 %v10011_v15  ;;  %v1738_v27 = vrot.slane %v10069_v46, 1  ;;  %v10110_v48 = vcombine.high %v631_v40, %v631_v40  ;;  %v7945_v52 = vcombine.low %v1304_v41, %v9940_v58 }
  0xaf   : > { %1030 = vmatprep.mubr.bf16.mxu0 %v781_v61  ;;  %v784_v35 = vor.u32 %v782_v37, %v772_v10  ;;  %v8845_v37 = vld [vmem:[#allocation7 + $0x3c4] ss:$8 sps:$4 sm:$0xff]  }
  0xb0   : > { %1546 = vmatpush1.bf16.msra.mxu0 %v8804_v51  ;;  %v10097_v33 = vsel %vm12460_vm1, %v1738_v27, %v1742_v28  ;;  %v10112_v51 = vcombine.low %v631_v40, %v631_v40  ;;  %v794_v59 = vshll.u32 %v10110_v48, 16  ;;  %v1343_v6 = vrot.slane %v7945_v52, 1  ;;  %v8840_v40 = vld [vmem:[#allocation7 + $0x2c0] ss:$8 sps:$4 sm:$0xff]  }
  0xb1   : > { %1929 = vmatpush1.bf16.msra.mxu1 %v8807_v55  ;;  %1547 = vmatprep.subr.bf16.mxu0 %v8812_v62  ;;  %v7946_v55 = vcombine.high %v1304_v41, %v9940_v58  ;;  %v792_v62 = vor.u32 %v790_v32, %v780_v9  ;;  %v10123_v58 = vcombine.high %v10116_v63, %v9945_v60  ;;  %v1730_v9 = vrot.slane %v10108_v42, 1  ;;  %v8843_v41 = vld [vmem:[#allocation7 + $0x3c0] ss:$8 sps:$4 sm:$0xff]  }
  0xb2   : > { %1930 = vmatprep.subr.bf16.mxu1 %v8815_v3  ;;  %v786_v4 = vshll.u32 %v10112_v51, 16  ;;  %v1347_v3 = vrot.slane %v9952_v2, 1  ;;  %v10130_v10 = vsel %vm12460_vm1, %v1343_v6, %v1344_v8  ;;  %v8837_v8 = vld [vmem:[#allocation7 + $0x3d0] ss:$8 sps:$4 sm:$0xff]   ;;  %v10145_v52 = vpack.c.bf16 %v9992_v57, %v9971_v38 }
  0xb3   : > { %1031 = vmatmul.mubr.bf16.gmra.mxu0 %v773_v14  ;;  %v1346_v14 = vrot.slane %v7946_v55, 1  ;;  %v8846_v57 = vld [vmem:[#allocation7 + $0x2b0] ss:$8 sps:$4 sm:$0xff]  }
  0xb4   : > { %1284 = vmatmul.mubr.bf16.gmra.mxu1 %v10014_v16  ;;  %1548 = vmatpush1.bf16.msra.mxu0 %v8810_v18  ;;  %v10102_v16 = vsel %vm12460_vm1, %v1736_v12, %v1740_v29  ;;  %v796_v12 = vrot.slane %v794_v59, 1  ;;  %v788_v61 = vrot.slane %v786_v4, 1  ;;  %v8836_v18 = vld [vmem:[#allocation7 + $0x2d4] ss:$8 sps:$4 sm:$0xff]   ;;  %v2098_v59 = vshll.u32 %v10029_v20, 16 }
  0xb5   : > { %1931 = vmatpush1.bf16.msra.mxu1 %v8813_v21  ;;  %1549 = vmatprep.subr.bf16.mxu0 %v8818_v0  ;;  %v1729_v21 = vrot.slane %v10123_v58, 1  ;;  %v8839_v0 = vld [vmem:[#allocation7 + $0x3d4] ss:$8 sps:$4 sm:$0xff]   ;;  %v1348_v32 = vsel %vm12460_vm1, %v1346_v14, %v1347_v3  ;;  %v2479_v4 = vrot.slane %v10026_v19, 2  ;;  %v2486_v6 = vrot.slane %v10145_v52, 2 }
  0xb6   : > { %1932 = vmatprep.subr.bf16.mxu1 %v8821_v25  ;;  %1293 = vmatprep.mubr.bf16.mxu1 %v10045_v49  ;;  %v797_v25 = vsel %vm12462_vm0, %v792_v62, %v796_v12  ;;  %v2482_v62 = vrot.slane %v10108_v42, 2  ;;  %v2100_v12 = vrot.slane %v2098_v59, 2  ;;  %v2140_v59 = vshrl.u32 %v10077_v23, 16  ;;  %v8887_v2 = vld [vmem:[#allocation7 + $0x550] ss:$8 sps:$4 sm:$0xff]  }
  0xb7   : > { %1040 = vmatprep.mubr.bf16.mxu0 %v797_v25  ;;  %v1731_v13 = vsel %vm12460_vm1, %v1729_v21, %v1730_v9  ;;  %v2113_v25 = vshrl.u32 %v10063_v5, 16 }
  0xb8   : > { %1550 = vmatpush1.bf16.msra.mxu0 %v8816_v30  ;;  %v789_v30 = vsel %vm12462_vm0, %v784_v35, %v788_v61  ;;  %v10156_v61 = vsel %vm12457_vm2, %v2482_v62, %v2486_v6 }
  0xb9   : > { %1933 = vmatpush1.bf16.msra.mxu1 %v8819_v31  ;;  %1551 = vmatprep.subr.bf16.mxu0 %v8824_v34  ;;  %v8834_v31 = vld [vmem:[#allocation7 + $0x2d0] ss:$8 sps:$4 sm:$0xff]   ;;  %v8842_v34 = vld [vmem:[#allocation7 + $0x2c4] ss:$8 sps:$4 sm:$0xff]  }
  0xba   : > { %1934 = vmatprep.subr.bf16.mxu1 %v8827_v36  ;;  %v2069_v36 = vshrl.u32 %v10026_v19, 16 }
  0xbb   : > { %1041 = vmatmul.mubr.bf16.gmra.mxu0 %v789_v30  ;;  %v2116_v30 = vshll.u32 %v10063_v5, 16 }
  0xbc   : > { %1294 = vmatmul.mubr.bf16.gmra.mxu1 %v10047_v50  ;;  %1552 = vmatpush2.bf16.msra.mxu0 %v8822_v39  ;;  %v2072_v39 = vshll.u32 %v10026_v19, 16  ;;  %v2071_v55 = vrot.slane %v2069_v36, 1  ;;  %v8862_v36 = vld [vmem:[#allocation7 + $0x294] ss:$8 sps:$4 sm:$0xff]  }
  0xbd   : > { %1935 = vmatpush2.bf16.msra.mxu1 %v8825_v43  ;;  %1553 = vmatprep.subr.bf16.mxu0 %v8830_v47  ;;  %v8848_v43 = vld [vmem:[#allocation7 + $0x2b4] ss:$8 sps:$4 sm:$0xff]  }
  0xbe   : > { %1936 = vmatprep.subr.bf16.mxu1 %v8833_v1  ;;  %1950 = vmatprep.mubr.bf16.mxu1 %v1731_v13  ;;  %v8852_v47 = vld [vmem:[#allocation7 + $0x3b4] ss:$8 sps:$4 sm:$0xff]   ;;  %v2095_v1 = vshrl.u32 %v10029_v20, 16  ;;  %v2074_v35 = vrot.slane %v2072_v39, 2  ;;  %v2122_v13 = vshrl.u32 %v10069_v46, 16  ;;  %v2118_v39 = vrot.slane %v2116_v30, 2 }
  0xbf   : > { %1567 = vmatprep.mubr.bf16.mxu0 %v1348_v32  ;;  %v8987_v19 = vld [vmem:[#allocation7 + $0x754] ss:$8 sps:$4 sm:$0xff]  }
  0xc0   : > { %1554 = vmatpush2.bf16.msra.mxu0 %v8828_v7  ;;  %v2484_v7 = vrot.slane %v10029_v20, 2  ;;  %v2097_v38 = vrot.slane %v2095_v1, 1  ;;  %v8859_v20 = vld [vmem:[#allocation7 + $0x3a4] ss:$8 sps:$4 sm:$0xff]   ;;  %v10163_v21 = vor.u32 %v2074_v35, %v2071_v55  ;;  %v2124_v55 = vrot.slane %v2122_v13, 1 }
  0xc1   : > { %1937 = vmatpush2.bf16.msra.mxu1 %v8831_v11  ;;  %1555 = vmatprep.subr.bf16.mxu0 %v8836_v18  ;;  %v8850_v11 = vld [vmem:[#allocation7 + $0x3b0] ss:$8 sps:$4 sm:$0xff]   ;;  %v8856_v18 = vld [vmem:[#allocation7 + $0x2a4] ss:$8 sps:$4 sm:$0xff]   ;;  %v2142_v13 = vrot.slane %v2140_v59, 1 }
  0xc2   : > { %1938 = vmatprep.subr.bf16.mxu1 %v8839_v0  ;;  %v10161_v14 = vsel %vm12457_vm2, %v2479_v4, %v2484_v7  ;;  %v2101_v0 = vor.u32 %v2100_v12, %v2097_v38  ;;  %v493_v35 = vld [vmem:[%s9921_s6 + $0xb8] sm:$0xff]  ;;  %v2143_v12 = vshll.u32 %v10077_v23, 16 }
  0xc3   : > { %v8874_v59 = vld [vmem:[#allocation7 + $0x474] ss:$8 sps:$4 sm:$0xff]  }
  0xc4   : > { %1556 = vmatpush2.bf16.msra.mxu0 %v8834_v31  ;;  %v8854_v31 = vld [vmem:[#allocation7 + $0x2a0] ss:$8 sps:$4 sm:$0xff]   ;;  %v10170_v32 = vsel %vm12456_vm3, %v10163_v21, %v2101_v0 }
  0xc5   : > { %1939 = vmatpush2.bf16.msra.mxu1 %v8837_v8  ;;  %1557 = vmatprep.subr.bf16.mxu0 %v8842_v34  ;;  %v8857_v8 = vld [vmem:[#allocation7 + $0x3a0] ss:$8 sps:$4 sm:$0xff]   ;;  %v2125_v34 = vshll.u32 %v10069_v46, 16 }
  0xc6   : > { %1940 = vmatprep.subr.bf16.mxu1 %v8845_v37  ;;  %v2115_v37 = vrot.slane %v2113_v25, 1 }
  0xc7   : > { %v2127_v38 = vrot.slane %v2125_v34, 2  ;;  %v2145_v34 = vrot.slane %v2143_v12, 2 }
  0xc8   : > { %1558 = vmatpush2.bf16.msra.mxu0 %v8840_v40  ;;  %v8865_v40 = vld [vmem:[#allocation7 + $0x394] ss:$8 sps:$4 sm:$0xff]   ;;  %v2119_v1 = vor.u32 %v2118_v39, %v2115_v37  ;;  %v8866_v37 = vld [vmem:[#allocation7 + $0x280] ss:$8 sps:$4 sm:$0xff]  }
  0xc9   : > { %1941 = vmatpush2.bf16.msra.mxu1 %v8843_v41  ;;  %1559 = vmatprep.subr.bf16.mxu0 %v8848_v43  ;;  %v2490_v41 = vrot.slane %v10069_v46, 2  ;;  %v2488_v43 = vrot.slane %v10063_v5, 2  ;;  %v10187_v5 = vcombine.low %v10116_v63, %v9945_v60  ;;  %v10194_v39 = vor.u32 %v2127_v38, %v2124_v55  ;;  %v8907_v46 = vld [vmem:[#allocation7 + $0x524] ss:$8 sps:$4 sm:$0xff]  }
  0xca   : > { %1942 = vmatprep.subr.bf16.mxu1 %v8852_v47  ;;  %v492_v47 = vld [vmem:[%s9921_s6 + $0xb0] sm:$0xff]  ;;  %v10190_v30 = vsel %vm12456_vm3, %v2101_v0, %v2119_v1  ;;  %v10196_v60 = vor.u32 %v2145_v34, %v2142_v13  ;;  %v2494_v63 = vrot.slane %v10077_v23, 2  ;;  %v2492_v0 = vrot.slane %v10079_v24, 2 }
  0xcb   : > { %v8564_v25 = vpack.c.bf16 %v493_v35, %v492_v47  ;;  %v8877_v35 = vld [vmem:[#allocation7 + $0x574] ss:$8 sps:$4 sm:$0xff]   ;;  %v8880_v34 = vld [vmem:[#allocation7 + $0x464] ss:$8 sps:$4 sm:$0xff]  }
  0xcc   : > { %1560 = vmatpush2.bf16.msra.mxu0 %v8846_v57  ;;  %v10179_v57 = vsel %vm12457_vm2, %v2486_v6, %v2490_v41  ;;  %v8868_v6 = vld [vmem:[#allocation7 + $0x284] ss:$8 sps:$4 sm:$0xff]   ;;  %v10204_v55 = vsel %vm12456_vm3, %v10194_v39, %v10196_v60  ;;  %v10209_v12 = vsel %vm12457_vm2, %v2490_v41, %v2494_v63  ;;  %v8875_v41 = vld [vmem:[#allocation7 + $0x570] ss:$8 sps:$4 sm:$0xff]   ;;  %v9025_v23 = vld [vmem:[#allocation7 + $0x7f4] ss:$8 sps:$4 sm:$0xff]  }
  0xcd   : > { %1943 = vmatpush2.bf16.msra.mxu1 %v8850_v11  ;;  %1561 = vmatprep.subr.bf16.mxu0 %v8856_v18  ;;  %v10182_v11 = vsel %vm12457_vm2, %v2484_v7, %v2488_v43  ;;  %v8860_v18 = vld [vmem:[#allocation7 + $0x290] ss:$8 sps:$4 sm:$0xff]   ;;  %v8871_v7 = vld [vmem:[#allocation7 + $0x384] ss:$8 sps:$4 sm:$0xff]   ;;  %587 = vst [vmem:[#allocation2 + $0x60] sm:$0xff] %v8564_v25  ;;  %v1734_v25 = vrot.slane %v10145_v52, 1 }
  0xce   : > { %1944 = vmatprep.subr.bf16.mxu1 %v8859_v20  ;;  %v8863_v20 = vld [vmem:[#allocation7 + $0x390] ss:$8 sps:$4 sm:$0xff]  }
  0xd0   : > { %1562 = vmatpush2.bf16.msra.mxu0 %v8854_v31  ;;  %v2131_v31 = vshrl.u32 %v10079_v24, 16 }
  0xd1   : > { %1945 = vmatpush2.bf16.msra.mxu1 %v8857_v8  ;;  %1563 = vmatprep.subr.bf16.mxu0 %v8862_v36  ;;  %v2134_v8 = vshll.u32 %v10079_v24, 16  ;;  %v8869_v36 = vld [vmem:[#allocation7 + $0x380] ss:$8 sps:$4 sm:$0xff]  }
  0xd2   : > { %1946 = vmatprep.subr.bf16.mxu1 %v8865_v40  ;;  %v1726_v40 = vrot.slane %v10187_v5, 1  ;;  %v2133_v47 = vrot.slane %v2131_v31, 1  ;;  %v8883_v31 = vld [vmem:[#allocation7 + $0x564] ss:$8 sps:$4 sm:$0xff]  }
  0xd3   : > { %v2136_v38 = vrot.slane %v2134_v8, 2 }
  0xd4   : > { %1564 = vmatpush2.bf16.msra.mxu0 %v8860_v18  ;;  %v10214_v18 = vsel %vm12457_vm2, %v2488_v43, %v2492_v0 }
  0xd5   : > { %1947 = vmatpush2.bf16.msra.mxu1 %v8863_v20  ;;  %1565 = vmatprep.subr.bf16.mxu0 %v8868_v6  ;;  %v1351_v20 = vrot.slane %v9981_v45, 1  ;;  %v10218_v13 = vor.u32 %v2136_v38, %v2133_v47  ;;  %v8872_v6 = vld [vmem:[#allocation7 + $0x470] ss:$8 sps:$4 sm:$0xff]   ;;  %v8878_v45 = vld [vmem:[#allocation7 + $0x460] ss:$8 sps:$4 sm:$0xff]  }
  0xd6   : > { %1948 = vmatprep.subr.bf16.mxu1 %v8871_v7  ;;  %v1728_v7 = vsel %vm12460_vm1, %v1726_v40, %v1727_v44  ;;  %v1735_v44 = vsel %vm12460_vm1, %v1730_v9, %v1734_v25  ;;  %v1355_v40 = vrot.slane %v10011_v15, 1  ;;  %v8895_v47 = vld [vmem:[#allocation7 + $0x544] ss:$8 sps:$4 sm:$0xff]   ;;  %v8890_v9 = vld [vmem:[#allocation7 + $0x440] ss:$8 sps:$4 sm:$0xff]  }
  0xd7   : > { %v10225_v43 = vsel %vm12456_vm3, %v2119_v1, %v10218_v13  ;;  %v1352_v8 = vsel %vm12460_vm1, %v1347_v3, %v1351_v20  ;;  %v8889_v1 = vld [vmem:[#allocation7 + $0x554] ss:$8 sps:$4 sm:$0xff]   ;;  %v8892_v3 = vld [vmem:[#allocation7 + $0x444] ss:$8 sps:$4 sm:$0xff]   ;;  %v8893_v15 = vld [vmem:[#allocation7 + $0x540] ss:$8 sps:$4 sm:$0xff]  }
  0xd8   : > { %1566 = vmatpush2.bf16.msra.mxu0 %v8866_v37  ;;  %v8881_v37 = vld [vmem:[#allocation7 + $0x560] ss:$8 sps:$4 sm:$0xff]   ;;  %v8898_v38 = vld [vmem:[#allocation7 + $0x434] ss:$8 sps:$4 sm:$0xff]  }
  0xd9   : > { %1949 = vmatpush2.bf16.msra.mxu1 %v8869_v36  ;;  %2336 = vmatprep.subr.bf16.mxu0 %v8874_v59  ;;  %v8886_v36 = vld [vmem:[#allocation7 + $0x454] ss:$8 sps:$4 sm:$0xff]   ;;  %v1356_v59 = vsel %vm12460_vm1, %v1351_v20, %v1355_v40 }
  0xda   : > { %2670 = vmatprep.subr.bf16.mxu1 %v8877_v35  ;;  %v1739_v35 = vsel %vm12460_vm1, %v1734_v25, %v1738_v27  ;;  %v1648_v20 = vld [vmem:[#allocation2 + $0x60] sm:$0x11]  ;;  %v8902_v27 = vld [vmem:[#allocation7 + $0x420] ss:$8 sps:$4 sm:$0xff]  }
  0xdb   : > { %1568 = vmatmul.mubr.bf16.vlgmr.msra.gmra.mxu0 %v10130_v10  ;;  %v8884_v10 = vld [vmem:[#allocation7 + $0x450] ss:$8 sps:$4 sm:$0xff]   ;;  %v8905_v25 = vld [vmem:[#allocation7 + $0x520] ss:$8 sps:$4 sm:$0xff]  }
  0xdc   : > { %1951 = vmatmul.mubr.bf16.vlgmr.msra.gmra.mxu1 %v1728_v7  ;;  %2337 = vmatpush1.bf16.msra.mxu0 %v8872_v6  ;;  %v8901_v6 = vld [vmem:[#allocation7 + $0x534] ss:$8 sps:$4 sm:$0xff]   ;;  %v8896_v7 = vld [vmem:[#allocation7 + $0x430] ss:$8 sps:$4 sm:$0xff]  }
  0xdd   : > { %2671 = vmatpush1.bf16.msra.mxu1 %v8875_v41  ;;  %2338 = vmatprep.subr.bf16.mxu0 %v8880_v34  ;;  %v8904_v41 = vld [vmem:[#allocation7 + $0x424] ss:$8 sps:$4 sm:$0xff]  }
  0xde   : > { %2672 = vmatprep.subr.bf16.mxu1 %v8883_v31  ;;  %1577 = vmatprep.mubr.bf16.mxu0 %v1352_v8  ;;  %v7990_v31 = vcombine.high %v1648_v20, %v1648_v20  ;;  %v2086_v8 = vshrl.u32 %v10108_v42, 16 }
  0xdf   : > { %1960 = vmatprep.mubr.bf16.mxu1 %v1735_v44  ;;  %v2089_v44 = vshll.u32 %v10108_v42, 16  ;;  %v8945_v42 = vld [vmem:[#allocation7 + $0x5c4] ss:$8 sps:$4 sm:$0xff]  }
  0xe0   : > { %2339 = vmatpush1.bf16.msra.mxu0 %v8878_v45  ;;  %v8910_v45 = vld [vmem:[#allocation7 + $0x414] ss:$8 sps:$4 sm:$0xff]  }
  0xe1   : > { %2673 = vmatpush1.bf16.msra.mxu1 %v8881_v37  ;;  %2340 = vmatprep.subr.bf16.mxu0 %v8886_v36  ;;  %v8908_v37 = vld [vmem:[#allocation7 + $0x410] ss:$8 sps:$4 sm:$0xff]   ;;  %v2081_v36 = vshll.u32 %v10123_v58, 16 }
  0xe2   : > { %2674 = vmatprep.subr.bf16.mxu1 %v8889_v1  ;;  %v8911_v1 = vld [vmem:[#allocation7 + $0x510] ss:$8 sps:$4 sm:$0xff]  }
  0xe3   : > { %1578 = vmatmul.mubr.bf16.gmra.mxu0 %v10021_v17  ;;  %v8899_v17 = vld [vmem:[#allocation7 + $0x530] ss:$8 sps:$4 sm:$0xff]  }
  0xe4   : > { %1961 = vmatmul.mubr.bf16.gmra.mxu1 %v10052_v53  ;;  %2341 = vmatpush1.bf16.msra.mxu0 %v8884_v10  ;;  %v1359_v53 = vrot.slane %v10045_v49, 1  ;;  %v8913_v49 = vld [vmem:[#allocation7 + $0x514] ss:$8 sps:$4 sm:$0xff]   ;;  %v8916_v10 = vld [vmem:[#allocation7 + $0x404] ss:$8 sps:$4 sm:$0xff]  }
  0xe5   : > { %2675 = vmatpush1.bf16.msra.mxu1 %v8887_v2  ;;  %2342 = vmatprep.subr.bf16.mxu0 %v8892_v3  ;;  %v7989_v2 = vcombine.low %v1648_v20, %v1648_v20  ;;  %v10251_v3 = vld [vmem:[#allocation2] sm:$0xcc] }
  0xe6   : > { %2676 = vmatprep.subr.bf16.mxu1 %v8895_v47  ;;  %1587 = vmatprep.mubr.bf16.mxu0 %v1356_v59  ;;  %v1360_v34 = vsel %vm12460_vm1, %v1355_v40, %v1359_v53  ;;  %v1746_v40 = vrot.slane %v7990_v31, 1  ;;  %v8919_v47 = vld [vmem:[#allocation7 + $0x504] ss:$8 sps:$4 sm:$0xff]   ;;  %v2088_v59 = vrot.slane %v2086_v8, 1  ;;  %v8936_v8 = vld [vmem:[#allocation7 + $0x4d4] ss:$8 sps:$4 sm:$0xff]  }
  0xe7   : > { %1970 = vmatprep.mubr.bf16.mxu1 %v1739_v35  ;;  %v8933_v31 = vld [vmem:[#allocation7 + $0x5e4] ss:$8 sps:$4 sm:$0xff]  }
  0xe8   : > { %2343 = vmatpush1.bf16.msra.mxu0 %v8890_v9 }
  0xe9   : > { %2677 = vmatpush1.bf16.msra.mxu1 %v8893_v15  ;;  %2344 = vmatprep.subr.bf16.mxu0 %v8898_v38  ;;  %v1747_v15 = vsel %vm12460_vm1, %v1742_v28, %v1746_v40  ;;  %v2083_v38 = vrot.slane %v2081_v36, 2  ;;  %v8948_v36 = vld [vmem:[#allocation7 + $0x4b4] ss:$8 sps:$4 sm:$0xff]   ;;  %v8949_v40 = vld [vmem:[#allocation7 + $0x5b0] ss:$8 sps:$4 sm:$0xff]  }
  0xea   : > { %2678 = vmatprep.subr.bf16.mxu1 %v8901_v6  ;;  %v10259_v6 = vld [vmem:[#allocation2 + $0x58] sm:$0xff] }
  0xeb   : > { %1588 = vmatmul.mubr.bf16.gmra.mxu0 %v10057_v54  ;;  %v1363_v54 = vrot.slane %v10110_v48, 1  ;;  %v8914_v48 = vld [vmem:[#allocation7 + $0x400] ss:$8 sps:$4 sm:$0xff]  }
  0xec   : > { %1971 = vmatmul.mubr.bf16.gmra.mxu1 %v10075_v22  ;;  %2345 = vmatpush1.bf16.msra.mxu0 %v8896_v7  ;;  %v2078_v22 = vshrl.u32 %v10123_v58, 16  ;;  %v8917_v58 = vld [vmem:[#allocation7 + $0x500] ss:$8 sps:$4 sm:$0xff]   ;;  %v8058_v7 = vcombine.high %v10251_v3, %v10259_v6 }
  0xed   : > { %2679 = vmatpush1.bf16.msra.mxu1 %v8899_v17  ;;  %2346 = vmatprep.subr.bf16.mxu0 %v8904_v41  ;;  %v1364_v35 = vsel %vm12460_vm1, %v1359_v53, %v1363_v54  ;;  %v8922_v17 = vld [vmem:[#allocation7 + $0x4f4] ss:$8 sps:$4 sm:$0xff]   ;;  %v8920_v53 = vld [vmem:[#allocation7 + $0x4f0] ss:$8 sps:$4 sm:$0xff]   ;;  %v8942_v54 = vld [vmem:[#allocation7 + $0x4c4] ss:$8 sps:$4 sm:$0xff]  }
  0xee   : > { %2680 = vmatprep.subr.bf16.mxu1 %v8907_v46  ;;  %1597 = vmatprep.mubr.bf16.mxu0 %v1360_v34  ;;  %v2080_v9 = vrot.slane %v2078_v22, 1  ;;  %v8927_v41 = vld [vmem:[#allocation7 + $0x5f4] ss:$8 sps:$4 sm:$0xff]   ;;  %v2481_v46 = vrot.slane %v8058_v7, 2  ;;  %v8930_v34 = vld [vmem:[#allocation7 + $0x4e4] ss:$8 sps:$4 sm:$0xff]  }
  0xef   : > { %1980 = vmatprep.mubr.bf16.mxu1 %v10097_v33  ;;  %v2091_v33 = vrot.slane %v2089_v44, 2  ;;  %v8934_v44 = vld [vmem:[#allocation7 + $0x4d0] ss:$8 sps:$4 sm:$0xff]   ;;  %v8940_v22 = vld [vmem:[#allocation7 + $0x4c0] ss:$8 sps:$4 sm:$0xff]   ;;  %v2104_v7 = vshrl.u32 %v10145_v52, 16 }
  0xf0   : > { %2347 = vmatpush1.bf16.msra.mxu0 %v8902_v27  ;;  %v2084_v20 = vor.u32 %v2083_v38, %v2080_v9  ;;  %v2483_v50 = vsel %vm12457_vm2, %v2481_v46, %v2482_v62  ;;  %v8943_v62 = vld [vmem:[#allocation7 + $0x5c0] ss:$8 sps:$4 sm:$0xff]  }
  0xf1   : > { %2681 = vmatpush1.bf16.msra.mxu1 %v8905_v25  ;;  %2348 = vmatprep.subr.bf16.mxu0 %v8910_v45  ;;  %v10264_v28 = vor.u32 %v2091_v33, %v2088_v59  ;;  %v8925_v25 = vld [vmem:[#allocation7 + $0x5f0] ss:$8 sps:$4 sm:$0xff]   ;;  %v8952_v9 = vld [vmem:[#allocation7 + $0x4a0] ss:$8 sps:$4 sm:$0xff]   ;;  %v2061_v59 = vshrl.u32 %v10187_v5, 16  ;;  %v2064_v33 = vshll.u32 %v10187_v5, 16  ;;  %v8057_v5 = vcombine.low %v10251_v3, %v10259_v6 }
  0xf2   : > { %2682 = vmatprep.subr.bf16.mxu1 %v8913_v49  ;;  %v8931_v49 = vld [vmem:[#allocation7 + $0x5e0] ss:$8 sps:$4 sm:$0xff]  }
  0xf3   : > { %1598 = vmatmul.mubr.bf16.gmra.mxu0 %v10089_v56  ;;  %v1361_v56 = vrot.slane %v10112_v51, 1  ;;  %v2093_v45 = vsel %vm12456_vm3, %v2084_v20, %v10264_v28  ;;  %v2066_v38 = vrot.slane %v2064_v33, 2  ;;  %v8964_v20 = vld [vmem:[#allocation7 + $0x480] ss:$8 sps:$4 sm:$0xff]  }
  0xf4   : > { %1981 = vmatmul.mubr.bf16.gmra.mxu1 %v10102_v16  ;;  %2349 = vmatpush1.bf16.msra.mxu0 %v8908_v37  ;;  %v1744_v16 = vrot.slane %v7989_v2, 1  ;;  %v8937_v37 = vld [vmem:[#allocation7 + $0x5d0] ss:$8 sps:$4 sm:$0xff]   ;;  %v8954_v2 = vld [vmem:[#allocation7 + $0x4a4] ss:$8 sps:$4 sm:$0xff]  }
  0xf5   : > { %2683 = vmatpush1.bf16.msra.mxu1 %v8911_v1  ;;  %2350 = vmatprep.subr.bf16.mxu0 %v8916_v10  ;;  %v1362_v27 = vsel %vm12460_vm1, %v1357_v26, %v1361_v56  ;;  %v8928_v26 = vld [vmem:[#allocation7 + $0x4e0] ss:$8 sps:$4 sm:$0xff]   ;;  %v8951_v1 = vld [vmem:[#allocation7 + $0x5b4] ss:$8 sps:$4 sm:$0xff]   ;;  %v8946_v10 = vld [vmem:[#allocation7 + $0x4b0] ss:$8 sps:$4 sm:$0xff]  }
  0xf6   : > { %2684 = vmatprep.subr.bf16.mxu1 %v8919_v47  ;;  %1607 = vmatprep.mubr.bf16.mxu0 %v1364_v35  ;;  %v1745_v51 = vsel %vm12460_vm1, %v1740_v29, %v1744_v16  ;;  %v8939_v29 = vld [vmem:[#allocation7 + $0x5d4] ss:$8 sps:$4 sm:$0xff]   ;;  %v8957_v47 = vld [vmem:[#allocation7 + $0x5a4] ss:$8 sps:$4 sm:$0xff]   ;;  %v2107_v56 = vshll.u32 %v10145_v52, 16  ;;  %v2478_v52 = vrot.slane %v8057_v5, 2 }
  0xf7   : > { %1990 = vmatprep.mubr.bf16.mxu1 %v1747_v15  ;;  %v8963_v35 = vld [vmem:[#allocation7 + $0x594] ss:$8 sps:$4 sm:$0xff]   ;;  %v2063_v15 = vrot.slane %v2061_v59, 1  ;;  %v8961_v16 = vld [vmem:[#allocation7 + $0x590] ss:$8 sps:$4 sm:$0xff]  }
  0xf8   : > { %2351 = vmatpush1.bf16.msra.mxu0 %v8914_v48  ;;  %v8955_v48 = vld [vmem:[#allocation7 + $0x5a0] ss:$8 sps:$4 sm:$0xff]   ;;  %v2480_v6 = vsel %vm12457_vm2, %v2478_v52, %v2479_v4  ;;  %v8982_v4 = vld [vmem:[#allocation7 + $0x650] ss:$8 sps:$4 sm:$0xff]  }
  0xf9   : > { %2685 = vmatpush1.bf16.msra.mxu1 %v8917_v58  ;;  %2352 = vmatprep.subr.bf16.mxu0 %v8922_v17  ;;  %v8960_v58 = vld [vmem:[#allocation7 + $0x494] ss:$8 sps:$4 sm:$0xff]   ;;  %v8958_v17 = vld [vmem:[#allocation7 + $0x490] ss:$8 sps:$4 sm:$0xff]   ;;  %v8967_v46 = vld [vmem:[#allocation7 + $0x580] ss:$8 sps:$4 sm:$0xff]  }
  0xfa   : > { %2686 = vmatprep.subr.bf16.mxu1 %v8927_v41  ;;  %v8966_v41 = vld [vmem:[#allocation7 + $0x484] ss:$8 sps:$4 sm:$0xff]   ;;  %v10303_v33 = vld [vmem:[#allocation2 + $0x50] ss:$-48 sps:$4 sm:$0xff]  }
  0xfb   : > { %1608 = vmatmul.mubr.bf16.gmra.mxu0 %v1362_v27  ;;  %v2106_v27 = vrot.slane %v2104_v7, 1  ;;  %v8997_v7 = vld [vmem:[#allocation7 + $0x730] ss:$8 sps:$4 sm:$0xff]  }
  0xfc   : > { %1991 = vmatmul.mubr.bf16.gmra.mxu1 %v1745_v51  ;;  %2353 = vmatpush2.bf16.msra.mxu0 %v8920_v53  ;;  %v8969_v53 = vld [vmem:[#allocation7 + $0x584] ss:$8 sps:$4 sm:$0xff]   ;;  %v2109_v51 = vrot.slane %v2107_v56, 2 }
  0xfd   : > { %2687 = vmatpush2.bf16.msra.mxu1 %v8925_v25  ;;  %2354 = vmatprep.subr.bf16.mxu0 %v8930_v34  ;;  %v2067_v25 = vor.u32 %v2066_v38, %v2063_v15  ;;  %v8972_v34 = vld [vmem:[#allocation7 + $0x674] ss:$8 sps:$4 sm:$0xff]   ;;  %v8994_v38 = vld [vmem:[#allocation7 + $0x630] ss:$8 sps:$4 sm:$0xff]   ;;  %v10312_v56 = vld [vmem:[#allocation2 + $0x58] sm:$0xcc] }
  0xfe   : > { %2688 = vmatprep.subr.bf16.mxu1 %v8933_v31  ;;  %2368 = vmatprep.mubr.bf16.mxu0 %v2093_v45  ;;  %v8975_v31 = vld [vmem:[#allocation7 + $0x774] ss:$8 sps:$4 sm:$0xff]   ;;  %v8970_v45 = vld [vmem:[#allocation7 + $0x670] ss:$8 sps:$4 sm:$0xff]  }
  0xff   : > { %2702 = vmatprep.mubr.bf16.mxu1 %v2483_v50  ;;  %v2110_v50 = vor.u32 %v2109_v51, %v2106_v27  ;;  %v2076_v3 = vsel %vm12456_vm3, %v2067_v25, %v10163_v21  ;;  %v2021_v21 = vld [vmem:[#allocation2 + $0x60] sm:$0x33]  ;;  %v9005_v51 = vld [vmem:[#allocation7 + $0x724] ss:$8 sps:$4 sm:$0xff]  }
 0x100   : > { %2355 = vmatpush2.bf16.msra.mxu0 %v8928_v26  ;;  %v8973_v26 = vld [vmem:[#allocation7 + $0x770] ss:$8 sps:$4 sm:$0xff]  }
 0x101   : > { %2689 = vmatpush2.bf16.msra.mxu1 %v8931_v49  ;;  %2356 = vmatprep.subr.bf16.mxu0 %v8936_v8  ;;  %v8978_v49 = vld [vmem:[#allocation7 + $0x664] ss:$8 sps:$4 sm:$0xff]  }
 0x102   : > { %2690 = vmatprep.subr.bf16.mxu1 %v8939_v29  ;;  %v8981_v8 = vld [vmem:[#allocation7 + $0x764] ss:$8 sps:$4 sm:$0xff]   ;;  %v8976_v29 = vld [vmem:[#allocation7 + $0x660] ss:$8 sps:$4 sm:$0xff]  }
 0x104   : > { %2357 = vmatpush2.bf16.msra.mxu0 %v8934_v44  ;;  %v2111_v44 = vsel %vm12456_vm3, %v10264_v28, %v2110_v50  ;;  %v8990_v28 = vld [vmem:[#allocation7 + $0x644] ss:$8 sps:$4 sm:$0xff]  }
 0x105   : > { %2691 = vmatpush2.bf16.msra.mxu1 %v8937_v37  ;;  %2358 = vmatprep.subr.bf16.mxu0 %v8942_v54  ;;  %v8979_v37 = vld [vmem:[#allocation7 + $0x760] ss:$8 sps:$4 sm:$0xff]   ;;  %v8984_v54 = vld [vmem:[#allocation7 + $0x654] ss:$8 sps:$4 sm:$0xff]  }
 0x106   : > { %2692 = vmatprep.subr.bf16.mxu1 %v8945_v42  ;;  %v8985_v42 = vld [vmem:[#allocation7 + $0x750] ss:$8 sps:$4 sm:$0xff]  }
 0x108   : > { %2359 = vmatpush2.bf16.msra.mxu0 %v8940_v22  ;;  %v10291_v22 = vcombine.high %v2021_v21, %v2021_v21 }
 0x109   : > { %2693 = vmatpush2.bf16.msra.mxu1 %v8943_v62  ;;  %2360 = vmatprep.subr.bf16.mxu0 %v8948_v36  ;;  %v8993_v62 = vld [vmem:[#allocation7 + $0x744] ss:$8 sps:$4 sm:$0xff]  }
 0x10a   : > { %2694 = vmatprep.subr.bf16.mxu1 %v8951_v1  ;;  %v10293_v36 = vld [vmem:[#allocation2 + $0xc] ss:$48 sps:$4 sm:$0xff]   ;;  %v8988_v1 = vld [vmem:[#allocation7 + $0x640] ss:$8 sps:$4 sm:$0xff]   ;;  %v2158_v59 = vshrl.u32 %v10291_v22, 16 }
 0x10c   : > { %2361 = vmatpush2.bf16.msra.mxu0 %v8946_v10  ;;  %v8991_v10 = vld [vmem:[#allocation7 + $0x740] ss:$8 sps:$4 sm:$0xff]   ;;  %v2160_v25 = vrot.slane %v2158_v59, 1 }
 0x10d   : > { %2695 = vmatpush2.bf16.msra.mxu1 %v8949_v40  ;;  %2362 = vmatprep.subr.bf16.mxu0 %v8954_v2  ;;  %v8996_v40 = vld [vmem:[#allocation7 + $0x634] ss:$8 sps:$4 sm:$0xff]   ;;  %v3573_v59 = vld [vmem:[#allocation2 + $0x58] sm:$0x88] }
 0x10e   : > { %2696 = vmatprep.subr.bf16.mxu1 %v8957_v47  ;;  %v8999_v2 = vld [vmem:[#allocation7 + $0x734] ss:$8 sps:$4 sm:$0xff]  }
 0x10f   : > { %v10299_v47 = vld [vmem:[#allocation2 + $0x54] ss:$-48 sps:$4 sm:$0xff]  }
 0x110   : > { %2363 = vmatpush2.bf16.msra.mxu0 %v8952_v9  ;;  %v3620_v9 = vrot.slane %v10293_v36, 3  ;;  %v3616_v15 = vrot.slane %v10299_v47, 3 }
 0x111   : > { %2697 = vmatpush2.bf16.msra.mxu1 %v8955_v48  ;;  %2364 = vmatprep.subr.bf16.mxu0 %v8960_v58  ;;  %v2780_v48 = vld [vmem:[#allocation2 + $0x48] sm:$0xff]  ;;  %v494_v58 = vld [vmem:[%s9921_s6 + $0xc0] sm:$0xff] }
 0x112   : > { %2698 = vmatprep.subr.bf16.mxu1 %v8963_v35  ;;  %v495_v35 = vld [vmem:[%s9921_s6 + $0xc8] sm:$0xff]  ;;  %v10321_v5 = vsel %vm12455_vm4, %v3616_v15, %v3620_v9 }
 0x114   : > { %2365 = vmatpush2.bf16.msra.mxu0 %v8958_v17  ;;  %v10314_v17 = vld [vmem:[#allocation2 + $0x18] sm:$0xff] }
 0x115   : > { %2699 = vmatpush2.bf16.msra.mxu1 %v8961_v16  ;;  %2366 = vmatprep.subr.bf16.mxu0 %v8966_v41  ;;  %v8565_v41 = vpack.c.bf16 %v495_v35, %v494_v58  ;;  %v8169_v58 = vcombine.low %v3573_v59, %v10314_v17  ;;  %v8170_v35 = vcombine.high %v3573_v59, %v10314_v17  ;;  %v9044_v59 = vld [vmem:[#allocation7 + $0x6b0] ss:$8 sps:$4 sm:$0xff]  }
 0x116   : > { %2700 = vmatprep.subr.bf16.mxu1 %v8969_v53  ;;  %v9002_v53 = vld [vmem:[#allocation7 + $0x624] ss:$8 sps:$4 sm:$0xff]  }
 0x117   : > { %588 = vst [vmem:[#allocation2 + $0x40] sm:$0xff] %v8565_v41 }
 0x118   : > { %2367 = vmatpush2.bf16.msra.mxu0 %v8964_v20  ;;  %v10323_v20 = vcombine.low %v2021_v21, %v2021_v21  ;;  %v9009_v21 = vld [vmem:[#allocation7 + $0x710] ss:$8 sps:$4 sm:$0xff]  }
 0x119   : > { %2701 = vmatpush2.bf16.msra.mxu1 %v8967_v46  ;;  %3053 = vmatprep.subr.bf16.mxu0 %v8972_v34  ;;  %v3613_v46 = vrot.slane %v10303_v33, 3 }
 0x11a   : > { %3470 = vmatprep.subr.bf16.mxu1 %v8975_v31  ;;  %v9000_v31 = vld [vmem:[#allocation7 + $0x620] ss:$8 sps:$4 sm:$0xff]  }
 0x11b   : > { %2369 = vmatmul.mubr.bf16.vlgmr.msra.gmra.mxu0 %v2076_v3 }
 0x11c   : > { %2703 = vmatmul.mubr.bf16.vlgmr.msra.gmra.mxu1 %v2480_v6  ;;  %3054 = vmatpush1.bf16.msra.mxu0 %v8970_v45  ;;  %v10332_v45 = vcombine.high %v10312_v56, %v10314_v17  ;;  %v9003_v6 = vld [vmem:[#allocation7 + $0x720] ss:$8 sps:$4 sm:$0xff]  }
 0x11d   : > { %3471 = vmatpush1.bf16.msra.mxu1 %v8973_v26  ;;  %3055 = vmatprep.subr.bf16.mxu0 %v8978_v49  ;;  %v9008_v49 = vld [vmem:[#allocation7 + $0x614] ss:$8 sps:$4 sm:$0xff]  }
 0x11e   : > { %3472 = vmatprep.subr.bf16.mxu1 %v8981_v8  ;;  %2378 = vmatprep.mubr.bf16.mxu0 %v2111_v44  ;;  %v2149_v8 = vshrl.u32 %v10323_v20, 16 }
 0x11f   : > { %2712 = vmatprep.mubr.bf16.mxu1 %v10156_v61  ;;  %v2129_v61 = vsel %vm12456_vm3, %v2110_v50, %v10194_v39  ;;  %v10306_v39 = vld [vmem:[#allocation2 + $0x8] ss:$48 sps:$4 sm:$0xff]  }
 0x120   : > { %3056 = vmatpush1.bf16.msra.mxu0 %v8976_v29  ;;  %v3618_v27 = vrot.slane %v10306_v39, 3  ;;  %v2152_v29 = vshll.u32 %v10323_v20, 16 }
 0x121   : > { %3473 = vmatpush1.bf16.msra.mxu1 %v8979_v37  ;;  %3057 = vmatprep.subr.bf16.mxu0 %v8984_v54  ;;  %v2498_v37 = vrot.slane %v10291_v22, 2  ;;  %v10353_v54 = vld [vmem:[#allocation2 + $0x14] ss:$80 sps:$4 sm:$0xff]  }
 0x122   : > { %3474 = vmatprep.subr.bf16.mxu1 %v8987_v19  ;;  %v10337_v50 = vsel %vm12455_vm4, %v3613_v46, %v3618_v27  ;;  %v9006_v19 = vld [vmem:[#allocation7 + $0x610] ss:$8 sps:$4 sm:$0xff]  }
 0x123   : > { %2379 = vmatmul.mubr.bf16.gmra.mxu0 %v10170_v32  ;;  %v2779_v32 = vld [vmem:[#allocation2 + $0x28] sm:$0xff] }
 0x124   : > { %2713 = vmatmul.mubr.bf16.gmra.mxu1 %v10161_v14  ;;  %3058 = vmatpush1.bf16.msra.mxu0 %v8982_v4  ;;  %v2161_v14 = vshll.u32 %v10291_v22, 16  ;;  %v10316_v16 = vcombine.high %v2779_v32, %v2780_v48  ;;  %v3212_v4 = vshrl.u32 %v10332_v45, 16  ;;  %v9017_v22 = vld [vmem:[#allocation7 + $0x704] ss:$8 sps:$4 sm:$0xff]  }
 0x125   : > { %3475 = vmatpush1.bf16.msra.mxu1 %v8985_v42  ;;  %3059 = vmatprep.subr.bf16.mxu0 %v8990_v28  ;;  %v9014_v42 = vld [vmem:[#allocation7 + $0x604] ss:$8 sps:$4 sm:$0xff]   ;;  %v3215_v28 = vshll.u32 %v10332_v45, 16 }
 0x126   : > { %3476 = vmatprep.subr.bf16.mxu1 %v8993_v62  ;;  %2388 = vmatprep.mubr.bf16.mxu0 %v2129_v61  ;;  %v2163_v34 = vrot.slane %v2161_v14, 2  ;;  %v3624_v52 = vrot.slane %v10316_v16, 3  ;;  %v3220_v62 = vshrl.u32 %v10299_v47, 16  ;;  %v2151_v61 = vrot.slane %v2149_v8, 1 }
 0x127   : > { %2722 = vmatprep.mubr.bf16.mxu1 %v10179_v57  ;;  %v10325_v57 = vcombine.low %v2779_v32, %v2780_v48  ;;  %v9012_v32 = vld [vmem:[#allocation7 + $0x600] ss:$8 sps:$4 sm:$0xff]   ;;  %v3214_v14 = vrot.slane %v3212_v4, 2 }
 0x128   : > { %3060 = vmatpush1.bf16.msra.mxu0 %v8988_v1  ;;  %v10343_v26 = vsel %vm12455_vm4, %v3620_v9, %v3624_v52  ;;  %v3223_v1 = vshll.u32 %v10299_v47, 16  ;;  %v3156_v9 = vld [vmem:[#allocation2 + $0x40] sm:$0x77]  ;;  %v9015_v48 = vld [vmem:[#allocation7 + $0x700] ss:$8 sps:$4 sm:$0xff]  }
 0x129   : > { %3477 = vmatpush1.bf16.msra.mxu1 %v8991_v10  ;;  %3061 = vmatprep.subr.bf16.mxu0 %v8996_v40  ;;  %v3622_v3 = vrot.slane %v10325_v57, 3  ;;  %v3628_v10 = vrot.slane %v10353_v54, 3  ;;  %v10362_v40 = vld [vmem:[#allocation2 + $0x10] ss:$80 sps:$4 sm:$0xff]  }
 0x12a   : > { %3478 = vmatprep.subr.bf16.mxu1 %v8999_v2  ;;  %v2499_v2 = vsel %vm12457_vm2, %v2494_v63, %v2498_v37  ;;  %v3222_v63 = vrot.slane %v3220_v62, 2  ;;  %v3225_v41 = vrot.slane %v3223_v1, 3  ;;  %v9037_v62 = vld [vmem:[#allocation7 + $0x7d4] ss:$8 sps:$4 sm:$0xff]   ;;  %v9032_v1 = vld [vmem:[#allocation7 + $0x6d0] ss:$8 sps:$4 sm:$0xff]  }
 0x12b   : > { %2389 = vmatmul.mubr.bf16.gmra.mxu0 %v10190_v30  ;;  %v10350_v44 = vsel %vm12455_vm4, %v3618_v27, %v3622_v3  ;;  %v9011_v30 = vld [vmem:[#allocation7 + $0x714] ss:$8 sps:$4 sm:$0xff]  }
 0x12c   : > { %2723 = vmatmul.mubr.bf16.gmra.mxu1 %v10182_v11  ;;  %3062 = vmatpush1.bf16.msra.mxu0 %v8994_v38  ;;  %v2164_v11 = vor.u32 %v2163_v34, %v2160_v25  ;;  %v10372_v38 = vsel %vm12455_vm4, %v3624_v52, %v3628_v10  ;;  %v3612_v25 = vrot.slane %v8169_v58, 3  ;;  %v3615_v34 = vrot.slane %v8170_v35, 3  ;;  %v9050_v35 = vld [vmem:[#allocation7 + $0x6a0] ss:$8 sps:$4 sm:$0xff]  }
 0x12d   : > { %3479 = vmatpush1.bf16.msra.mxu1 %v8997_v7  ;;  %3063 = vmatprep.subr.bf16.mxu0 %v9002_v53  ;;  %v3217_v7 = vrot.slane %v3215_v28, 3  ;;  %v3626_v53 = vrot.slane %v10362_v40, 3  ;;  %v10379_v52 = vcombine.high %v3156_v9, %v3156_v9  ;;  %v8091_v58 = vcombine.low %v10312_v56, %v10314_v17  ;;  %v9059_v56 = vld [vmem:[#allocation7 + $0x790] ss:$8 sps:$4 sm:$0xff]  }
 0x12e   : > { %3480 = vmatprep.subr.bf16.mxu1 %v9005_v51  ;;  %2398 = vmatprep.mubr.bf16.mxu0 %v10204_v55  ;;  %v2154_v55 = vrot.slane %v2152_v29, 2  ;;  %v2496_v51 = vrot.slane %v10323_v20, 2  ;;  %v10387_v20 = vsel %vm12455_vm4, %v3615_v34, %v3616_v15  ;;  %v10392_v8 = vsel %vm12455_vm4, %v3612_v25, %v3613_v46  ;;  %v9031_v29 = vld [vmem:[#allocation7 + $0x7e4] ss:$8 sps:$4 sm:$0xff]  }
 0x12f   : > { %2732 = vmatprep.mubr.bf16.mxu1 %v10209_v12  ;;  %v2165_v12 = vsel %vm12456_vm3, %v10196_v60, %v2164_v11  ;;  %v9022_v60 = vld [vmem:[#allocation7 + $0x6f4] ss:$8 sps:$4 sm:$0xff]   ;;  %v10394_v11 = vor.u32 %v3225_v41, %v3222_v63  ;;  %v10399_v37 = vsel %vm12455_vm4, %v3622_v3, %v3626_v53  ;;  %v9026_v3 = vld [vmem:[#allocation7 + $0x6e0] ss:$8 sps:$4 sm:$0xff]   ;;  %v3195_v63 = vshrl.u32 %v8091_v58, 16 }
 0x130   : > { %3064 = vmatpush1.bf16.msra.mxu0 %v9000_v31  ;;  %v2155_v27 = vor.u32 %v2154_v55, %v2151_v61  ;;  %v9023_v31 = vld [vmem:[#allocation7 + $0x7f0] ss:$8 sps:$4 sm:$0xff]   ;;  %v2497_v46 = vsel %vm12457_vm2, %v2492_v0, %v2496_v51  ;;  %v9043_v61 = vld [vmem:[#allocation7 + $0x7c4] ss:$8 sps:$4 sm:$0xff]   ;;  %v9038_v55 = vld [vmem:[#allocation7 + $0x6c0] ss:$8 sps:$4 sm:$0xff]  }
 0x131   : > { %3481 = vmatpush1.bf16.msra.mxu1 %v9003_v6  ;;  %3065 = vmatprep.subr.bf16.mxu0 %v9008_v49  ;;  %v2865_v6 = vrot.slane %v10299_v47, 2  ;;  %v10382_v49 = vcombine.low %v3156_v9, %v3156_v9  ;;  %v9049_v9 = vld [vmem:[#allocation7 + $0x7b4] ss:$8 sps:$4 sm:$0xff]   ;;  %v3198_v41 = vshll.u32 %v8091_v58, 16  ;;  %v9056_v51 = vld [vmem:[#allocation7 + $0x690] ss:$8 sps:$4 sm:$0xff]  }
 0x132   : > { %3482 = vmatprep.subr.bf16.mxu1 %v9011_v30  ;;  %v3218_v30 = vor.u32 %v3217_v7, %v3214_v14  ;;  %v2156_v15 = vsel %vm12456_vm3, %v10218_v13, %v2155_v27  ;;  %v9034_v13 = vld [vmem:[#allocation7 + $0x6d4] ss:$8 sps:$4 sm:$0xff]   ;;  %v9055_v14 = vld [vmem:[#allocation7 + $0x7a4] ss:$8 sps:$4 sm:$0xff]   ;;  %v3206_v27 = vshll.u32 %v10303_v33, 16  ;;  %v3238_v17 = vshrl.u32 %v10293_v36, 16 }
 0x133   : > { %2399 = vmatmul.mubr.bf16.gmra.mxu0 %v10225_v43  ;;  %v2864_v43 = vrot.slane %v10332_v45, 2  ;;  %v9028_v45 = vld [vmem:[#allocation7 + $0x6e4] ss:$8 sps:$4 sm:$0xff]   ;;  %v9061_v7 = vld [vmem:[#allocation7 + $0x794] ss:$8 sps:$4 sm:$0xff]   ;;  %v3241_v25 = vshll.u32 %v10293_v36, 16 }
 0x134   : > { %2733 = vmatmul.mubr.bf16.gmra.mxu1 %v10214_v18  ;;  %3066 = vmatpush1.bf16.msra.mxu0 %v9006_v19  ;;  %v9020_v18 = vld [vmem:[#allocation7 + $0x6f0] ss:$8 sps:$4 sm:$0xff]   ;;  %v3632_v19 = vrot.slane %v10379_v52, 3  ;;  %v3227_v0 = vsel %vm12454_vm5, %v3218_v30, %v10394_v11  ;;  %v9064_v34 = vld [vmem:[#allocation7 + $0x684] ss:$8 sps:$4 sm:$0xff]  }
 0x135   : > { %3483 = vmatpush1.bf16.msra.mxu1 %v9009_v21  ;;  %3067 = vmatprep.subr.bf16.mxu0 %v9014_v42  ;;  %v3630_v21 = vrot.slane %v10382_v49, 3  ;;  %v9029_v42 = vld [vmem:[#allocation7 + $0x7e0] ss:$8 sps:$4 sm:$0xff]   ;;  %v2866_v24 = vsel %vm12457_vm2, %v2864_v43, %v2865_v6  ;;  %v9067_v43 = vld [vmem:[#allocation7 + $0x784] ss:$8 sps:$4 sm:$0xff]  }
 0x136   : > { %3484 = vmatprep.subr.bf16.mxu1 %v9017_v22  ;;  %2408 = vmatprep.mubr.bf16.mxu0 %v2165_v12  ;;  %v10409_v4 = vsel %vm12455_vm4, %v3628_v10, %v3632_v19  ;;  %v9035_v10 = vld [vmem:[#allocation7 + $0x7d0] ss:$8 sps:$4 sm:$0xff]   ;;  %v9040_v22 = vld [vmem:[#allocation7 + $0x6c4] ss:$8 sps:$4 sm:$0xff]   ;;  %v9041_v12 = vld [vmem:[#allocation7 + $0x7c0] ss:$8 sps:$4 sm:$0xff]  }
 0x137   : > { %2742 = vmatprep.mubr.bf16.mxu1 %v2499_v2  ;;  %v10412_v28 = vsel %vm12455_vm4, %v3626_v53, %v3630_v21  ;;  %v9046_v2 = vld [vmem:[#allocation7 + $0x6b4] ss:$8 sps:$4 sm:$0xff]   ;;  %v3203_v53 = vshrl.u32 %v10303_v33, 16  ;;  %v9062_v30 = vld [vmem:[#allocation7 + $0x680] ss:$8 sps:$4 sm:$0xff]   ;;  %v2861_v21 = vrot.slane %v8091_v58, 2 }
 0x138   : > { %3068 = vmatpush1.bf16.msra.mxu0 %v9012_v32  ;;  %v9047_v32 = vld [vmem:[#allocation7 + $0x7b0] ss:$8 sps:$4 sm:$0xff]   ;;  %v9065_v19 = vld [vmem:[#allocation7 + $0x780] ss:$8 sps:$4 sm:$0xff]  }
 0x139   : > { %3485 = vmatpush1.bf16.msra.mxu1 %v9015_v48  ;;  %3069 = vmatprep.subr.bf16.mxu0 %v9022_v60  ;;  %v9052_v48 = vld [vmem:[#allocation7 + $0x6a4] ss:$8 sps:$4 sm:$0xff]   ;;  %v9053_v60 = vld [vmem:[#allocation7 + $0x7a0] ss:$8 sps:$4 sm:$0xff]  }
 0x13a   : > { %3486 = vmatprep.subr.bf16.mxu1 %v9025_v23  ;;  %v9058_v23 = vld [vmem:[#allocation7 + $0x694] ss:$8 sps:$4 sm:$0xff]  }
 0x13b   : > { %2409 = vmatmul.mubr.bf16.gmra.mxu0 %v2156_v15  ;;  %v3240_v15 = vrot.slane %v3238_v17, 2 }
 0x13c   : > { %2743 = vmatmul.mubr.bf16.gmra.mxu1 %v2497_v46  ;;  %3070 = vmatpush2.bf16.msra.mxu0 %v9020_v18  ;;  %v3197_v18 = vrot.slane %v3195_v63, 2  ;;  %v3243_v46 = vrot.slane %v3241_v25, 3  ;;  %v3274_v25 = vshrl.u32 %v10353_v54, 16 }
 0x13d   : > { %3487 = vmatpush2.bf16.msra.mxu1 %v9023_v31  ;;  %3071 = vmatprep.subr.bf16.mxu0 %v9028_v45  ;;  %v3200_v31 = vrot.slane %v3198_v41, 3  ;;  %v3205_v45 = vrot.slane %v3203_v53, 2  ;;  %v3250_v41 = vshll.u32 %v10325_v57, 16 }
 0x13e   : > { %3488 = vmatprep.subr.bf16.mxu1 %v9031_v29  ;;  %3085 = vmatprep.mubr.bf16.mxu0 %v2866_v24  ;;  %v3208_v29 = vrot.slane %v3206_v27, 3  ;;  %v3229_v24 = vshrl.u32 %v10306_v39, 16  ;;  %v2873_v27 = vrot.slane %v10316_v16, 2 }
 0x13f   : > { %3502 = vmatprep.mubr.bf16.mxu1 %v3227_v0  ;;  %v3232_v0 = vshll.u32 %v10306_v39, 16 }
 0x140   : > { %3072 = vmatpush2.bf16.msra.mxu0 %v9026_v3  ;;  %v2862_v3 = vrot.slane %v10303_v33, 2  ;;  %v9076_v33 = vld [vmem:[#allocation7 + $0x864] ss:$8 sps:$4 sm:$0xff]  }
 0x141   : > { %3489 = vmatpush2.bf16.msra.mxu1 %v9029_v42  ;;  %3073 = vmatprep.subr.bf16.mxu0 %v9034_v13  ;;  %v9073_v42 = vld [vmem:[#allocation7 + $0x874] ss:$8 sps:$4 sm:$0xff]   ;;  %v3201_v13 = vor.u32 %v3200_v31, %v3197_v18 }
 0x142   : > { %3490 = vmatprep.subr.bf16.mxu1 %v9037_v62  ;;  %v3209_v62 = vor.u32 %v3208_v29, %v3205_v45  ;;  %v9085_v45 = vld [vmem:[#allocation7 + $0x844] ss:$8 sps:$4 sm:$0xff]  }
 0x144   : > { %3074 = vmatpush2.bf16.msra.mxu0 %v9032_v1  ;;  %v2869_v1 = vrot.slane %v10293_v36, 2 }
 0x145   : > { %3491 = vmatpush2.bf16.msra.mxu1 %v9035_v10  ;;  %3075 = vmatprep.subr.bf16.mxu0 %v9040_v22  ;;  %v9071_v10 = vld [vmem:[#allocation7 + $0x870] ss:$8 sps:$4 sm:$0xff]   ;;  %v3244_v22 = vor.u32 %v3243_v46, %v3240_v15 }
 0x146   : > { %3492 = vmatprep.subr.bf16.mxu1 %v9043_v61  ;;  %v3256_v61 = vshrl.u32 %v10316_v16, 16  ;;  %v2870_v36 = vsel %vm12457_vm2, %v2865_v6, %v2869_v1  ;;  %v3247_v6 = vshrl.u32 %v10325_v57, 16 }
 0x148   : > { %3076 = vmatpush2.bf16.msra.mxu0 %v9038_v55  ;;  %v3259_v55 = vshll.u32 %v10316_v16, 16 }
 0x149   : > { %3493 = vmatpush2.bf16.msra.mxu1 %v9041_v12  ;;  %3077 = vmatprep.subr.bf16.mxu0 %v9046_v2  ;;  %v2863_v12 = vsel %vm12457_vm2, %v2861_v21, %v2862_v3  ;;  %v3210_v2 = vsel %vm12454_vm5, %v3201_v13, %v3209_v62  ;;  %v2874_v21 = vsel %vm12457_vm2, %v2869_v1, %v2873_v27 }
 0x14a   : > { %3494 = vmatprep.subr.bf16.mxu1 %v9049_v9  ;;  %v3231_v9 = vrot.slane %v3229_v24, 2  ;;  %v3261_v58 = vrot.slane %v3259_v55, 3  ;;  %v3276_v24 = vrot.slane %v3274_v25, 2 }
 0x14c   : > { %3078 = vmatpush2.bf16.msra.mxu0 %v9044_v59  ;;  %v3234_v59 = vrot.slane %v3232_v0, 3  ;;  %v9088_v0 = vld [vmem:[#allocation7 + $0x834] ss:$8 sps:$4 sm:$0xff]  }
 0x14d   : > { %3495 = vmatpush2.bf16.msra.mxu1 %v9047_v32  ;;  %3079 = vmatprep.subr.bf16.mxu0 %v9052_v48  ;;  %v9074_v32 = vld [vmem:[#allocation7 + $0x860] ss:$8 sps:$4 sm:$0xff]   ;;  %v3245_v48 = vsel %vm12454_vm5, %v10394_v11, %v3244_v22 }
 0x14e   : > { %3496 = vmatprep.subr.bf16.mxu1 %v9055_v14  ;;  %v3258_v14 = vrot.slane %v3256_v61, 2  ;;  %v3235_v47 = vor.u32 %v3234_v59, %v3231_v9 }
 0x150   : > { %3080 = vmatpush2.bf16.msra.mxu0 %v9050_v35  ;;  %v3262_v17 = vor.u32 %v3261_v58, %v3258_v14  ;;  %v3236_v16 = vsel %vm12454_vm5, %v3209_v62, %v3235_v47  ;;  %v3268_v62 = vshll.u32 %v10362_v40, 16  ;;  %v3292_v14 = vshrl.u32 %v10379_v52, 16 }
 0x151   : > { %3497 = vmatpush2.bf16.msra.mxu1 %v9053_v60  ;;  %3081 = vmatprep.subr.bf16.mxu0 %v9058_v23  ;;  %v2867_v23 = vrot.slane %v10306_v39, 2  ;;  %v3295_v58 = vshll.u32 %v10379_v52, 16 }
 0x152   : > { %3498 = vmatprep.subr.bf16.mxu1 %v9061_v7  ;;  %v9082_v7 = vld [vmem:[#allocation7 + $0x854] ss:$8 sps:$4 sm:$0xff]   ;;  %v3263_v13 = vsel %vm12454_vm5, %v3244_v22, %v3262_v17  ;;  %v2877_v22 = vrot.slane %v10353_v54, 2  ;;  %v3294_v39 = vrot.slane %v3292_v14, 2 }
 0x153   : > { %v2868_v31 = vsel %vm12457_vm2, %v2862_v3, %v2867_v23 }
 0x154   : > { %3082 = vmatpush2.bf16.msra.mxu0 %v9056_v51 }
 0x155   : > { %3499 = vmatpush2.bf16.msra.mxu1 %v9059_v56  ;;  %3083 = vmatprep.subr.bf16.mxu0 %v9064_v34  ;;  %v9080_v56 = vld [vmem:[#allocation7 + $0x850] ss:$8 sps:$4 sm:$0xff]   ;;  %v3277_v34 = vshll.u32 %v10353_v54, 16 }
 0x156   : > { %3500 = vmatprep.subr.bf16.mxu1 %v9067_v43 }
 0x157   : > { %v3279_v3 = vrot.slane %v3277_v34, 3  ;;  %v9089_v34 = vld [vmem:[#allocation7 + $0x820] ss:$8 sps:$4 sm:$0xff]  }
 0x158   : > { %3084 = vmatpush2.bf16.msra.mxu0 %v9062_v30  ;;  %v3249_v30 = vrot.slane %v3247_v6, 2 }
 0x159   : > { %3501 = vmatpush2.bf16.msra.mxu1 %v9065_v19  ;;  %3804 = vmatprep.subr.bf16.mxu0 %v9073_v42  ;;  %v3252_v19 = vrot.slane %v3250_v41, 3  ;;  %v9083_v42 = vld [vmem:[#allocation7 + $0x840] ss:$8 sps:$4 sm:$0xff]  }
 0x15b   : > { %v1002_v35 = vpop.f32.mrf.mxu0  ;;  %3086 = vmatmul.mubr.bf16.vlgmr.msra.gmra.mxu0 %v2863_v12  ;;  %v3253_v12 = vor.u32 %v3252_v19, %v3249_v30  ;;  %v3286_v30 = vshll.u32 %v10382_v49, 16 }
 0x15c   : > { %v1255_v60 = vpop.f32.mrf.mxu1  ;;  %3503 = vmatmul.mubr.bf16.vlgmr.msra.gmra.mxu1 %v3210_v2  ;;  %3805 = vmatpush1.bf16.msra.mxu0 %v9071_v10  ;;  %v3265_v10 = vshrl.u32 %v10362_v40, 16  ;;  %v10465_v2 = vld [vmem:[#allocation2 + $0x40] sm:$0x33] }
 0x15d   : > { %v10439_v63 = vadd.f32 %v1255_v60, %v1002_v35  ;;  %3095 = vmatprep.mubr.bf16.mxu0 %v2870_v36  ;;  %v1004_v53 = vpop.f32.mrf.mxu0  ;;  %3806 = vmatprep.subr.bf16.mxu0 %v9076_v33  ;;  %v2871_v33 = vrot.slane %v10325_v57, 2  ;;  %v9086_v36 = vld [vmem:[#allocation7 + $0x830] ss:$8 sps:$4 sm:$0xff]   ;;  %v9091_v57 = vld [vmem:[#allocation7 + $0x824] ss:$8 sps:$4 sm:$0xff]   ;;  %v3270_v60 = vrot.slane %v3268_v62, 3  ;;  %v3254_v41 = vsel %vm12454_vm5, %v3235_v47, %v3253_v12 }
 0x15e   : > { %v1257_v11 = vpop.f32.mrf.mxu1  ;;  %3512 = vmatprep.mubr.bf16.mxu1 %v3245_v48  ;;  %v3267_v35 = vrot.slane %v3265_v10, 2  ;;  %v8102_v52 = vcombine.high %v10465_v2, %v10465_v2  ;;  %v9097_v47 = vld [vmem:[#allocation7 + $0x814] ss:$8 sps:$4 sm:$0xff]   ;;  %v9100_v10 = vld [vmem:[#allocation7 + $0x804] ss:$8 sps:$4 sm:$0xff]  }
 0x15f   : > { %v10444_v51 = vadd.f32 %v1257_v11, %v1004_v53  ;;  %v1006_v43 = vpop.f32.mrf.mxu0  ;;  %v2872_v54 = vsel %vm12457_vm2, %v2867_v23, %v2871_v33  ;;  %v2878_v11 = vsel %vm12457_vm2, %v2873_v27, %v2877_v22  ;;  %v2875_v23 = vrot.slane %v10362_v40, 2 }
 0x160   : > { %v1259_v18 = vpop.f32.mrf.mxu1  ;;  %3807 = vmatpush1.bf16.msra.mxu0 %v9074_v32  ;;  %v3280_v32 = vor.u32 %v3279_v3, %v3276_v24 }
 0x161   : > { %v10451_v29 = vadd.f32 %v1259_v18, %v1006_v43  ;;  %v10454_v15 = vpop.f32.mrf.mxu0  ;;  %3808 = vmatprep.subr.bf16.mxu0 %v9082_v7  ;;  %v3297_v18 = vrot.slane %v3295_v58, 3  ;;  %v2876_v3 = vsel %vm12457_vm2, %v2871_v33, %v2875_v23  ;;  %v9098_v33 = vld [vmem:[#allocation7 + $0x800] ss:$8 sps:$4 sm:$0xff]  }
 0x162   : > { %v10456_v46 = vpop.f32.mrf.mxu1  ;;  %v3281_v43 = vsel %vm12454_vm5, %v3262_v17, %v3280_v32  ;;  %v2881_v17 = vrot.slane %v8102_v52, 2  ;;  %v9110_v52 = vld [vmem:[#allocation7 + $0x8e4] ss:$8 sps:$4 sm:$0xff]  }
 0x163   : > { %3096 = vmatmul.mubr.bf16.gmra.mxu0 %v2868_v31  ;;  %v1012_v61 = vpop.f32.mrf.mxu0  ;;  %v3271_v31 = vor.u32 %v3270_v60, %v3267_v35  ;;  %v3298_v24 = vor.u32 %v3297_v18, %v3294_v39 }
 0x164   : > { %3513 = vmatmul.mubr.bf16.gmra.mxu1 %v3236_v16  ;;  %v1265_v55 = vpop.f32.mrf.mxu1  ;;  %3809 = vmatpush1.bf16.msra.mxu0 %v9080_v56  ;;  %v3283_v16 = vshrl.u32 %v10382_v49, 16  ;;  %v8101_v49 = vcombine.low %v10465_v2, %v10465_v2 }
 0x165   : > { %3105 = vmatprep.mubr.bf16.mxu0 %v2874_v21  ;;  %v10463_v1 = vadd.f32 %v1265_v55, %v1012_v61  ;;  %3810 = vmatprep.subr.bf16.mxu0 %v9085_v45  ;;  %v1014_v9 = vpop.f32.mrf.mxu0 }
 0x166   : > { %3522 = vmatprep.mubr.bf16.mxu1 %v3263_v13  ;;  %v1267_v59 = vpop.f32.mrf.mxu1  ;;  %v9095_v13 = vld [vmem:[#allocation7 + $0x810] ss:$8 sps:$4 sm:$0xff]   ;;  %v3285_v55 = vrot.slane %v3283_v16, 2  ;;  %v2879_v2 = vrot.slane %v8101_v49, 2  ;;  %v9122_v49 = vld [vmem:[#allocation7 + $0x8a4] ss:$8 sps:$4 sm:$0xff]  }
 0x167   : > { %v10468_v48 = vadd.f32 %v1267_v59, %v1014_v9  ;;  %v1016_v7 = vpop.f32.mrf.mxu0  ;;  %v3288_v9 = vrot.slane %v3286_v30, 3 }
 0x168   : > { %v1269_v6 = vpop.f32.mrf.mxu1  ;;  %3811 = vmatpush1.bf16.msra.mxu0 %v9083_v42 }
 0x169   : > { %v10476_v53 = vadd.f32 %v1269_v6, %v1016_v7  ;;  %3812 = vmatprep.subr.bf16.mxu0 %v9088_v0  ;;  %v10481_v56 = vpop.f32.mrf.mxu0  ;;  %v3272_v0 = vsel %vm12454_vm5, %v3253_v12, %v3271_v31  ;;  %v3299_v12 = vsel %vm12454_vm5, %v3280_v32, %v3298_v24  ;;  %v3289_v7 = vor.u32 %v3288_v9, %v3285_v55  ;;  %v9114_v24 = vld [vmem:[#allocation7 + $0x8c0] ss:$8 sps:$4 sm:$0xff]   ;;  %v9125_v9 = vld [vmem:[#allocation7 + $0x894] ss:$8 sps:$4 sm:$0xff]  }
 0x16a   : > { %v10483_v25 = vpop.f32.mrf.mxu1  ;;  %v9120_v55 = vld [vmem:[#allocation7 + $0x8a0] ss:$8 sps:$4 sm:$0xff]  }
 0x16b   : > { %3106 = vmatmul.mubr.bf16.gmra.mxu0 %v2872_v54  ;;  %v1022_v45 = vpop.f32.mrf.mxu0  ;;  %v3290_v39 = vsel %vm12454_vm5, %v3271_v31, %v3289_v7 }
 0x16c   : > { %3523 = vmatmul.mubr.bf16.gmra.mxu1 %v3254_v41  ;;  %v1275_v27 = vpop.f32.mrf.mxu1  ;;  %3813 = vmatpush1.bf16.msra.mxu0 %v9086_v36  ;;  %v2882_v36 = vsel %vm12457_vm2, %v2877_v22, %v2881_v17  ;;  %v9103_v41 = vld [vmem:[#allocation7 + $0x8f0] ss:$8 sps:$4 sm:$0xff]  }
 0x16d   : > { %3115 = vmatprep.mubr.bf16.mxu0 %v2878_v11  ;;  %v10489_v19 = vadd.f32 %v1275_v27, %v1022_v45  ;;  %3814 = vmatprep.subr.bf16.mxu0 %v9091_v57  ;;  %v1024_v21 = vpop.f32.mrf.mxu0  ;;  %v9105_v57 = vld [vmem:[#allocation7 + $0x8f4] ss:$8 sps:$4 sm:$0xff]   ;;  %v9108_v45 = vld [vmem:[#allocation7 + $0x8e0] ss:$8 sps:$4 sm:$0xff]   ;;  %v9111_v17 = vld [vmem:[#allocation7 + $0x8d0] ss:$8 sps:$4 sm:$0xff]  }
 0x16e   : > { %3532 = vmatprep.mubr.bf16.mxu1 %v3281_v43  ;;  %v1277_v42 = vpop.f32.mrf.mxu1  ;;  %v2880_v43 = vsel %vm12457_vm2, %v2875_v23, %v2879_v2  ;;  %v9113_v27 = vld [vmem:[#allocation7 + $0x8d4] ss:$8 sps:$4 sm:$0xff]   ;;  %v9116_v23 = vld [vmem:[#allocation7 + $0x8c4] ss:$8 sps:$4 sm:$0xff]  }
 0x16f   : > { %v10491_v40 = vadd.f32 %v1277_v42, %v1024_v21  ;;  %v1026_v62 = vpop.f32.mrf.mxu0 }
 0x170   : > { %v1279_v61 = vpop.f32.mrf.mxu1  ;;  %3815 = vmatpush1.bf16.msra.mxu0 %v9089_v34 }
 0x171   : > { %v10497_v59 = vadd.f32 %v1279_v61, %v1026_v62  ;;  %3816 = vmatprep.subr.bf16.mxu0 %v9097_v47  ;;  %v10500_v14 = vpop.f32.mrf.mxu0 }
 0x172   : > { %v10502_v58 = vpop.f32.mrf.mxu1 }
 0x173   : > { %3116 = vmatmul.mubr.bf16.gmra.mxu0 %v2876_v3  ;;  %v1032_v35 = vpop.f32.mrf.mxu0 }
 0x174   : > { %3533 = vmatmul.mubr.bf16.gmra.mxu1 %v3272_v0  ;;  %v1285_v60 = vpop.f32.mrf.mxu1  ;;  %3817 = vmatpush1.bf16.msra.mxu0 %v9095_v13  ;;  %v9119_v0 = vld [vmem:[#allocation7 + $0x8b4] ss:$8 sps:$4 sm:$0xff]  }
 0x175   : > { %3125 = vmatprep.mubr.bf16.mxu0 %v2882_v36  ;;  %v10505_v6 = vadd.f32 %v1285_v60, %v1032_v35  ;;  %3818 = vmatprep.subr.bf16.mxu0 %v9100_v10  ;;  %v1034_v22 = vpop.f32.mrf.mxu0  ;;  %v9123_v36 = vld [vmem:[#allocation7 + $0x890] ss:$8 sps:$4 sm:$0xff]  }
 0x176   : > { %3542 = vmatprep.mubr.bf16.mxu1 %v3299_v12  ;;  %v1287_v54 = vpop.f32.mrf.mxu1  ;;  %v9126_v12 = vld [vmem:[#allocation7 + $0x880] ss:$8 sps:$4 sm:$0xff]  }
 0x177   : > { %v10507_v11 = vadd.f32 %v1287_v54, %v1034_v22  ;;  %v1036_v32 = vpop.f32.mrf.mxu0 }
 0x178   : > { %v1289_v34 = vpop.f32.mrf.mxu1  ;;  %3819 = vmatpush1.bf16.msra.mxu0 %v9098_v33  ;;  %v9128_v33 = vld [vmem:[#allocation7 + $0x884] ss:$8 sps:$4 sm:$0xff]  }
 0x179   : > { %v10511_v18 = vadd.f32 %v1289_v34, %v1036_v32  ;;  %3820 = vmatprep.subr.bf16.mxu0 %v9105_v57  ;;  %v10515_v16 = vpop.f32.mrf.mxu0 }
 0x17a   : > { %v10513_v47 = vpop.f32.mrf.mxu1 }
 0x17b   : > { %3126 = vmatmul.mubr.bf16.gmra.mxu0 %v2880_v43  ;;  %v1042_v21 = vpop.f32.mrf.mxu0 }
 0x17c   : > { %3543 = vmatmul.mubr.bf16.gmra.mxu1 %v3290_v39  ;;  %v1295_v30 = vpop.f32.mrf.mxu1  ;;  %3821 = vmatpush2.bf16.msra.mxu0 %v9103_v41 }
 0x17d   : > { %3836 = vmatprep.mubr.bf16.mxu0 %v10387_v20  ;;  %3822 = vmatprep.subr.bf16.mxu0 %v9110_v52  ;;  %v10518_v42 = vadd.f32 %v1295_v30, %v1042_v21  ;;  %v1044_v13 = vpop.f32.mrf.mxu0  ;;  %v9117_v20 = vld [vmem:[#allocation7 + $0x8b0] ss:$8 sps:$4 sm:$0xff]  }
 0x17e   : > { %v1297_v31 = vpop.f32.mrf.mxu1 }
 0x17f   : > { %v10520_v3 = vadd.f32 %v1297_v31, %v1044_v13  ;;  %v1046_v10 = vpop.f32.mrf.mxu0 }
 0x180   : > { %3823 = vmatpush2.bf16.msra.mxu0 %v9108_v45  ;;  %v1299_v62 = vpop.f32.mrf.mxu1 }
 0x181   : > { %3824 = vmatprep.subr.bf16.mxu0 %v9113_v27  ;;  %v10522_v61 = vadd.f32 %v1299_v62, %v1046_v10  ;;  %v10524_v57 = vpop.f32.mrf.mxu0 }
 0x182   : > { %v10526_v35 = vpop.f32.mrf.mxu1 }
 0x184   : > { %3825 = vmatpush2.bf16.msra.mxu0 %v9111_v17 }
 0x185   : > { %3826 = vmatprep.subr.bf16.mxu0 %v9116_v23 }
 0x188   : > { %3827 = vmatpush2.bf16.msra.mxu0 %v9114_v24 }
 0x189   : > { %3828 = vmatprep.subr.bf16.mxu0 %v9119_v0 }
 0x18c   : > { %3829 = vmatpush2.bf16.msra.mxu0 %v9117_v20 }
 0x18d   : > { %3830 = vmatprep.subr.bf16.mxu0 %v9122_v49 }
 0x190   : > { %3831 = vmatpush2.bf16.msra.mxu0 %v9120_v55 }
 0x191   : > { %3832 = vmatprep.subr.bf16.mxu0 %v9125_v9 }
 0x194   : > { %3833 = vmatpush2.bf16.msra.mxu0 %v9123_v36 }
 0x195   : > { %3834 = vmatprep.subr.bf16.mxu0 %v9128_v33 }
 0x198   : > { %3835 = vmatpush2.bf16.msra.mxu0 %v9126_v12 }
 0x19b   : > { %v1569_v60 = vpop.f32.mrf.mxu0  ;;  %3837 = vmatmul.mubr.bf16.vlgmr.msra.gmra.mxu0 %v10392_v8 }
 0x19c   : > { %v1952_v2 = vpop.f32.mrf.mxu1  ;;  %v1618_v7 = vadd.f32 %v1569_v60, %v10439_v63  ;;  %3846 = vmatprep.mubr.bf16.mxu0 %v10321_v5 }
 0x19d   : > { %v1571_v22 = vpop.f32.mrf.mxu0 }
 0x19e   : > { %v1954_v54 = vpop.f32.mrf.mxu1  ;;  %v1619_v41 = vadd.f32 %v1571_v22, %v10444_v51  ;;  %v10532_v52 = vadd.f32 %v1952_v2, %v1618_v7 }
 0x19f   : > { %v1573_v32 = vpop.f32.mrf.mxu0 }
 0x1a0   : > { %v1956_v34 = vpop.f32.mrf.mxu1  ;;  %v1620_v43 = vadd.f32 %v1573_v32, %v10451_v29  ;;  %v10535_v39 = vadd.f32 %v1954_v54, %v1619_v41 }
 0x1a1   : > { %v10537_v45 = vpop.f32.mrf.mxu0 }
 0x1a2   : > { %v10539_v8 = vpop.f32.mrf.mxu1  ;;  %v10541_v27 = vadd.f32 %v1956_v34, %v1620_v43 }
 0x1a3   : > { %v1579_v63 = vpop.f32.mrf.mxu0  ;;  %3847 = vmatmul.mubr.bf16.gmra.mxu0 %v10337_v50 }
 0x1a4   : > { %v1962_v5 = vpop.f32.mrf.mxu1  ;;  %v1622_v51 = vadd.f32 %v1579_v63, %v10463_v1  ;;  %3856 = vmatprep.mubr.bf16.mxu0 %v10343_v26  ;;  %v9131_v63 = vld [vmem:[#allocation7 + $0x974] ss:$8 sps:$4 sm:$0xff]  }
 0x1a5   : > { %v1581_v30 = vpop.f32.mrf.mxu0  ;;  %4818 = vmatprep.subr.bf16.mxu0 %v9131_v63  ;;  %v9156_v63 = vld [vmem:[#allocation7 + $0x910] ss:$8 sps:$4 sm:$0xff]  }
 0x1a6   : > { %v1964_v17 = vpop.f32.mrf.mxu1  ;;  %v1623_v29 = vadd.f32 %v1581_v30, %v10468_v48  ;;  %v10547_v23 = vadd.f32 %v1962_v5, %v1622_v51 }
 0x1a7   : > { %v1583_v21 = vpop.f32.mrf.mxu0 }
 0x1a8   : > { %v1966_v31 = vpop.f32.mrf.mxu1  ;;  %v1624_v13 = vadd.f32 %v1583_v21, %v10476_v53  ;;  %v10550_v24 = vadd.f32 %v1964_v17, %v1623_v29  ;;  %v9134_v17 = vld [vmem:[#allocation7 + $0x964] ss:$8 sps:$4 sm:$0xff]  }
 0x1a9   : > { %v10552_v0 = vpop.f32.mrf.mxu0 }
 0x1aa   : > { %v10554_v50 = vpop.f32.mrf.mxu1  ;;  %v10556_v10 = vadd.f32 %v1966_v31, %v1624_v13  ;;  %v9132_v31 = vld [vmem:[#allocation7 + $0x960] ss:$8 sps:$4 sm:$0xff]  }
 0x1ab   : > { %v1589_v1 = vpop.f32.mrf.mxu0  ;;  %3857 = vmatmul.mubr.bf16.gmra.mxu0 %v10350_v44 }
 0x1ac   : > { %v1972_v26 = vpop.f32.mrf.mxu1  ;;  %v1626_v48 = vadd.f32 %v1589_v1, %v10489_v19  ;;  %3866 = vmatprep.mubr.bf16.mxu0 %v10372_v38 }
 0x1ad   : > { %v1591_v62 = vpop.f32.mrf.mxu0 }
 0x1ae   : > { %v1974_v20 = vpop.f32.mrf.mxu1  ;;  %v1627_v53 = vadd.f32 %v1591_v62, %v10491_v40  ;;  %v10562_v49 = vadd.f32 %v1972_v26, %v1626_v48  ;;  %v9137_v62 = vld [vmem:[#allocation7 + $0x954] ss:$8 sps:$4 sm:$0xff]  }
 0x1af   : > { %v1593_v55 = vpop.f32.mrf.mxu0 }
 0x1b0   : > { %v1976_v9 = vpop.f32.mrf.mxu1  ;;  %v1628_v36 = vadd.f32 %v1593_v55, %v10497_v59  ;;  %v10565_v33 = vadd.f32 %v1974_v20, %v1627_v53  ;;  %v9135_v53 = vld [vmem:[#allocation7 + $0x950] ss:$8 sps:$4 sm:$0xff]   ;;  %v9140_v55 = vld [vmem:[#allocation7 + $0x944] ss:$8 sps:$4 sm:$0xff]  }
 0x1b1   : > { %v10567_v12 = vpop.f32.mrf.mxu0 }
 0x1b2   : > { %v10569_v44 = vpop.f32.mrf.mxu1  ;;  %v10571_v60 = vadd.f32 %v1976_v9, %v1628_v36  ;;  %v9146_v9 = vld [vmem:[#allocation7 + $0x934] ss:$8 sps:$4 sm:$0xff]   ;;  %v9147_v36 = vld [vmem:[#allocation7 + $0xa60] ss:$8 sps:$4 sm:$0xff]  }
 0x1b3   : > { %v1599_v19 = vpop.f32.mrf.mxu0  ;;  %3867 = vmatmul.mubr.bf16.gmra.mxu0 %v10399_v37 }
 0x1b4   : > { %v1982_v38 = vpop.f32.mrf.mxu1  ;;  %v1630_v40 = vadd.f32 %v1599_v19, %v10505_v6  ;;  %3876 = vmatprep.mubr.bf16.mxu0 %v10409_v4  ;;  %v9129_v4 = vld [vmem:[#allocation7 + $0x970] ss:$8 sps:$4 sm:$0xff]   ;;  %v9149_v19 = vld [vmem:[#allocation7 + $0xa64] ss:$8 sps:$4 sm:$0xff]  }
 0x1b5   : > { %v1601_v2 = vpop.f32.mrf.mxu0  ;;  %4819 = vmatpush1.bf16.msra.mxu0 %v9129_v4  ;;  %v9165_v4 = vld [vmem:[#allocation7 + $0xa30] ss:$8 sps:$4 sm:$0xff]  }
 0x1b6   : > { %v1984_v7 = vpop.f32.mrf.mxu1  ;;  %v1631_v59 = vadd.f32 %v1601_v2, %v10507_v11  ;;  %v10577_v22 = vadd.f32 %v1982_v38, %v1630_v40  ;;  %4820 = vmatprep.subr.bf16.mxu0 %v9134_v17  ;;  %v9144_v38 = vld [vmem:[#allocation7 + $0x930] ss:$8 sps:$4 sm:$0xff]   ;;  %v9152_v2 = vld [vmem:[#allocation7 + $0x924] ss:$8 sps:$4 sm:$0xff]  }
 0x1b7   : > { %v1603_v54 = vpop.f32.mrf.mxu0  ;;  %v9153_v40 = vld [vmem:[#allocation7 + $0xa50] ss:$8 sps:$4 sm:$0xff]  }
 0x1b8   : > { %v1986_v41 = vpop.f32.mrf.mxu1  ;;  %v1632_v32 = vadd.f32 %v1603_v54, %v10511_v18  ;;  %v10580_v34 = vadd.f32 %v1984_v7, %v1631_v59  ;;  %v9161_v7 = vld [vmem:[#allocation7 + $0xa44] ss:$8 sps:$4 sm:$0xff]   ;;  %v9150_v59 = vld [vmem:[#allocation7 + $0x920] ss:$8 sps:$4 sm:$0xff]  }
 0x1b9   : > { %v10582_v43 = vpop.f32.mrf.mxu0  ;;  %4821 = vmatpush1.bf16.msra.mxu0 %v9132_v31  ;;  %v9159_v54 = vld [vmem:[#allocation7 + $0xa40] ss:$8 sps:$4 sm:$0xff]   ;;  %v9170_v31 = vld [vmem:[#allocation7 + $0x9f4] ss:$8 sps:$4 sm:$0xff]  }
 0x1ba   : > { %v10584_v37 = vpop.f32.mrf.mxu1  ;;  %v10586_v6 = vadd.f32 %v1986_v41, %v1632_v32  ;;  %4822 = vmatprep.subr.bf16.mxu0 %v9137_v62  ;;  %v9158_v41 = vld [vmem:[#allocation7 + $0x914] ss:$8 sps:$4 sm:$0xff]  }
 0x1bb   : > { %v1609_v5 = vpop.f32.mrf.mxu0  ;;  %3877 = vmatmul.mubr.bf16.gmra.mxu0 %v10412_v28  ;;  %v9143_v28 = vld [vmem:[#allocation7 + $0xa74] ss:$8 sps:$4 sm:$0xff]  }
 0x1bc   : > { %v1992_v11 = vpop.f32.mrf.mxu1  ;;  %v1634_v51 = vadd.f32 %v1609_v5, %v10518_v42  ;;  %v9141_v42 = vld [vmem:[#allocation7 + $0xa70] ss:$8 sps:$4 sm:$0xff]   ;;  %4565 = vmatprep.subr.bf16.mxu1 %v9143_v28  ;;  %v9167_v32 = vld [vmem:[#allocation7 + $0xa34] ss:$8 sps:$4 sm:$0xff]   ;;  %v9164_v5 = vld [vmem:[#allocation7 + $0x904] ss:$8 sps:$4 sm:$0xff]  }
 0x1bd   : > { %v1611_v30 = vpop.f32.mrf.mxu0  ;;  %4566 = vmatpush1.bf16.msra.mxu1 %v9141_v42  ;;  %4823 = vmatpush1.bf16.msra.mxu0 %v9135_v53 }
 0x1be   : > { %v1994_v18 = vpop.f32.mrf.mxu1  ;;  %v1635_v29 = vadd.f32 %v1611_v30, %v10520_v3  ;;  %v10591_v21 = vadd.f32 %v1992_v11, %v1634_v51  ;;  %v9138_v3 = vld [vmem:[#allocation7 + $0x940] ss:$8 sps:$4 sm:$0xff]   ;;  %4824 = vmatprep.subr.bf16.mxu0 %v9140_v55  ;;  %4567 = vmatprep.subr.bf16.mxu1 %v9149_v19  ;;  %v9173_v51 = vld [vmem:[#allocation7 + $0xa24] ss:$8 sps:$4 sm:$0xff]  }
 0x1bf   : > { %v1613_v13 = vpop.f32.mrf.mxu0  ;;  %v9162_v11 = vld [vmem:[#allocation7 + $0x900] ss:$8 sps:$4 sm:$0xff]   ;;  %v9185_v55 = vld [vmem:[#allocation7 + $0xa04] ss:$8 sps:$4 sm:$0xff]  }
 0x1c0   : > { %v1996_v1 = vpop.f32.mrf.mxu1  ;;  %v1636_v26 = vadd.f32 %v1613_v13, %v10522_v61  ;;  %v10594_v48 = vadd.f32 %v1994_v18, %v1635_v29  ;;  %v9155_v61 = vld [vmem:[#allocation7 + $0xa54] ss:$8 sps:$4 sm:$0xff]   ;;  %v9171_v30 = vld [vmem:[#allocation7 + $0xa20] ss:$8 sps:$4 sm:$0xff]   ;;  %v9177_v13 = vld [vmem:[#allocation7 + $0xa10] ss:$8 sps:$4 sm:$0xff]  }
 0x1c1   : > { %4825 = vmatpush1.bf16.msra.mxu0 %v9138_v3  ;;  %4568 = vmatpush1.bf16.msra.mxu1 %v9147_v36  ;;  %v9179_v18 = vld [vmem:[#allocation7 + $0xa14] ss:$8 sps:$4 sm:$0xff]   ;;  %v10598_v17 = vpop.f32.mrf.mxu0  ;;  %v9176_v3 = vld [vmem:[#allocation7 + $0x9e4] ss:$8 sps:$4 sm:$0xff]   ;;  %v9174_v36 = vld [vmem:[#allocation7 + $0x9e0] ss:$8 sps:$4 sm:$0xff]  }
 0x1c2   : > { %v10596_v20 = vadd.f32 %v1996_v1, %v1636_v26  ;;  %4826 = vmatprep.subr.bf16.mxu0 %v9146_v9  ;;  %4569 = vmatprep.subr.bf16.mxu1 %v9155_v61  ;;  %v10600_v29 = vpop.f32.mrf.mxu1  ;;  %v9168_v1 = vld [vmem:[#allocation7 + $0x9f0] ss:$8 sps:$4 sm:$0xff]   ;;  %v9183_v19 = vld [vmem:[#allocation7 + $0xa00] ss:$8 sps:$4 sm:$0xff]  }
 0x1c5   : > { %4827 = vmatpush1.bf16.msra.mxu0 %v9144_v38  ;;  %4570 = vmatpush1.bf16.msra.mxu1 %v9153_v40 }
 0x1c6   : > { %4828 = vmatprep.subr.bf16.mxu0 %v9152_v2  ;;  %4571 = vmatprep.subr.bf16.mxu1 %v9161_v7  ;;  %v9191_v7 = vld [vmem:[#allocation7 + $0xaf4] ss:$8 sps:$4 sm:$0xff]  }
 0x1c9   : > { %4829 = vmatpush1.bf16.msra.mxu0 %v9150_v59  ;;  %4572 = vmatpush1.bf16.msra.mxu1 %v9159_v54  ;;  %v9182_v59 = vld [vmem:[#allocation7 + $0x9d4] ss:$8 sps:$4 sm:$0xff]  }
 0x1ca   : > { %4830 = vmatprep.subr.bf16.mxu0 %v9158_v41  ;;  %4573 = vmatprep.subr.bf16.mxu1 %v9167_v32  ;;  %v9180_v32 = vld [vmem:[#allocation7 + $0x9d0] ss:$8 sps:$4 sm:$0xff]  }
 0x1cd   : > { %4831 = vmatpush1.bf16.msra.mxu0 %v9156_v63  ;;  %4574 = vmatpush1.bf16.msra.mxu1 %v9165_v4  ;;  %v12489_v4 = vmov 0 }
 0x1ce   : > { %4832 = vmatprep.subr.bf16.mxu0 %v9164_v5  ;;  %4575 = vmatprep.subr.bf16.mxu1 %v9173_v51  ;;  %v12490_v4 = vsel %vm10627_vm8, 4294967295, %v12489_v4  ;;  %v456_v5 = vld [vmem:[#allocation3 + $0x38] sm:$0x33]  ;;  %v12492_v51 = vmov 0 }
 0x1cf   : > { %12491 = vst [vmem:[#allocation14_spill] sm:$0xff] %v12490_v4  ;;  %v12493_v51 = vsel %vm10637_vm12, 4294967295, %v12492_v51 }
 0x1d0   : > { %12494 = vst [vmem:[#allocation15_spill] sm:$0xff] %v12493_v51 }
 0x1d1   : > { %4833 = vmatpush1.bf16.msra.mxu0 %v9162_v11  ;;  %4576 = vmatpush1.bf16.msra.mxu1 %v9171_v30  ;;  %v9188_v30 = vld [vmem:[#allocation7 + $0x9c4] ss:$8 sps:$4 sm:$0xff]  }
 0x1d2   : > { %4577 = vmatprep.subr.bf16.mxu1 %v9179_v18  ;;  %4834 = vmatprep.subr.bf16.mxu0 %v9170_v31  ;;  %v9186_v31 = vld [vmem:[#allocation7 + $0x9c0] ss:$8 sps:$4 sm:$0xff]  }
 0x1d5   : > { %4835 = vmatpush2.bf16.msra.mxu0 %v9168_v1  ;;  %4578 = vmatpush1.bf16.msra.mxu1 %v9177_v13  ;;  %v457_v13 = vsel %vm12461_vm15, 0, %v456_v5  ;;  %v12495_v1 = vmov 0 }
 0x1d6   : > { %4836 = vmatprep.subr.bf16.mxu0 %v9176_v3  ;;  %4579 = vmatprep.subr.bf16.mxu1 %v9185_v55  ;;  %v12496_v1 = vsel %vm10653_vm6, 4294967295, %v12495_v1  ;;  %458 = vst [vmem:[#allocation3 + $0x38] sm:$0x33] %v457_v13  ;;  %v12498_v55 = vmov 0  ;;  %v9200_v13 = vld [vmem:[#allocation7 + $0x9a4] ss:$8 sps:$4 sm:$0xff]  }
 0x1d7   : > { %12497 = vst [vmem:[#allocation16_spill] sm:$0xff] %v12496_v1  ;;  %v12499_v55 = vsel %vm10659_vm9, 4294967295, %v12498_v55 }
 0x1d8   : > { %12500 = vst [vmem:[#allocation17_spill] sm:$0xff] %v12499_v55  ;;  %v220_v55 = vlaneseq }
 0x1d9   : > { %4837 = vmatpush2.bf16.msra.mxu0 %v9174_v36  ;;  %4580 = vmatpush1.bf16.msra.mxu1 %v9183_v19  ;;  %v9194_v19 = vld [vmem:[#allocation7 + $0x9b4] ss:$8 sps:$4 sm:$0xff]  }
 0x1da   : > { %4581 = vmatprep.subr.bf16.mxu1 %v9191_v7  ;;  %4838 = vmatprep.subr.bf16.mxu0 %v9182_v59 }
 0x1db   : > { %v2370_v26 = vpop.f32.mrf.mxu0 }
 0x1dc   : > { %v10602_v28 = vpop.f32.mrf.mxu1  ;;  %v10605_v62 = vadd.f32 %v2370_v26, %v10532_v52  ;;  %v466_v26 = vld [vmem:[#allocation3 + $0x18] sm:$0xee] }
 0x1dd   : > { %v2372_v42 = vpop.f32.mrf.mxu0  ;;  %4839 = vmatpush2.bf16.msra.mxu0 %v9180_v32  ;;  %v467_v59 = vsel %vm12464_vm10, 0, %v466_v26  ;;  %v9201_v32 = vld [vmem:[#allocation7 + $0xad0] ss:$8 sps:$4 sm:$0xff]  }
 0x1de   : > { %v10607_v53 = vpop.f32.mrf.mxu1  ;;  %v10610_v9 = vadd.f32 %v2372_v42, %v10535_v39  ;;  %v9189_v39 = vld [vmem:[#allocation7 + $0xaf0] ss:$8 sps:$4 sm:$0xff]   ;;  %4840 = vmatprep.subr.bf16.mxu0 %v9188_v30  ;;  %v9195_v42 = vld [vmem:[#allocation7 + $0xae0] ss:$8 sps:$4 sm:$0xff]   ;;  %468 = vst [vmem:[#allocation3 + $0x18] sm:$0xee] %v467_v59 }
 0x1df   : > { %v2374_v61 = vpop.f32.mrf.mxu0  ;;  %4582 = vmatpush2.bf16.msra.mxu1 %v9189_v39  ;;  %v9192_v39 = vld [vmem:[#allocation7 + $0x9b0] ss:$8 sps:$4 sm:$0xff]  }
 0x1e0   : > { %v10612_v38 = vpop.f32.mrf.mxu1  ;;  %v10615_v52 = vadd.f32 %v2374_v61, %v10541_v27  ;;  %v9203_v61 = vld [vmem:[#allocation7 + $0xad4] ss:$8 sps:$4 sm:$0xff]   ;;  %v9204_v59 = vld [vmem:[#allocation7 + $0x990] ss:$8 sps:$4 sm:$0xff]  }
 0x1e1   : > { %v10617_v40 = vpop.f32.mrf.mxu0  ;;  %4841 = vmatpush2.bf16.msra.mxu0 %v9186_v31 }
 0x1e2   : > { %v10619_v2 = vpop.f32.mrf.mxu1  ;;  %4842 = vmatprep.subr.bf16.mxu0 %v9194_v19 }
 0x1e3   : > { %v2380_v54 = vpop.f32.mrf.mxu0 }
 0x1e4   : > { %v10621_v41 = vpop.f32.mrf.mxu1  ;;  %v10624_v63 = vadd.f32 %v2380_v54, %v10547_v23 }
 0x1e5   : > { %v2382_v27 = vpop.f32.mrf.mxu0  ;;  %4843 = vmatpush2.bf16.msra.mxu0 %v9192_v39  ;;  %v9213_v39 = vld [vmem:[#allocation7 + $0xab0] ss:$8 sps:$4 sm:$0xff]  }
 0x1e6   : > { %v10632_v11 = vadd.f32 %v2382_v27, %v10550_v24  ;;  %v10634_v23 = vpop.f32.mrf.mxu1  ;;  %4844 = vmatprep.subr.bf16.mxu0 %v9200_v13 }
 0x1e7   : > { %v2384_v18 = vpop.f32.mrf.mxu0 }
 0x1e8   : > { %v10646_v24 = vadd.f32 %v2384_v18, %v10556_v10  ;;  %v9197_v10 = vld [vmem:[#allocation7 + $0xae4] ss:$8 sps:$4 sm:$0xff]   ;;  %v10663_v36 = vpop.f32.mrf.mxu1 }
 0x1e9   : > { %v10657_v3 = vpop.f32.mrf.mxu0  ;;  %4583 = vmatprep.subr.bf16.mxu1 %v9197_v10  ;;  %v9209_v18 = vld [vmem:[#allocation7 + $0xac4] ss:$8 sps:$4 sm:$0xff]   ;;  %v9207_v10 = vld [vmem:[#allocation7 + $0xac0] ss:$8 sps:$4 sm:$0xff]  }
 0x1ea   : > { %4584 = vmatpush2.bf16.msra.mxu1 %v9195_v42  ;;  %v10677_v5 = vpop.f32.mrf.mxu1 }
 0x1eb   : > { %v2390_v7 = vpop.f32.mrf.mxu0  ;;  %4585 = vmatprep.subr.bf16.mxu1 %v9203_v61 }
 0x1ec   : > { %v10675_v54 = vadd.f32 %v2390_v7, %v10562_v49  ;;  %v9198_v49 = vld [vmem:[#allocation7 + $0x9a0] ss:$8 sps:$4 sm:$0xff]   ;;  %v10687_v42 = vpop.f32.mrf.mxu1  ;;  %v9206_v7 = vld [vmem:[#allocation7 + $0x994] ss:$8 sps:$4 sm:$0xff]  }
 0x1ed   : > { %v2392_v27 = vpop.f32.mrf.mxu0  ;;  %4845 = vmatpush2.bf16.msra.mxu0 %v9198_v49  ;;  %v9212_v49 = vld [vmem:[#allocation7 + $0x984] ss:$8 sps:$4 sm:$0xff]  }
 0x1ee   : > { %v10680_v30 = vadd.f32 %v2392_v27, %v10565_v33  ;;  %4586 = vmatpush2.bf16.msra.mxu1 %v9201_v32  ;;  %4846 = vmatprep.subr.bf16.mxu0 %v9206_v7  ;;  %v9215_v27 = vld [vmem:[#allocation7 + $0xab4] ss:$8 sps:$4 sm:$0xff]  }
 0x1ef   : > { %v2394_v31 = vpop.f32.mrf.mxu0  ;;  %4587 = vmatprep.subr.bf16.mxu1 %v9209_v18  ;;  %v10694_v18 = vpop.f32.mrf.mxu1 }
 0x1f0   : > { %v10683_v26 = vadd.f32 %v2394_v31, %v10571_v60  ;;  %v12448_v60 = vmov 0   ;;  %12504 = vst [vmem:[#allocation21_spill] sm:$0xff] %v10694_v18 }
 0x1f1   : > { %v10685_v19 = vpop.f32.mrf.mxu0  ;;  %448 = vst [vmem:[#allocation3 + $0x30] sm:$0xff] %v12448_v60  ;;  %469 = vst [vmem:[#allocation3] sm:$0xff] %v12448_v60  ;;  %4847 = vmatpush2.bf16.msra.mxu0 %v9204_v59  ;;  %v10704_v60 = vpop.f32.mrf.mxu1 }
 0x1f2   : > { %12501 = vst [vmem:[#allocation18_spill] sm:$0xff] %v10683_v26  ;;  %12502 = vst [vmem:[#allocation19_spill] sm:$0xff] %v10685_v19  ;;  %4588 = vmatpush2.bf16.msra.mxu1 %v9207_v10  ;;  %4848 = vmatprep.subr.bf16.mxu0 %v9212_v49  ;;  %v9218_v49 = vld [vmem:[#allocation7 + $0xc74] ss:$8 sps:$4 sm:$0xff]   ;;  %v1292_v26 = vadd.f32 %v10513_v47, %v10515_v16 }
 0x1f3   : > { %v2400_v61 = vpop.f32.mrf.mxu0  ;;  %4589 = vmatprep.subr.bf16.mxu1 %v9215_v27  ;;  %12508 = vst [vmem:[#allocation25_spill] sm:$0xff] %v10704_v60  ;;  %v10709_v59 = vpop.f32.mrf.mxu1  ;;  %v9221_v27 = vld [vmem:[#allocation7 + $0xaa4] ss:$8 sps:$4 sm:$0xff]  }
 0x1f4   : > { %v10690_v33 = vadd.f32 %v2400_v61, %v10577_v22  ;;  %v9210_v61 = vld [vmem:[#allocation7 + $0x980] ss:$8 sps:$4 sm:$0xff]   ;;  %12510 = vst [vmem:[#allocation27_spill] sm:$0xff] %v10709_v59 }
 0x1f5   : > { %v2402_v32 = vpop.f32.mrf.mxu0  ;;  %4849 = vmatpush2.bf16.msra.mxu0 %v9210_v61  ;;  %v10717_v51 = vpop.f32.mrf.mxu1 }
 0x1f6   : > { %12503 = vst [vmem:[#allocation20_spill] sm:$0xff] %v10690_v33  ;;  %v10697_v31 = vadd.f32 %v2402_v32, %v10580_v34  ;;  %4590 = vmatpush2.bf16.msra.mxu1 %v9213_v39  ;;  %12513 = vst [vmem:[#allocation30_spill] sm:$0xff] %v10717_v51  ;;  %5514 = vmatprep.subr.bf16.mxu0 %v9218_v49 }
 0x1f7   : > { %v2404_v13 = vpop.f32.mrf.mxu0  ;;  %4591 = vmatprep.subr.bf16.mxu1 %v9221_v27  ;;  %v10719_v61 = vpop.f32.mrf.mxu1  ;;  %v9239_v27 = vld [vmem:[#allocation7 + $0xb74] ss:$8 sps:$4 sm:$0xff]  }
 0x1f8   : > { %12505 = vst [vmem:[#allocation22_spill] sm:$0xff] %v10697_v31  ;;  %v10700_v22 = vadd.f32 %v2404_v13, %v10586_v6  ;;  %v9219_v13 = vld [vmem:[#allocation7 + $0xaa0] ss:$8 sps:$4 sm:$0xff]   ;;  %12514 = vst [vmem:[#allocation31_spill] sm:$0xff] %v10719_v61 }
 0x1f9   : > { %v10702_v10 = vpop.f32.mrf.mxu0  ;;  %v10721_v1 = vpop.f32.mrf.mxu1 }
 0x1fa   : > { %12506 = vst [vmem:[#allocation23_spill] sm:$0xff] %v10700_v22  ;;  %12507 = vst [vmem:[#allocation24_spill] sm:$0xff] %v10702_v10  ;;  %4592 = vmatpush2.bf16.msra.mxu1 %v9219_v13 }
 0x1fb   : > { %v2410_v7 = vpop.f32.mrf.mxu0  ;;  %12515 = vst [vmem:[#allocation32_spill] sm:$0xff] %v10721_v1 }
 0x1fc   : > { %v10707_v4 = vadd.f32 %v2410_v7, %v10591_v21  ;;  %v9225_v21 = vld [vmem:[#allocation7 + $0xa90] ss:$8 sps:$4 sm:$0xff]   ;;  %v9227_v7 = vld [vmem:[#allocation7 + $0xa94] ss:$8 sps:$4 sm:$0xff]  }
 0x1fd   : > { %v2412_v34 = vpop.f32.mrf.mxu0  ;;  %4593 = vmatprep.subr.bf16.mxu1 %v9227_v7  ;;  %v10733_v7 = vshrl.u32 %v220_v55, 7 }
 0x1fe   : > { %12509 = vst [vmem:[#allocation26_spill] sm:$0xff] %v10707_v4  ;;  %v10712_v32 = vadd.f32 %v2412_v34, %v10594_v48  ;;  %4594 = vmatpush2.bf16.msra.mxu1 %v9225_v21  ;;  %v9233_v48 = vld [vmem:[#allocation7 + $0xa84] ss:$8 sps:$4 sm:$0xff]   ;;  %v9231_v34 = vld [vmem:[#allocation7 + $0xa80] ss:$8 sps:$4 sm:$0xff]  }
 0x1ff   : > { %v2414_v6 = vpop.f32.mrf.mxu0  ;;  %4595 = vmatprep.subr.bf16.mxu1 %v9233_v48  ;;  %v223_v1 = vadd.s32 16, %v10733_v7  ;;  %v10815_v59 = vadd.s32 64, %v10733_v7 }
 0x200   : > { %12511 = vst [vmem:[#allocation28_spill] sm:$0xff] %v10712_v32  ;;  %v10715_v39 = vadd.f32 %v2414_v6, %v10596_v20  ;;  %v10723_v20 = vpop.f32.mrf.mxu1 }
 0x201   : > { %12516 = vst [vmem:[#allocation33_spill] sm:$0xff] %v10723_v20  ;;  %v10729_v49 = vpop.f32.mrf.mxu0 }
 0x202   : > { %12512 = vst [vmem:[#allocation29_spill] sm:$0xff] %v10715_v39  ;;  %4596 = vmatpush2.bf16.msra.mxu1 %v9231_v34  ;;  %v10725_v6 = vpop.f32.mrf.mxu1  ;;  %12519 = vst [vmem:[#allocation36_spill] sm:$0xff] %v10729_v49 }
 0x203   : > { %12517 = vst [vmem:[#allocation34_spill] sm:$0xff] %v10725_v6  ;;  %5131 = vmatprep.subr.bf16.mxu1 %v9239_v27  ;;  %v10742_v34 = vmul.u32.u64.low 3435973837, %v10733_v7  ;;  %v10743_v6 = vmul.u32.u64.high 3435973837, %v10733_v7, %v10742_v34 }
 0x204   : > { %v10727_v13 = vpop.f32.mrf.mxu1 }
 0x205   : > { %12518 = vst [vmem:[#allocation35_spill] sm:$0xff] %v10727_v13 }
 0x206   : > { %v10731_v39 = vpop.f32.mrf.mxu1 }
 0x207   : > { %12520 = vst [vmem:[#allocation37_spill] sm:$0xff] %v10731_v39 }
 0x208   : > { %v10739_v48 = vpop.f32.mrf.mxu1 }
 0x209   : > { %12523 = vst [vmem:[#allocation40_spill] sm:$0xff] %v10739_v48  ;;  %v237_v48 = vshrl.u32 %v10743_v6, 3  ;;  %v10777_v6 = vadd.s32 24, %v10733_v7 }
 0x21b   : > { %v10735_v21 = vpop.f32.mrf.mxu0 }
 0x21c   : > { %12521 = vst [vmem:[#allocation38_spill] sm:$0xff] %v10735_v21  ;;  %v10747_v13 = vpop.f32.mrf.mxu1 }
 0x21d   : > { %v10737_v32 = vpop.f32.mrf.mxu0  ;;  %12525 = vst [vmem:[#allocation42_spill] sm:$0xff] %v10747_v13 }
 0x21e   : > { %12522 = vst [vmem:[#allocation39_spill] sm:$0xff] %v10737_v32  ;;  %v10753_v55 = vpop.f32.mrf.mxu1  ;;  %v222_v32 = vadd.s32 8, %v10733_v7 }
 0x21f   : > { %v10745_v27 = vpop.f32.mrf.mxu0  ;;  %12528 = vst [vmem:[#allocation45_spill] sm:$0xff] %v10753_v55  ;;  %v10769_v61 = vmul.u32.u64.low 3435973837, %v223_v1  ;;  %v10770_v55 = vmul.u32.u64.high 3435973837, %v223_v1, %v10769_v61 }
 0x220   : > { %12524 = vst [vmem:[#allocation41_spill] sm:$0xff] %v10745_v27  ;;  %v10762_v34 = vpop.f32.mrf.mxu1 }
 0x221   : > { %v10749_v4 = vpop.f32.mrf.mxu0  ;;  %12531 = vst [vmem:[#allocation48_spill] sm:$0xff] %v10762_v34  ;;  %v10783_v34 = vadd.s32 32, %v10733_v7 }
 0x222   : > { %12526 = vst [vmem:[#allocation43_spill] sm:$0xff] %v10749_v4  ;;  %v10766_v13 = vmul.u32.u64.low 3435973837, %v222_v32  ;;  %v10767_v4 = vmul.u32.u64.high 3435973837, %v222_v32, %v10766_v13 }
 0x223   : > { %v10751_v20 = vpop.f32.mrf.mxu0 }
 0x224   : > { %12527 = vst [vmem:[#allocation44_spill] sm:$0xff] %v10751_v20  ;;  %v238_v20 = vmul.u32 10, %v237_v48  ;;  %v248_v13 = vshrl.u32 %v10767_v4, 3  ;;  %v10789_v61 = vmul.u32.u64.low 3435973837, %v10777_v6  ;;  %v10790_v48 = vmul.u32.u64.high 3435973837, %v10777_v6, %v10789_v61 }
 0x225   : > { %v10755_v39 = vpop.f32.mrf.mxu0  ;;  %v1272_v4 = vadd.f32 %v10483_v25, %v10481_v56  ;;  %v10806_v61 = vadd.s32 56, %v10733_v7 }
 0x226   : > { %12529 = vst [vmem:[#allocation46_spill] sm:$0xff] %v10755_v39  ;;  %v10772_v39 = vpop.f32.mrf.mxu1  ;;  %v270_v47 = vshrl.u32 %v10790_v48, 3 }
 0x227   : > { %v10760_v22 = vpop.f32.mrf.mxu0  ;;  %12533 = vst [vmem:[#allocation50_spill] sm:$0xff] %v10772_v39  ;;  %v10793_v39 = vadd.s32 40, %v10733_v7 }
 0x228   : > { %12530 = vst [vmem:[#allocation47_spill] sm:$0xff] %v10760_v22  ;;  %v239_v22 = vsub.s32 %v10733_v7, %v238_v20  ;;  %v10780_v21 = vpop.f32.mrf.mxu1  ;;  %v259_v20 = vshrl.u32 %v10770_v55, 3  ;;  %v10811_v55 = vmul.u32.u64.low 3435973837, %v10783_v34  ;;  %v10812_v49 = vmul.u32.u64.high 3435973837, %v10783_v34, %v10811_v55 }
 0x229   : > { %v10764_v27 = vpop.f32.mrf.mxu0  ;;  %12535 = vst [vmem:[#allocation52_spill] sm:$0xff] %v10780_v21  ;;  %v10797_v21 = vadd.s32 48, %v10733_v7  ;;  %v10820_v56 = vmul.u32.u64.low 3435973837, %v10793_v39  ;;  %v10821_v25 = vmul.u32.u64.high 3435973837, %v10793_v39, %v10820_v56 }
 0x22a   : > { %12532 = vst [vmem:[#allocation49_spill] sm:$0xff] %v10764_v27  ;;  %vm341_vm11 = vcmp.ne.s32.totalorder %v239_v22, 0  ;;  %vm351_vm13 = vcmp.lt.s32.totalorder %v239_v22, 0  ;;  %v10808_v51 = vpop.f32.mrf.mxu1  ;;  %v371_v33 = vadd.s32 10, %v239_v22 }
 0x22b   : > { %v10774_v31 = vpop.f32.mrf.mxu0  ;;  %12537 = vst [vmem:[#allocation54_spill] sm:$0xff] %v10808_v51  ;;  %vm361_vm14 = vmand %vm351_vm13, %vm341_vm11  ;;  %v260_v51 = vmul.u32 10, %v259_v20  ;;  %v10828_v60 = vmul.u32.u64.low 3435973837, %v10797_v21  ;;  %v10829_v55 = vmul.u32.u64.high 3435973837, %v10797_v21, %v10828_v60 }
 0x22c   : > { %12534 = vst [vmem:[#allocation51_spill] sm:$0xff] %v10774_v31  ;;  %v1262_v31 = vadd.f32 %v10456_v46, %v10454_v15  ;;  %v249_v46 = vmul.u32 10, %v248_v13  ;;  %v10835_v13 = vmul.u32.u64.low 3435973837, %v10806_v61  ;;  %v10836_v10 = vmul.u32.u64.high 3435973837, %v10806_v61, %v10835_v13  ;;  %v10839_v19 = vpop.f32.mrf.mxu1 }
 0x22d   : > { %v10785_v27 = vpop.f32.mrf.mxu0  ;;  %v381_v18 = vsel %vm361_vm14, %v371_v33, %v239_v22  ;;  %v1633_v22 = vadd.f32 %v10582_v43, %v1292_v26  ;;  %v281_v13 = vshrl.u32 %v10812_v49, 3  ;;  %v10882_v26 = vsub.s32 1, %v10733_v7 }
 0x22e   : > { %12536 = vst [vmem:[#allocation53_spill] sm:$0xff] %v10785_v27  ;;  %v1282_v27 = vadd.f32 %v10502_v58, %v10500_v14  ;;  %v10824_v14 = vadd.s32 72, %v10733_v7  ;;  %v1621_v58 = vadd.f32 %v10537_v45, %v1262_v31  ;;  %v250_v60 = vsub.s32 %v222_v32, %v249_v46  ;;  %v10863_v46 = vpop.f32.mrf.mxu1 }
 0x22f   : > { %v10817_v15 = vpop.f32.mrf.mxu0  ;;  %v10842_v45 = vmul.u32.u64.low 3435973837, %v10815_v59  ;;  %v10843_v31 = vmul.u32.u64.high 3435973837, %v10815_v59, %v10842_v45  ;;  %vm391_vm11 = vcmp.ge.s32.totalorder %v381_v18, 1  ;;  %vm401_vm13 = vcmp.le.s32.totalorder %v381_v18, 8  ;;  %12542 = vst [vmem:[#allocation57_spill] sm:$0xff] %v10882_v26 }
 0x230   : > { %12538 = vst [vmem:[#allocation55_spill] sm:$0xff] %v10817_v15  ;;  %v1625_v15 = vadd.f32 %v10552_v0, %v1272_v4  ;;  %v1629_v56 = vadd.f32 %v10567_v12, %v1282_v27  ;;  %v10849_v16 = vmul.u32.u64.low 3435973837, %v10824_v14  ;;  %v10850_v0 = vmul.u32.u64.high 3435973837, %v10824_v14, %v10849_v16  ;;  %vm10870_vm4 = vmand %vm391_vm11, %vm401_vm13 }
 0x231   : > { %v10845_v20 = vpop.f32.mrf.mxu0  ;;  %v1302_v4 = vadd.f32 %v10526_v35, %v10524_v57  ;;  %v2004_v12 = vadd.f32 %v10539_v8, %v1621_v58  ;;  %v261_v27 = vsub.s32 %v223_v1, %v260_v51  ;;  %v441_v35 = vld [vmem:[#allocation9] ss:$4 sm:$0x3]  ;;  %vm342_vm14 = vcmp.ne.s32.totalorder %v250_v60, 0 }
 0x232   : > { %v10856_v33 = vadd.f32 %v10554_v50, %v1625_v15  ;;  %v10860_v32 = vadd.f32 %v10569_v44, %v1629_v56  ;;  %vm352_vm5 = vcmp.lt.s32.totalorder %v250_v60, 0  ;;  %v271_v8 = vmul.u32 10, %v270_v47  ;;  %v443_v1 = vld [vmem:[#allocation9 + $0x1] ss:$4 sm:$0x3] }
 0x233   : > { %v1637_v48 = vadd.f32 %v10598_v17, %v1302_v4  ;;  %v10866_v57 = vpop.f32.mrf.mxu0  ;;  %v292_v50 = vshrl.u32 %v10821_v25, 3  ;;  %v10875_v44 = vsub.s32 0, %v10733_v7  ;;  %vm343_vm3 = vcmp.ne.s32.totalorder %v261_v27, 0  ;;  %v10888_v25 = vpop.f32.mrf.mxu1  ;;  %vm10892_vm11 = vmand %vm352_vm5, %vm342_vm14 }
 0x234   : > { %vm353_vm2 = vcmp.lt.s32.totalorder %v261_v27, 0  ;;  %v303_v17 = vshrl.u32 %v10829_v55, 3  ;;  %v10879_v51 = vadd.f32 %v10584_v37, %v1633_v22  ;;  %v372_v49 = vadd.s32 10, %v250_v60 }
 0x235   : > { %12541 = vst [vmem:[#allocation56_spill] sm:$0xff] %v10875_v44  ;;  %v314_v18 = vshrl.u32 %v10836_v10, 3  ;;  %v10886_v15 = vadd.f32 %v10600_v29, %v1637_v48  ;;  %v373_v37 = vadd.s32 10, %v261_v27  ;;  %v282_v55 = vmul.u32 10, %v281_v13  ;;  %v10897_v7 = vpop.f32.mrf.mxu0  ;;  %vm363_vm13 = vmand %vm353_vm2, %vm343_vm3 }
 0x236   : > { %v325_v56 = vshrl.u32 %v10843_v31, 3  ;;  %v12458_v45 = vmov 0.0   ;;  %v272_v10 = vsub.s32 %v10777_v6, %v271_v8  ;;  %v293_v47 = vmul.u32 10, %v292_v50 }
 0x237   : > { %v10902_v29 = vsel %vm10870_vm4, 1.0, %v12458_v45  ;;  %v336_v16 = vshrl.u32 %v10850_v0, 3  ;;  %v10910_v4 = vadd.f32 %v10602_v28, %v10605_v62  ;;  %v10913_v31 = vrot.slane %v441_v35, %v10875_v44  ;;  %v10928_v62 = vpop.f32.mrf.mxu1 }
 0x238   : > { %v10916_v22 = vrot.slane %v443_v1, %v10875_v44  ;;  %v304_v48 = vmul.u32 10, %v303_v17  ;;  %v10920_v13 = vadd.f32 %v10607_v53, %v10610_v9  ;;  %v10923_v6 = vrot.slane %v441_v35, %v10882_v26  ;;  %v10931_v17 = vpop.f32.mrf.mxu0 }
 0x239   : > { %v382_v0 = vsel %vm10892_vm11, %v372_v49, %v250_v60  ;;  %v315_v8 = vmul.u32 10, %v314_v18  ;;  %v2422_v28 = vadd.f32 %v10617_v40, %v2004_v12  ;;  %v383_v50 = vsel %vm363_vm13, %v373_v37, %v261_v27  ;;  %v10943_v27 = vpop.f32.mrf.mxu1 }
 0x23a   : > { %v283_v43 = vsub.s32 %v10783_v34, %v282_v55  ;;  %v326_v45 = vmul.u32 10, %v325_v56  ;;  %vm344_vm2 = vcmp.ne.s32.totalorder %v272_v10, 0  ;;  %vm354_vm3 = vcmp.lt.s32.totalorder %v272_v10, 0 }
 0x23b   : > { %v294_v53 = vsub.s32 %v10793_v39, %v293_v47  ;;  %v337_v9 = vmul.u32 10, %v336_v16  ;;  %v10935_v35 = vrot.slane %v443_v1, %v10882_v26  ;;  %vm392_vm4 = vcmp.ge.s32.totalorder %v382_v0, 1  ;;  %vm364_vm13 = vmand %vm354_vm3, %vm344_vm2  ;;  %v12604_v26 = vld [vmem:[#allocation44_spill] sm:$0xff] }
 0x23c   : > { %vm402_vm5 = vcmp.le.s32.totalorder %v382_v0, 8  ;;  %v305_v40 = vsub.s32 %v10797_v21, %v304_v48  ;;  %vm393_vm14 = vcmp.ge.s32.totalorder %v383_v50, 1  ;;  %vm403_vm11 = vcmp.le.s32.totalorder %v383_v50, 8  ;;  %v10949_v21 = vpop.f32.mrf.mxu0  ;;  %v12585_v48 = vld [vmem:[#allocation31_spill] sm:$0xff] }
 0x23d   : > { %v374_v60 = vadd.s32 10, %v272_v10  ;;  %v316_v34 = vsub.s32 %v10806_v61, %v315_v8  ;;  %v10941_v12 = vadd.f32 %v10612_v38, %v10615_v52  ;;  %vm355_vm15 = vcmp.lt.s32.totalorder %v283_v43, 0  ;;  %vm10952_vm0 = vmand %vm392_vm4, %vm402_vm5 }
 0x23e   : > { %v327_v39 = vsub.s32 %v10815_v59, %v326_v45  ;;  %v10947_v1 = vadd.f32 %v10619_v2, %v2422_v28  ;;  %vm356_vm10 = vcmp.lt.s32.totalorder %v294_v53, 0  ;;  %v338_v38 = vsub.s32 %v10824_v14, %v337_v9  ;;  %vm10961_vm2 = vmand %vm393_vm14, %vm403_vm11  ;;  %v10974_v14 = vpop.f32.mrf.mxu1  ;;  %v10985_v56 = vpop.f32.mrf.mxu0 }
 0x23f   : > { %v2426_v52 = vadd.f32 %v10657_v3, %v10856_v33  ;;  %v375_v2 = vadd.s32 10, %v283_v43  ;;  %vm347_vm3 = vcmp.ne.s32.totalorder %v305_v40, 0  ;;  %vm357_vm1 = vcmp.lt.s32.totalorder %v305_v40, 0 }
 0x240   : > { %v384_v61 = vsel %vm364_vm13, %v374_v60, %v272_v10  ;;  %vm12549_vm4 = vcmp.ne.s32.totalorder %v283_v43, 0  ;;  %v376_v58 = vadd.s32 10, %v294_v53  ;;  %v10972_v3 = vadd.f32 %v10621_v41, %v10624_v63  ;;  %v12579_v41 = vld [vmem:[#allocation20_spill] sm:$0xff] }
 0x241   : > { %vm10966_vm5 = vmand %vm355_vm15, %vm12549_vm4  ;;  %vm12552_vm14 = vcmp.ne.s32.totalorder %v294_v53, 0  ;;  %v377_v37 = vadd.s32 10, %v305_v40  ;;  %v10983_v55 = vadd.f32 %v10634_v23, %v10632_v11  ;;  %v378_v63 = vadd.s32 10, %v316_v34  ;;  %v12581_v11 = vld [vmem:[#allocation38_spill] sm:$0xff] }
 0x242   : > { %vm10977_vm11 = vmand %vm356_vm10, %vm12552_vm14  ;;  %vm350_vm8 = vcmp.ne.s32.totalorder %v338_v38, 0  ;;  %vm360_vm10 = vcmp.lt.s32.totalorder %v338_v38, 0  ;;  %vm394_vm14 = vcmp.ge.s32.totalorder %v384_v61, 1  ;;  %vm404_vm7 = vcmp.le.s32.totalorder %v384_v61, 8 }
 0x243   : > { %vm10988_vm4 = vmand %vm357_vm1, %vm347_vm3  ;;  %v385_v45 = vsel %vm10966_vm5, %v375_v2, %v283_v43  ;;  %vm12557_vm15 = vcmp.ne.s32.totalorder %v316_v34, 0  ;;  %vm12558_vm13 = vcmp.lt.s32.totalorder %v316_v34, 0  ;;  %v379_v23 = vadd.s32 10, %v327_v39  ;;  %v12571_v2 = vld [vmem:[#allocation25_spill] sm:$0xff] }
 0x244   : > { %vm10996_vm12 = vmand %vm12558_vm13, %vm12557_vm15  ;;  %v11002_v10 = vadd.f32 %v10663_v36, %v10646_v24  ;;  %v11005_v47 = vadd.f32 %v10677_v5, %v2426_v52  ;;  %v386_v16 = vsel %vm10977_vm11, %v376_v58, %v294_v53  ;;  %vm12561_vm1 = vcmp.ne.s32.totalorder %v327_v39, 0  ;;  %v12565_v24 = vld [vmem:[#allocation21_spill] sm:$0xff]  ;;  %v11023_v5 = vpop.f32.mrf.mxu1  ;;  %v11036_v53 = vpop.f32.mrf.mxu0  ;;  %v12570_v52 = vld [vmem:[#allocation18_spill] sm:$0xff] }
 0x245   : > { %vm12562_vm3 = vcmp.lt.s32.totalorder %v327_v39, 0  ;;  %v380_v0 = vadd.s32 10, %v338_v38  ;;  %v11017_v8 = vadd.f32 %v10687_v42, %v10675_v54  ;;  %v11021_v36 = vadd.f32 %v12565_v24, %v10680_v30  ;;  %vm370_vm11 = vmand %vm360_vm10, %vm350_vm8  ;;  %v12567_v54 = vld [vmem:[#allocation19_spill] sm:$0xff] }
 0x246   : > { %vm11011_vm5 = vmand %vm12562_vm3, %vm12561_vm1  ;;  %v12566_v28 = vmov 0.0   ;;  %v387_v43 = vsel %vm10988_vm4, %v377_v37, %v305_v40  ;;  %v2430_v42 = vadd.f32 %v12567_v54, %v10860_v32  ;;  %vm395_vm15 = vcmp.ge.s32.totalorder %v385_v45, 1  ;;  %v12569_v40 = vld [vmem:[#allocation24_spill] sm:$0xff]  ;;  %v12586_v24 = vld [vmem:[#allocation23_spill] sm:$0xff] }
 0x247   : > { %v11028_v50 = vsel %vm10952_vm0, 1.0, %v12566_v28  ;;  %vm414_vm13 = vmand %vm394_vm14, %vm404_vm7  ;;  %vm405_vm1 = vcmp.le.s32.totalorder %v385_v45, 8  ;;  %v388_v30 = vsel %vm10996_vm12, %v378_v63, %v316_v34  ;;  %v11045_v9 = vsel %vm10961_vm2, 1.0, %v12566_v28  ;;  %v11053_v34 = vpop.f32.mrf.mxu1  ;;  %v12580_v63 = vld [vmem:[#allocation30_spill] sm:$0xff]  ;;  %v12587_v54 = vld [vmem:[#allocation32_spill] sm:$0xff] }
 0x248   : > { %12568 = vst [vmem:[#allocation21_spill] sm:$0xff] %v11045_v9  ;;  %vm396_vm0 = vcmp.ge.s32.totalorder %v386_v16, 1  ;;  %vm406_vm8 = vcmp.le.s32.totalorder %v386_v16, 8  ;;  %v389_v32 = vsel %vm11011_vm5, %v379_v23, %v327_v39  ;;  %v2434_v60 = vadd.f32 %v12569_v40, %v10879_v51  ;;  %vm11058_vm12 = vmand %vm395_vm15, %vm405_vm1  ;;  %v12575_v39 = vld [vmem:[#allocation27_spill] sm:$0xff]  ;;  %v12576_v51 = vld [vmem:[#allocation36_spill] sm:$0xff] }
 0x249   : > { %vm397_vm4 = vcmp.ge.s32.totalorder %v387_v43, 1  ;;  %vm407_vm7 = vcmp.le.s32.totalorder %v387_v43, 8  ;;  %v390_v49 = vsel %vm370_vm11, %v380_v0, %v338_v38  ;;  %v2763_v61 = vadd.f32 %v12571_v2, %v12570_v52  ;;  %v11065_v38 = vpop.f32.mrf.mxu0  ;;  %vm11069_vm14 = vmand %vm396_vm0, %vm406_vm8  ;;  %v12584_v16 = vld [vmem:[#allocation22_spill] sm:$0xff]  ;;  %v12588_v40 = vld [vmem:[#allocation33_spill] sm:$0xff] }
 0x24a   : > { %v11056_v59 = vsel %vm414_vm13, 1.0, %v12566_v28  ;;  %vm398_vm2 = vcmp.ge.s32.totalorder %v388_v30, 1  ;;  %vm408_vm10 = vcmp.le.s32.totalorder %v388_v30, 8  ;;  %v2764_v58 = vadd.f32 %v12575_v39, %v2430_v42  ;;  %vm11079_vm11 = vmand %vm397_vm4, %vm407_vm7  ;;  %v12592_v2 = vld [vmem:[#allocation26_spill] sm:$0xff]  ;;  %v12598_v30 = vld [vmem:[#allocation29_spill] sm:$0xff] }
 0x24b   : > { %12572 = vst [vmem:[#allocation19_spill] sm:$0xff] %v11056_v59  ;;  %v2438_v33 = vadd.f32 %v12576_v51, %v10886_v15  ;;  %vm399_vm3 = vcmp.ge.s32.totalorder %v389_v32, 1  ;;  %vm409_vm5 = vcmp.le.s32.totalorder %v389_v32, 8  ;;  %v2765_v45 = vadd.f32 %v12580_v63, %v12579_v41  ;;  %vm11095_vm1 = vmand %vm398_vm2, %vm408_vm10  ;;  %v12593_v39 = vld [vmem:[#allocation34_spill] sm:$0xff]  ;;  %v12594_v41 = vld [vmem:[#allocation28_spill] sm:$0xff] }
 0x24c   : > { %v3136_v23 = vadd.f32 %v12581_v11, %v10910_v4  ;;  %vm400_vm13 = vcmp.ge.s32.totalorder %v390_v49, 1  ;;  %vm410_vm15 = vcmp.le.s32.totalorder %v390_v49, 8  ;;  %v2766_v0 = vadd.f32 %v12585_v48, %v12584_v16  ;;  %v12595_v63 = vld [vmem:[#allocation35_spill] sm:$0xff]  ;;  %v3538_v48 = vpop.f32.mrf.mxu1  ;;  %vm419_vm0 = vmand %vm399_vm3, %vm409_vm5  ;;  %v12603_v32 = vld [vmem:[#allocation42_spill] sm:$0xff] }
 0x24d   : > { %v2767_v42 = vadd.f32 %v12587_v54, %v12586_v24  ;;  %v2768_v52 = vadd.f32 %v12588_v40, %v2434_v60  ;;  %v11091_v4 = vsel %vm11058_vm12, 1.0, %v12566_v28  ;;  %v2769_v51 = vadd.f32 %v12593_v39, %v12592_v2  ;;  %v12596_v16 = vld [vmem:[#allocation39_spill] sm:$0xff]  ;;  %v12599_v24 = vld [vmem:[#allocation37_spill] sm:$0xff]  ;;  %v12600_v40 = vld [vmem:[#allocation40_spill] sm:$0xff] }
 0x24e   : > { %12589 = vst [vmem:[#allocation24_spill] sm:$0xff] %v11091_v4  ;;  %v2770_v11 = vadd.f32 %v12595_v63, %v12594_v41  ;;  %v3137_v60 = vadd.f32 %v12596_v16, %v10920_v13  ;;  %v11108_v18 = vsel %vm11069_vm14, 1.0, %v12566_v28  ;;  %v11114_v54 = vadd.f32 %v12599_v24, %v12598_v30  ;;  %v12601_v39 = vld [vmem:[#allocation41_spill] sm:$0xff]  ;;  %v12602_v13 = vld [vmem:[#allocation43_spill] sm:$0xff]  ;;  %v11123_v16 = vpop.f32.mrf.mxu0  ;;  %vm420_vm8 = vmand %vm400_vm13, %vm410_vm15 }
 0x24f   : > { %12597 = vst [vmem:[#allocation18_spill] sm:$0xff] %v11108_v18  ;;  %v11117_v2 = vadd.f32 %v12600_v40, %v2438_v33  ;;  %v3138_v41 = vadd.f32 %v12601_v39, %v10941_v12  ;;  %v3139_v63 = vadd.f32 %v12602_v13, %v10947_v1  ;;  %v3553_v37 = vadd.f32 %v12603_v32, %v3136_v23  ;;  %v12605_v24 = vld [vmem:[#allocation46_spill] sm:$0xff]  ;;  %v12607_v1 = vld [vmem:[#allocation47_spill] sm:$0xff]  ;;  %v12608_v39 = vld [vmem:[#allocation49_spill] sm:$0xff] }
 0x250   : > { %v3140_v30 = vadd.f32 %v12604_v26, %v10972_v3  ;;  %v3141_v33 = vadd.f32 %v12605_v24, %v10983_v55  ;;  %v11135_v12 = vsel %vm11079_vm11, 1.0, %v12566_v28  ;;  %v3142_v40 = vadd.f32 %v12607_v1, %v11002_v10  ;;  %v12611_v3 = vld [vmem:[#allocation45_spill] sm:$0xff]  ;;  %v12612_v15 = vld [vmem:[#allocation51_spill] sm:$0xff]  ;;  %v3540_v24 = vpop.f32.mrf.mxu1  ;;  %v12617_v59 = vld [vmem:[#allocation52_spill] sm:$0xff] }
 0x251   : > { %12606 = vst [vmem:[#allocation25_spill] sm:$0xff] %v11135_v12  ;;  %v3143_v49 = vadd.f32 %v12608_v39, %v11005_v47  ;;  %v11144_v23 = vsel %vm11095_vm1, 1.0, %v12566_v28  ;;  %v11147_v26 = vsel %vm419_vm0, 1.0, %v12566_v28  ;;  %v3554_v55 = vadd.f32 %v12611_v3, %v3137_v60  ;;  %v12613_v47 = vld [vmem:[#allocation48_spill] sm:$0xff]  ;;  %v12614_v39 = vld [vmem:[#allocation50_spill] sm:$0xff]  ;;  %v12615_v43 = vld [vmem:[#allocation53_spill] sm:$0xff] }
 0x252   : > { %12609 = vst [vmem:[#allocation27_spill] sm:$0xff] %v11144_v23  ;;  %12610 = vst [vmem:[#allocation36_spill] sm:$0xff] %v11147_v26  ;;  %v3144_v32 = vadd.f32 %v12612_v15, %v11017_v8  ;;  %v11153_v10 = vsel %vm420_vm8, 1.0, %v12566_v28  ;;  %v3555_v1 = vadd.f32 %v12613_v47, %v3138_v41  ;;  %v3556_v12 = vadd.f32 %v12614_v39, %v3139_v63  ;;  %v12616_v18 = vld [vmem:[#allocation55_spill] sm:$0xff]  ;;  %v12618_v3 = vld [vmem:[#allocation54_spill] sm:$0xff] }
 0x253   : > { %v3145_v23 = vadd.f32 %v12615_v43, %v11021_v36  ;;  %v3146_v4 = vadd.f32 %v12616_v18, %v2763_v61  ;;  %v3557_v60 = vadd.f32 %v12617_v59, %v3140_v30  ;;  %v3558_v9 = vadd.f32 %v12618_v3, %v3141_v33  ;;  %v3544_v61 = vpop.f32.mrf.mxu1  ;;  %vm12622_vm7 = vmor %vm10659_vm9, %vm10653_vm6 }
 0x254   : > { %v3559_v28 = vadd.f32 %v10839_v19, %v3142_v40  ;;  %v3147_v41 = vadd.f32 %v10845_v20, %v2764_v58  ;;  %v3148_v63 = vadd.f32 %v10866_v57, %v2765_v45  ;;  %v11168_v36 = vadd.f32 %v10888_v25, %v3144_v32 }
 0x255   : > { %v11176_v19 = vadd.f32 %v10943_v27, %v3146_v4  ;;  %v3149_v20 = vadd.f32 %v10897_v7, %v2766_v0  ;;  %v3151_v27 = vadd.f32 %v10949_v21, %v2768_v52  ;;  %v3152_v4 = vadd.f32 %v10985_v56, %v2769_v51  ;;  %v3546_v0 = vpop.f32.mrf.mxu1 }
 0x256   : > { %v11183_v40 = vadd.f32 %v10974_v14, %v3147_v41  ;;  %vm4059_vm4 = vsmask.f32 5392  ;;  %vm12623_vm12 = vsmask.f32 1280  ;;  %vm12633_vm6 = vsmask.f32 7424 }
 0x257   : > { %vm11237_vm2 = vmor %vm12623_vm12, %vm4059_vm4  ;;  %vm12645_vm0 = vcmask 1046528  }
 0x258   : > { %vm12634_vm9 = vmmov %vm12633_vm6 }
 0x259   : > { %vm12635_vm10 = vmmov %vm12633_vm6 }
 0x25a   : > { %vm12636_vm14 = vmmov %vm12633_vm6 }
 0x25b   : > { %v3838_v13 = vpop.f32.mrf.mxu0  ;;  %vm12637_vm3 = vmmov %vm12633_vm6 }
 0x25c   : > { %v3887_v44 = vadd.f32 %v3838_v13, %v3553_v37  ;;  %v3560_v13 = vadd.f32 %v10863_v46, %v3143_v49  ;;  %v3150_v46 = vadd.f32 %v10931_v17, %v2767_v42  ;;  %v3153_v17 = vadd.f32 %v11036_v53, %v2770_v11  ;;  %vm12643_vm15 = vmmov %vm12637_vm3 }
 0x25d   : > { %v3840_v26 = vpop.f32.mrf.mxu0  ;;  %v11201_v11 = vadd.f32 %v3540_v24, %v3151_v27  ;;  %vm12644_vm1 = vmmov %vm12637_vm3 }
 0x25e   : > { %v3918_v8 = vmul.f32 %v10913_v31, %v3887_v44  ;;  %v3888_v37 = vadd.f32 %v3840_v26, %v3554_v55  ;;  %v11173_v44 = vadd.f32 %v10928_v62, %v3145_v23  ;;  %v11186_v62 = vadd.f32 %v11023_v5, %v3148_v63  ;;  %vm12646_vm8 = vmmov %vm12644_vm1 }
 0x25f   : > { %v3842_v15 = vpop.f32.mrf.mxu0  ;;  %v11196_v14 = vadd.f32 %v3538_v48, %v3150_v46  ;;  %v11203_v55 = vadd.f32 %v3544_v61, %v3152_v4  ;;  %v11208_v47 = vadd.f32 %v3546_v0, %v3153_v17  ;;  %v4171_v46 = vld [vmem:[#allocation3 + $0x38] sm:$0xee]  ;;  %vm12647_vm4 = vmmov %vm12645_vm0 }
 0x260   : > { %v3949_v59 = vadd.f32 %v10916_v22, %v3918_v8  ;;  %v3919_v18 = vmul.f32 %v10923_v6, %v3888_v37  ;;  %v3889_v30 = vadd.f32 %v3842_v15, %v3555_v1  ;;  %v3548_v1 = vpop.f32.mrf.mxu1  ;;  %vm12649_vm12 = vmmov %vm12645_vm0 }
 0x261   : > { %v3844_v57 = vpop.f32.mrf.mxu0 }
 0x262   : > { %v3969_v58 = vmax.f32 %v3949_v59, 0.0  ;;  %v3950_v25 = vadd.f32 %v10935_v35, %v3919_v18  ;;  %v3920_v45 = vmul.f32 %v10913_v31, %v3889_v30  ;;  %v3890_v33 = vadd.f32 %v3844_v57, %v3556_v12 }
 0x263   : > { %v3848_v7 = vpop.f32.mrf.mxu0  ;;  %v11194_v12 = vadd.f32 %v11053_v34, %v3149_v20  ;;  %v3154_v34 = vadd.f32 %v11065_v38, %v11114_v54 }
 0x264   : > { %v3970_v42 = vmax.f32 %v3950_v25, 0.0  ;;  %v3951_v49 = vadd.f32 %v10916_v22, %v3920_v45  ;;  %v3921_v23 = vmul.f32 %v10923_v6, %v3890_v33  ;;  %v3989_v5 = vmul.f32 %v10902_v29, %v3969_v58 }
 0x265   : > { %v3891_v26 = vadd.f32 %v3848_v7, %v3557_v60  ;;  %v3850_v21 = vpop.f32.mrf.mxu0  ;;  %v11219_v63 = vadd.f32 %v3548_v1, %v3154_v34 }
 0x266   : > { %v3990_v56 = vmul.f32 %v10902_v29, %v3970_v42  ;;  %v3971_v52 = vmax.f32 %v3951_v49, 0.0  ;;  %v3952_v53 = vadd.f32 %v10935_v35, %v3921_v23  ;;  %v3892_v51 = vadd.f32 %v3850_v21, %v3558_v9 }
 0x267   : > { %v3922_v48 = vmul.f32 %v10913_v31, %v3891_v26  ;;  %v3852_v32 = vpop.f32.mrf.mxu0  ;;  %v11213_v9 = vadd.f32 %v11123_v16, %v11117_v2 }
 0x268   : > { %v8566_v39 = vpack.c.bf16 %v3990_v56, %v3989_v5  ;;  %v3972_v29 = vmax.f32 %v3952_v53, 0.0  ;;  %v3923_v43 = vmul.f32 %v10923_v6, %v3892_v51  ;;  %v3991_v24 = vmul.f32 %v11028_v50, %v3971_v52  ;;  %v12626_v51 = vld [vmem:[#allocation19_spill] sm:$0xff]  ;;  %v9260_v52 = vld [vmem:[#allocation7 + $0xc04] ss:$8 sps:$4 sm:$0xff]  }
 0x269   : > { %v3953_v60 = vadd.f32 %v10916_v22, %v3922_v48  ;;  %v3893_v3 = vadd.f32 %v3852_v32, %v3559_v28  ;;  %v3854_v38 = vpop.f32.mrf.mxu0  ;;  %v12619_v28 = vld [vmem:[#allocation21_spill] sm:$0xff] }
 0x26a   : > { %v4062_v54 = vshrl.u32 %v8566_v39, 16  ;;  %v4065_v8 = vshll.u32 %v8566_v39, 16  ;;  %v3992_v37 = vmul.f32 %v11028_v50, %v3972_v29  ;;  %v3954_v41 = vadd.f32 %v10935_v35, %v3923_v43 }
 0x26b   : > { %v3973_v15 = vmax.f32 %v3953_v60, 0.0  ;;  %v3924_v61 = vmul.f32 %v10913_v31, %v3893_v3  ;;  %v3894_v59 = vadd.f32 %v3854_v38, %v3560_v13  ;;  %v3858_v2 = vpop.f32.mrf.mxu0 }
 0x26c   : > { %v4064_v16 = vrot.slane %v4062_v54, 6  ;;  %v4067_v18 = vrot.slane %v4065_v8, 7  ;;  %v8567_v30 = vpack.c.bf16 %v3992_v37, %v3991_v24  ;;  %v3974_v20 = vmax.f32 %v3954_v41, 0.0 }
 0x26d   : > { %v3993_v57 = vmul.f32 %v12619_v28, %v3973_v15  ;;  %v3955_v58 = vadd.f32 %v10916_v22, %v3924_v61  ;;  %v3925_v50 = vmul.f32 %v10923_v6, %v3894_v59  ;;  %v3895_v25 = vadd.f32 %v3858_v2, %v11168_v36  ;;  %v3860_v45 = vpop.f32.mrf.mxu0  ;;  %v12627_v59 = vld [vmem:[#allocation24_spill] sm:$0xff] }
 0x26e   : > { %v4068_v33 = vor.u32 %v4067_v18, %v4064_v16  ;;  %v4071_v27 = vshrl.u32 %v8567_v30, 16  ;;  %v4074_v4 = vshll.u32 %v8567_v30, 16  ;;  %v3994_v13 = vmul.f32 %v12619_v28, %v3974_v20 }
 0x26f   : > { %v3975_v7 = vmax.f32 %v3955_v58, 0.0  ;;  %v3956_v17 = vadd.f32 %v10935_v35, %v3925_v50  ;;  %v3926_v0 = vmul.f32 %v10913_v31, %v3895_v25  ;;  %v3896_v42 = vadd.f32 %v3860_v45, %v11173_v44  ;;  %v3862_v49 = vpop.f32.mrf.mxu0 }
 0x270   : > { %v4069_v23 = vrot.slane %v4068_v33, 4  ;;  %v4172_v36 = vsel %vm12622_vm7, %v4068_v33, %v4171_v46  ;;  %v4073_v21 = vrot.slane %v4071_v27, 6  ;;  %v4076_v56 = vrot.slane %v4074_v4, 7  ;;  %vm12648_vm7 = vmmov %vm12645_vm0 }
 0x271   : > { %4173 = vst [vmem:[#allocation3 + $0x38] sm:$0xee] %v4172_v36  ;;  %v8568_v53 = vpack.c.bf16 %v3994_v13, %v3993_v57  ;;  %v3995_v44 = vmul.f32 %v12626_v51, %v3975_v7  ;;  %v3976_v34 = vmax.f32 %v3956_v17, 0.0  ;;  %v3957_v48 = vadd.f32 %v10916_v22, %v3926_v0  ;;  %v3864_v32 = vpop.f32.mrf.mxu0 }
 0x272   : > { %v4077_v1 = vor.u32 %v4076_v56, %v4073_v21  ;;  %v3927_v39 = vmul.f32 %v10923_v6, %v3896_v42  ;;  %v3897_v29 = vadd.f32 %v3862_v49, %v11176_v19  ;;  %v3898_v43 = vadd.f32 %v3864_v32, %v11183_v40 }
 0x273   : > { %v4081_v24 = vshrl.u32 %v8568_v53, 16  ;;  %v4084_v60 = vshll.u32 %v8568_v53, 16  ;;  %v3996_v3 = vmul.f32 %v12626_v51, %v3976_v34  ;;  %v3977_v38 = vmax.f32 %v3957_v48, 0.0  ;;  %v3868_v54 = vpop.f32.mrf.mxu0 }
 0x274   : > { %v11249_v8 = vsel %vm11237_vm2, %v4069_v23, %v4077_v1  ;;  %v4079_v37 = vrot.slane %v4077_v1, 4  ;;  %v3958_v41 = vadd.f32 %v10935_v35, %v3927_v39  ;;  %v3928_v15 = vmul.f32 %v10913_v31, %v3897_v29 }
 0x275   : > { %4174 = vst [vmem:[#allocation3 + $0x10] sm:$0xff] %v11249_v8  ;;  %v4083_v19 = vrot.slane %v4081_v24, 6  ;;  %v4086_v61 = vrot.slane %v4084_v60, 7  ;;  %v8569_v40 = vpack.c.bf16 %v3996_v3, %v3995_v44  ;;  %v3997_v2 = vmul.f32 %v12627_v59, %v3977_v38  ;;  %v3870_v16 = vpop.f32.mrf.mxu0  ;;  %v12629_v3 = vld [vmem:[#allocation25_spill] sm:$0xff] }
 0x276   : > { %v3978_v18 = vmax.f32 %v3958_v41, 0.0  ;;  %v3959_v30 = vadd.f32 %v10916_v22, %v3928_v15  ;;  %v3929_v20 = vmul.f32 %v10923_v6, %v3898_v43  ;;  %v3899_v46 = vadd.f32 %v3868_v54, %v11186_v62  ;;  %v3550_v54 = vpop.f32.mrf.mxu1 }
 0x277   : > { %v4087_v28 = vor.u32 %v4086_v61, %v4083_v19  ;;  %v4091_v57 = vshrl.u32 %v8569_v40, 16  ;;  %v4094_v58 = vshll.u32 %v8569_v40, 16  ;;  %v3900_v50 = vadd.f32 %v3870_v16, %v11194_v12  ;;  %v3872_v25 = vpop.f32.mrf.mxu0  ;;  %v12628_v12 = vld [vmem:[#allocation18_spill] sm:$0xff] }
 0x278   : > { %v3998_v45 = vmul.f32 %v12627_v59, %v3978_v18  ;;  %v3979_v33 = vmax.f32 %v3959_v30, 0.0  ;;  %v3960_v27 = vadd.f32 %v10935_v35, %v3929_v20  ;;  %v3930_v4 = vmul.f32 %v10913_v31, %v3899_v46  ;;  %v11279_v43 = vld [vmem:[#allocation3 + $0x38] sm:$0xff] }
 0x279   : > { %v11264_v13 = vsel %vm11237_vm2, %v4079_v37, %v4087_v28  ;;  %v4089_v7 = vrot.slane %v4087_v28, 4  ;;  %v4093_v17 = vrot.slane %v4091_v57, 6  ;;  %v4096_v62 = vrot.slane %v4094_v58, 7  ;;  %v3874_v0 = vpop.f32.mrf.mxu0 }
 0x27a   : > { %4175 = vst [vmem:[#allocation3 + $0x40] sm:$0xff] %v11264_v13  ;;  %v8570_v42 = vpack.c.bf16 %v3998_v45, %v3997_v2  ;;  %v3999_v49 = vmul.f32 %v12628_v12, %v3979_v33  ;;  %v3980_v23 = vmax.f32 %v3960_v27, 0.0  ;;  %v3961_v5 = vadd.f32 %v10916_v22, %v3930_v4 }
 0x27b   : > { %v4097_v26 = vor.u32 %v4096_v62, %v4093_v17  ;;  %v3931_v36 = vmul.f32 %v10923_v6, %v3900_v50  ;;  %v3901_v21 = vadd.f32 %v3872_v25, %v11196_v14  ;;  %v3902_v56 = vadd.f32 %v3874_v0, %v11201_v11  ;;  %v3878_v53 = vpop.f32.mrf.mxu0  ;;  %v9216_v0 = vld [vmem:[#allocation7 + $0xc70] ss:$8 sps:$4 sm:$0xff]  }
 0x27c   : > { %v4101_v51 = vshrl.u32 %v8570_v42, 16  ;;  %v4104_v44 = vshll.u32 %v8570_v42, 16  ;;  %v4000_v34 = vmul.f32 %v12628_v12, %v3980_v23  ;;  %v3981_v48 = vmax.f32 %v3961_v5, 0.0  ;;  %v9224_v5 = vld [vmem:[#allocation7 + $0xc64] ss:$8 sps:$4 sm:$0xff]  }
 0x27d   : > { %v11275_v32 = vsel %vm11237_vm2, %v4089_v7, %v4097_v26  ;;  %v4099_v1 = vrot.slane %v4097_v26, 4  ;;  %v3962_v39 = vadd.f32 %v10935_v35, %v3931_v36  ;;  %v3932_v29 = vmul.f32 %v10913_v31, %v3901_v21  ;;  %v3880_v14 = vpop.f32.mrf.mxu0  ;;  %v12631_v7 = vld [vmem:[#allocation27_spill] sm:$0xff] }
 0x27e   : > { %4176 = vst [vmem:[#allocation3 + $0x48] sm:$0xff] %v11275_v32  ;;  %v4103_v11 = vrot.slane %v4101_v51, 6  ;;  %v4106_v24 = vrot.slane %v4104_v44, 7  ;;  %v8571_v60 = vpack.c.bf16 %v4000_v34, %v3999_v49  ;;  %v4001_v38 = vmul.f32 %v12629_v3, %v3981_v48 }
 0x27f   : > { %v3982_v37 = vmax.f32 %v3962_v39, 0.0  ;;  %v3963_v41 = vadd.f32 %v10916_v22, %v3932_v29  ;;  %v3933_v15 = vmul.f32 %v10923_v6, %v3902_v56  ;;  %v3903_v19 = vadd.f32 %v3878_v53, %v11203_v55  ;;  %v3882_v28 = vpop.f32.mrf.mxu0  ;;  %v9222_v29 = vld [vmem:[#allocation7 + $0xc60] ss:$8 sps:$4 sm:$0xff]  }
 0x280   : > { %v4107_v61 = vor.u32 %v4106_v24, %v4103_v11  ;;  %v4111_v40 = vshrl.u32 %v8571_v60, 16  ;;  %v4114_v59 = vshll.u32 %v8571_v60, 16  ;;  %v12630_v2 = vmov 0  }
 0x281   : > { %v11288_v16 = vcombine.low %v12630_v2, %v11279_v43  ;;  %v4002_v18 = vmul.f32 %v12629_v3, %v3982_v37  ;;  %v3983_v30 = vmax.f32 %v3963_v41, 0.0  ;;  %v3964_v20 = vadd.f32 %v10935_v35, %v3933_v15  ;;  %v3884_v26 = vpop.f32.mrf.mxu0 }
 0x282   : > { %v3934_v46 = vmul.f32 %v10913_v31, %v3903_v19  ;;  %v3572_v57 = vadd.f32 %v3550_v54, %v11213_v9  ;;  %v11296_v55 = vsel %vm11237_vm2, %v4099_v1, %v4107_v61  ;;  %v4113_v58 = vrot.slane %v4111_v40, 6  ;;  %v9230_v54 = vld [vmem:[#allocation7 + $0xc54] ss:$8 sps:$4 sm:$0xff]  }
 0x283   : > { %v4116_v50 = vrot.slane %v4114_v59, 7  ;;  %v4109_v25 = vrot.slane %v4107_v61, 4  ;;  %4177 = vst [vmem:[#allocation3 + $0x60] sm:$0xff] %v11296_v55  ;;  %v8572_v45 = vpack.c.bf16 %v4002_v18, %v4001_v38  ;;  %v3984_v33 = vmax.f32 %v3964_v20, 0.0  ;;  %v9236_v18 = vld [vmem:[#allocation7 + $0xc44] ss:$8 sps:$4 sm:$0xff]  }
 0x284   : > { %v11300_v27 = vadd.f32 %v10916_v22, %v3934_v46  ;;  %v4003_v17 = vmul.f32 %v12631_v7, %v3983_v30  ;;  %v8214_v9 = vcombine.high %v12630_v2, %v11279_v43  ;;  %v4310_v62 = vshll.u32 %v11288_v16, 16 }
 0x285   : > { %v4117_v4 = vor.u32 %v4116_v50, %v4113_v58  ;;  %v4121_v42 = vshrl.u32 %v8572_v45, 16  ;;  %v4124_v12 = vshll.u32 %v8572_v45, 16  ;;  %v4004_v49 = vmul.f32 %v12631_v7, %v3984_v33 }
 0x286   : > { %v4308_v23 = vshrl.u32 %v11288_v16, 16  ;;  %v3985_v56 = vmax.f32 %v11300_v27, 0.0  ;;  %v4312_v53 = vrot.slane %v4310_v62, 1  ;;  %4850 = vmatprep.mubr.bf16.mxu0 %v8214_v9  ;;  %v4322_v48 = vshll.u32 %v8214_v9, 16 }
 0x287   : > { %v11310_v36 = vsel %vm11237_vm2, %v4109_v25, %v4117_v4  ;;  %v4119_v21 = vrot.slane %v4117_v4, 4  ;;  %v4123_v51 = vrot.slane %v4121_v42, 6  ;;  %v4126_v44 = vrot.slane %v4124_v12, 7  ;;  %4851 = vmatmul.mubr.bf16.vlgmr.msra.gmra.mxu0 %v11288_v16 }
 0x288   : > { %4178 = vst [vmem:[#allocation3 + $0x28] sm:$0xff] %v11310_v36  ;;  %v8573_v34 = vpack.c.bf16 %v4004_v49, %v4003_v17  ;;  %5515 = vmatpush1.bf16.msra.mxu0 %v9216_v0  ;;  %v3904_v1 = vadd.f32 %v3880_v14, %v11208_v47  ;;  %v3905_v39 = vadd.f32 %v3882_v28, %v11219_v63  ;;  %v4320_v14 = vshrl.u32 %v8214_v9, 16  ;;  %v9234_v17 = vld [vmem:[#allocation7 + $0xc40] ss:$8 sps:$4 sm:$0xff]   ;;  %v9237_v9 = vld [vmem:[#allocation7 + $0xb70] ss:$8 sps:$4 sm:$0xff]  }
 0x289   : > { %v3906_v11 = vadd.f32 %v3884_v26, %v3572_v57  ;;  %v11319_v24 = vcombine.high %v11249_v8, %v11264_v13  ;;  %v4127_v60 = vor.u32 %v4126_v44, %v4123_v51  ;;  %5516 = vmatprep.subr.bf16.mxu0 %v9224_v5  ;;  %v11323_v37 = vcombine.low %v11249_v8, %v11264_v13  ;;  %v9242_v49 = vld [vmem:[#allocation7 + $0xc34] ss:$8 sps:$4 sm:$0xff]  }
 0x28a   : > { %v4131_v3 = vshrl.u32 %v8573_v34, 16  ;;  %v4134_v38 = vshll.u32 %v8573_v34, 16  ;;  %v3935_v41 = vmul.f32 %v10923_v6, %v3904_v1  ;;  %v3936_v47 = vmul.f32 %v10913_v31, %v3905_v39 }
 0x28b   : > { %v3937_v63 = vmul.f32 %v10923_v6, %v3906_v11  ;;  %4860 = vmatprep.mubr.bf16.mxu0 %v11319_v24  ;;  %v11331_v15 = vsel %vm11237_vm2, %v4119_v21, %v4127_v60  ;;  %v4129_v19 = vrot.slane %v4127_v60, 4  ;;  %v9228_v6 = vld [vmem:[#allocation7 + $0xc50] ss:$8 sps:$4 sm:$0xff]   ;;  %v4324_v2 = vrot.slane %v4322_v48, 1  ;;  %v9248_v60 = vld [vmem:[#allocation7 + $0xc24] ss:$8 sps:$4 sm:$0xff]  }
 0x28c   : > { %v4133_v61 = vrot.slane %v4131_v3, 6  ;;  %v4136_v40 = vrot.slane %v4134_v38, 7  ;;  %4179 = vst [vmem:[#allocation3 + $0x8] sm:$0xff] %v11331_v15  ;;  %v3966_v8 = vadd.f32 %v10935_v35, %v3935_v41  ;;  %v3967_v59 = vadd.f32 %v10916_v22, %v3936_v47  ;;  %5517 = vmatpush1.bf16.msra.mxu0 %v9222_v29  ;;  %v9240_v11 = vld [vmem:[#allocation7 + $0xc30] ss:$8 sps:$4 sm:$0xff]  }
 0x28d   : > { %v3968_v31 = vadd.f32 %v10935_v35, %v3937_v63  ;;  %5518 = vmatprep.subr.bf16.mxu0 %v9230_v54  ;;  %v4327_v30 = vshll.u32 %v11319_v24, 16  ;;  %v4313_v20 = vor.u32 %v4312_v53, %v4308_v23  ;;  %v4315_v46 = vshll.u32 %v11323_v37, 16  ;;  %v12632_v35 = vld [vmem:[#allocation36_spill] sm:$0xff]  ;;  %v9243_v53 = vld [vmem:[#allocation7 + $0xb60] ss:$8 sps:$4 sm:$0xff]  }
 0x28e   : > { %v11337_v16 = vor.u32 %v4136_v40, %v4133_v61  ;;  %v3986_v28 = vmax.f32 %v3966_v8, 0.0  ;;  %v3987_v57 = vmax.f32 %v3967_v59, 0.0  ;;  %v4325_v50 = vor.u32 %v4324_v2, %v4320_v14  ;;  %v9251_v54 = vld [vmem:[#allocation7 + $0xb54] ss:$8 sps:$4 sm:$0xff]   ;;  %v11376_v40 = vld [vmem:[#allocation3 + $0x10] sm:$0xff] }
 0x28f   : > { %v3988_v58 = vmax.f32 %v3968_v31, 0.0  ;;  %v4005_v25 = vmul.f32 %v12632_v35, %v3985_v56  ;;  %4861 = vmatmul.mubr.bf16.gmra.mxu0 %v11323_v37  ;;  %v4329_v45 = vrot.slane %v4327_v30, 1  ;;  %v4317_v33 = vrot.slane %v4315_v46, 1  ;;  %v4183_v8 = vld [vmem:[#allocation3 + $0x18] sm:$0x33] }
 0x290   : > { %v11344_v22 = vsel %vm11237_vm2, %v4129_v19, %v11337_v16  ;;  %v4006_v27 = vmul.f32 %v12632_v35, %v3986_v28  ;;  %v4007_v4 = vmul.f32 %v11153_v10, %v3987_v57  ;;  %5519 = vmatpush1.bf16.msra.mxu0 %v9228_v6  ;;  %v11354_v62 = vcombine.high %v11275_v32, %v11296_v55  ;;  %v9246_v59 = vld [vmem:[#allocation7 + $0xc20] ss:$8 sps:$4 sm:$0xff]   ;;  %v9249_v46 = vld [vmem:[#allocation7 + $0xb50] ss:$8 sps:$4 sm:$0xff]   ;;  %v9257_v35 = vld [vmem:[#allocation7 + $0xb44] ss:$8 sps:$4 sm:$0xff]  }
 0x291   : > { %4180 = vst [vmem:[#allocation3 + $0x20] sm:$0xff] %v11344_v22  ;;  %v4008_v7 = vmul.f32 %v11153_v10, %v3988_v58  ;;  %v4139_v0 = vrot.slane %v11337_v16, 4  ;;  %5520 = vmatprep.subr.bf16.mxu0 %v9236_v18  ;;  %v4330_v42 = vsel %vm12633_vm6, %v4325_v50, %v4329_v45  ;;  %v4318_v12 = vsel %vm12634_vm9, %v4313_v20, %v4317_v33  ;;  %v9245_v10 = vld [vmem:[#allocation7 + $0xb64] ss:$8 sps:$4 sm:$0xff]   ;;  %v11385_v58 = vld [vmem:[#allocation3 + $0x38] sm:$0xee]  ;;  %vm12651_vm6 = vmmov %vm12645_vm0 }
 0x292   : > { %v11361_v23 = vcombine.low %v11275_v32, %v11296_v55  ;;  %v8574_v5 = vpack.c.bf16 %v4006_v27, %v4005_v25  ;;  %4597 = vmatprep.mubr.bf16.mxu1 %v4330_v42  ;;  %4870 = vmatprep.mubr.bf16.mxu0 %v11354_v62  ;;  %v4339_v21 = vshrl.u32 %v11319_v24, 16  ;;  %v4343_v56 = vshll.u32 %v11354_v62, 16  ;;  %v9254_v50 = vld [vmem:[#allocation7 + $0xc14] ss:$8 sps:$4 sm:$0xff]   ;;  %vm12652_vm9 = vmmov %vm12645_vm0 }
 0x293   : > { %v8575_v26 = vpack.c.bf16 %v4008_v7, %v4007_v4  ;;  %4598 = vmatmul.mubr.bf16.vlgmr.msra.gmra.mxu1 %v4318_v12  ;;  %v4331_v51 = vshrl.u32 %v11323_v37, 16  ;;  %v11370_v55 = vcombine.high %v11310_v36, %v11331_v15  ;;  %v11374_v34 = vcombine.low %v11310_v36, %v11331_v15 }
 0x294   : > { %v4335_v44 = vshll.u32 %v11361_v23, 16  ;;  %v4141_v48 = vshrl.u32 %v8574_v5, 16  ;;  %v4144_v1 = vshll.u32 %v8574_v5, 16  ;;  %5521 = vmatpush1.bf16.msra.mxu0 %v9234_v17  ;;  %5132 = vmatpush1.bf16.msra.mxu1 %v9237_v9  ;;  %v4341_v3 = vor.u32 %v4339_v21, %v4329_v45  ;;  %v12640_v5 = vld [vmem:[#allocation14_spill] sm:$0xff]  ;;  %v9252_v21 = vld [vmem:[#allocation7 + $0xc10] ss:$8 sps:$4 sm:$0xff]  }
 0x295   : > { %v4151_v39 = vshrl.u32 %v8575_v26, 16  ;;  %v4154_v29 = vshll.u32 %v8575_v26, 16  ;;  %5522 = vmatprep.subr.bf16.mxu0 %v9242_v49  ;;  %5133 = vmatprep.subr.bf16.mxu1 %v9245_v10  ;;  %v4345_v38 = vrot.slane %v4343_v56, 1  ;;  %v4333_v41 = vor.u32 %v4331_v51, %v4317_v33  ;;  %v12638_v10 = vld [vmem:[#allocation15_spill] sm:$0xff]  ;;  %v9255_v56 = vld [vmem:[#allocation7 + $0xb40] ss:$8 sps:$4 sm:$0xff]  }
 0x296   : > { %v4337_v47 = vrot.slane %v4335_v44, 1  ;;  %v4143_v63 = vrot.slane %v4141_v48, 6  ;;  %v4146_v14 = vrot.slane %v4144_v1, 7  ;;  %v4355_v2 = vshrl.u32 %v11354_v62, 16  ;;  %v11425_v51 = vld [vmem:[#allocation3 + $0x30] sm:$0xee] }
 0x297   : > { %v4153_v19 = vrot.slane %v4151_v39, 6  ;;  %v4156_v61 = vrot.slane %v4154_v29, 7  ;;  %4871 = vmatmul.mubr.bf16.gmra.mxu0 %v11361_v23  ;;  %v4346_v31 = vsel %vm12635_vm10, %v4341_v3, %v4345_v38  ;;  %v4359_v18 = vshll.u32 %v11370_v55, 16  ;;  %v9263_v44 = vld [vmem:[#allocation7 + $0xb34] ss:$8 sps:$4 sm:$0xff]   ;;  %vm12653_vm10 = vmmov %vm12645_vm0 }
 0x298   : > { %v4338_v6 = vsel %vm12636_vm14, %v4333_v41, %v4337_v47  ;;  %v4147_v30 = vor.u32 %v4146_v14, %v4143_v63  ;;  %5523 = vmatpush1.bf16.msra.mxu0 %v9240_v11  ;;  %5134 = vmatpush1.bf16.msra.mxu1 %v9243_v53  ;;  %v4347_v28 = vshrl.u32 %v11361_v23, 16  ;;  %v4351_v57 = vshll.u32 %v11374_v34, 16  ;;  %v9261_v41 = vld [vmem:[#allocation7 + $0xb30] ss:$8 sps:$4 sm:$0xff]   ;;  %vm12654_vm14 = vmmov %vm12644_vm1 }
 0x299   : > { %v4157_v20 = vor.u32 %v4156_v61, %v4153_v19  ;;  %5524 = vmatprep.subr.bf16.mxu0 %v9248_v60  ;;  %4607 = vmatprep.mubr.bf16.mxu1 %v4346_v31  ;;  %v4357_v25 = vor.u32 %v4355_v2, %v4345_v38  ;;  %v4361_v45 = vrot.slane %v4359_v18, 1  ;;  %v11389_v33 = vcombine.high %v11385_v58, %v11376_v40  ;;  %v11442_v14 = vld [vmem:[#allocation3 + $0x60] sm:$0xff]  ;;  %v9269_v61 = vld [vmem:[#allocation7 + $0xb24] ss:$8 sps:$4 sm:$0xff]  }
 0x29a   : > { %v11393_v27 = vcombine.low %v11264_v13, %v11275_v32  ;;  %v11399_v4 = vsel %vm11237_vm2, %v4139_v0, %v4147_v30  ;;  %v4149_v7 = vrot.slane %v4147_v30, 4  ;;  %5135 = vmatprep.subr.bf16.mxu1 %v9251_v54  ;;  %4880 = vmatprep.mubr.bf16.mxu0 %v11370_v55  ;;  %v4349_v9 = vor.u32 %v4347_v28, %v4337_v47  ;;  %v9258_v54 = vld [vmem:[#allocation7 + $0xc00] ss:$8 sps:$4 sm:$0xff]   ;;  %v9266_v19 = vld [vmem:[#allocation7 + $0xcf4] ss:$8 sps:$4 sm:$0xff]  }
 0x29b   : > { %v4159_v17 = vrot.slane %v4157_v20, 4  ;;  %4181 = vst [vmem:[#allocation3 + $0x58] sm:$0xff] %v11399_v4  ;;  %4608 = vmatmul.mubr.bf16.gmra.mxu1 %v4338_v6  ;;  %v4362_v42 = vsel %vm12637_vm3, %v4357_v25, %v4361_v45  ;;  %v4353_v12 = vrot.slane %v4351_v57, 1  ;;  %v11406_v49 = vcombine.high %v11344_v22, %v11399_v4  ;;  %v9264_v30 = vld [vmem:[#allocation7 + $0xcf0] ss:$8 sps:$4 sm:$0xff]   ;;  %vm12655_vm3 = vmmov %vm12645_vm0 }
 0x29c   : > { %v11410_v16 = vcombine.low %v11344_v22, %v11399_v4  ;;  %v11414_v0 = vsel %vm11237_vm2, %v4149_v7, %v4157_v20  ;;  %vm12639_vm5 = vnez %v12638_v10  ;;  %vm12641_vm11 = vnez %v12640_v5  ;;  %5525 = vmatpush1.bf16.msra.mxu0 %v9246_v59  ;;  %5136 = vmatpush1.bf16.msra.mxu1 %v9249_v46  ;;  %v9267_v20 = vld [vmem:[#allocation7 + $0xb20] ss:$8 sps:$4 sm:$0xff]   ;;  %vm12650_vm2 = vmmov %vm12645_vm0 }
 0x29d   : > { %vm12642_vm13 = vmor %vm12639_vm5, %vm12641_vm11  ;;  %v11423_v53 = vcombine.high %v11264_v13, %v11275_v32  ;;  %4182 = vst [vmem:[#allocation3 + $0x50] sm:$0xff] %v11414_v0  ;;  %5526 = vmatprep.subr.bf16.mxu0 %v9254_v50  ;;  %5137 = vmatprep.subr.bf16.mxu1 %v9257_v35  ;;  %v4354_v48 = vsel %vm12643_vm15, %v4349_v9, %v4353_v12  ;;  %v4371_v1 = vshrl.u32 %v11370_v55, 16  ;;  %v4375_v39 = vshll.u32 %v11406_v49, 16 }
 0x29e   : > { %v4184_v26 = vsel %vm12642_vm13, %v4159_v17, %v4183_v8  ;;  %4617 = vmatprep.mubr.bf16.mxu1 %v4362_v42  ;;  %v5325_v29 = vrot.slane %v11389_v33, 1  ;;  %v4363_v32 = vshrl.u32 %v11374_v34, 16  ;;  %v4367_v11 = vshll.u32 %v11410_v16, 16  ;;  %vm12656_vm5 = vmmov %vm12645_vm0 }
 0x29f   : > { %4185 = vst [vmem:[#allocation3 + $0x18] sm:$0x33] %v4184_v26  ;;  %v5326_v13 = vrot.slane %v11423_v53, 1  ;;  %4881 = vmatmul.mubr.bf16.gmra.mxu0 %v11374_v34  ;;  %v4373_v60 = vor.u32 %v4371_v1, %v4361_v45  ;;  %v11436_v3 = vrot.slane %v4375_v39, 1  ;;  %v8289_v38 = vcombine.low %v11425_v51, %v11279_v43  ;;  %vm12657_vm11 = vmmov %vm12645_vm0 }
 0x2a0   : > { %5527 = vmatpush1.bf16.msra.mxu0 %v9252_v21  ;;  %5138 = vmatpush1.bf16.msra.mxu1 %v9255_v56  ;;  %v4365_v47 = vor.u32 %v4363_v32, %v4353_v12  ;;  %v11440_v63 = vrot.slane %v4367_v11, 1  ;;  %v4387_v59 = vshrl.u32 %v11406_v49, 16  ;;  %v8290_v2 = vcombine.high %v11425_v51, %v11279_v43  ;;  %v9277_v12 = vld [vmem:[#allocation7 + $0xb14] ss:$8 sps:$4 sm:$0xff]   ;;  %v9272_v51 = vld [vmem:[#allocation7 + $0xce0] ss:$8 sps:$4 sm:$0xff]   ;;  %vm12658_vm13 = vmmov %vm12645_vm0 }
 0x2a1   : > { %5528 = vmatprep.subr.bf16.mxu0 %v9260_v52  ;;  %5139 = vmatprep.subr.bf16.mxu1 %v9263_v44  ;;  %v4378_v8 = vsel %vm12644_vm1, %v4373_v60, %v11436_v3  ;;  %v5327_v31 = vsel %vm12645_vm0, %v5325_v29, %v5326_v13  ;;  %v4939_v18 = vrot.slane %v8289_v38, 1  ;;  %v11455_v46 = vcombine.high %v11442_v14, %v11310_v36  ;;  %v9275_v52 = vld [vmem:[#allocation7 + $0xb10] ss:$8 sps:$4 sm:$0xff]   ;;  %v9280_v29 = vld [vmem:[#allocation7 + $0xcd4] ss:$8 sps:$4 sm:$0xff]   ;;  %vm12659_vm15 = vmmov %vm12645_vm0 }
 0x2a2   : > { %4890 = vmatprep.mubr.bf16.mxu0 %v11406_v49  ;;  %v4370_v6 = vsel %vm12646_vm8, %v4365_v47, %v11440_v63  ;;  %v11459_v28 = vcombine.low %v11442_v14, %v11310_v36  ;;  %v11463_v57 = vcombine.high %v11331_v15, %v11344_v22  ;;  %v4940_v50 = vrot.slane %v11323_v37, 1  ;;  %v9274_v36 = vld [vmem:[#allocation7 + $0xce4] ss:$8 sps:$4 sm:$0xff]   ;;  %vm12660_vm1 = vmmov %vm12645_vm0 }
 0x2a3   : > { %4618 = vmatmul.mubr.bf16.gmra.mxu1 %v4354_v48  ;;  %v4943_v35 = vrot.slane %v11319_v24, 1  ;;  %v5323_v25 = vrot.slane %v11393_v27, 1  ;;  %v4947_v45 = vrot.slane %v11354_v62, 1  ;;  %v11471_v7 = vcombine.low %v11331_v15, %v11344_v22  ;;  %v9284_v38 = vld [vmem:[#allocation7 + $0xb04] ss:$8 sps:$4 sm:$0xff]   ;;  %vm12661_vm0 = vmmov %vm12646_vm8 }
 0x2a4   : > { %5529 = vmatpush1.bf16.msra.mxu0 %v9258_v54  ;;  %5140 = vmatpush1.bf16.msra.mxu1 %v9261_v41  ;;  %v4229_v43 = vld [vmem:[#allocation3 + $0x50] sm:$0x11]  ;;  %v5330_v37 = vrot.slane %v11455_v46, 1  ;;  %v5328_v42 = vrot.slane %v11459_v28, 1  ;;  %v5334_v10 = vrot.slane %v11463_v57, 1  ;;  %v11481_v62 = vsel %vm12647_vm4, %v4939_v18, %v4940_v50  ;;  %vm12662_vm8 = vmmov %vm12660_vm1 }
 0x2a5   : > { %5530 = vmatprep.subr.bf16.mxu0 %v9266_v19  ;;  %5141 = vmatprep.subr.bf16.mxu1 %v9269_v61  ;;  %v11473_v17 = vcombine.high %v4229_v43, %v4229_v43  ;;  %v11475_v9 = vcombine.low %v4229_v43, %v4229_v43  ;;  %v11486_v15 = vsel %vm12648_vm7, %v4943_v35, %v4947_v45  ;;  %v5332_v22 = vrot.slane %v11471_v7, 1  ;;  %v9290_v18 = vld [vmem:[#allocation7 + $0xbf4] ss:$8 sps:$4 sm:$0xff]   ;;  %vm12663_vm4 = vmmov %vm12660_vm1 }
 0x2a6   : > { %4627 = vmatprep.mubr.bf16.mxu1 %v4378_v8  ;;  %v11493_v21 = vsel %vm12649_vm12, %v5326_v13, %v5330_v37  ;;  %v11498_v56 = vsel %vm12650_vm2, %v5323_v25, %v5328_v42  ;;  %v11501_v44 = vsel %vm12651_vm6, %v5330_v37, %v5334_v10  ;;  %v11508_v1 = vcombine.high %v11399_v4, %v11414_v0  ;;  %v9296_v24 = vld [vmem:[#allocation7 + $0xcb4] ss:$8 sps:$4 sm:$0xff]   ;;  %vm12664_vm7 = vmmov %vm12660_vm1 }
 0x2a7   : > { %4891 = vmatmul.mubr.bf16.gmra.mxu0 %v11410_v16  ;;  %v4391_v5 = vshll.u32 %v11473_v17, 16  ;;  %v4383_v26 = vshll.u32 %v11475_v9, 16  ;;  %v11504_v48 = vsel %vm12652_vm9, %v5328_v42, %v5332_v22  ;;  %v4945_v39 = vrot.slane %v11361_v23, 1 }
 0x2a8   : > { %5531 = vmatpush2.bf16.msra.mxu0 %v9264_v30  ;;  %5142 = vmatpush1.bf16.msra.mxu1 %v9267_v20  ;;  %v4389_v13 = vor.u32 %v4387_v59, %v11436_v3  ;;  %v4951_v11 = vrot.slane %v11370_v55, 1  ;;  %v11515_v60 = vcombine.low %v11399_v4, %v11414_v0  ;;  %v4379_v54 = vshrl.u32 %v11410_v16, 16  ;;  %v9278_v3 = vld [vmem:[#allocation7 + $0xcd0] ss:$8 sps:$4 sm:$0xff]   ;;  %v9282_v0 = vld [vmem:[#allocation7 + $0xb00] ss:$8 sps:$4 sm:$0xff]  }
 0x2a9   : > { %5546 = vmatprep.mubr.bf16.mxu0 %v5327_v31  ;;  %5532 = vmatprep.subr.bf16.mxu0 %v9274_v36  ;;  %v4393_v32 = vrot.slane %v4391_v5, 1  ;;  %v5338_v41 = vrot.slane %v11508_v1, 1  ;;  %v11520_v23 = vsel %vm12653_vm10, %v4940_v50, %v4945_v39  ;;  %v4949_v47 = vrot.slane %v11374_v34, 1 }
 0x2aa   : > { %5143 = vmatprep.subr.bf16.mxu1 %v9277_v12  ;;  %v4942_v55 = vrot.slane %v8290_v2, 1  ;;  %v11525_v61 = vsel %vm12655_vm3, %v4947_v45, %v4951_v11  ;;  %v5336_v4 = vrot.slane %v11515_v60, 1  ;;  %v4385_v8 = vrot.slane %v4383_v26, 1  ;;  %v9287_v2 = vld [vmem:[#allocation7 + $0xcc4] ss:$8 sps:$4 sm:$0xff]  }
 0x2ab   : > { %4628 = vmatmul.mubr.bf16.gmra.mxu1 %v4370_v6  ;;  %v4394_v19 = vsel %vm12654_vm14, %v4389_v13, %v4393_v32  ;;  %v11531_v59 = vsel %vm12656_vm5, %v5334_v10, %v5338_v41  ;;  %v11534_v34 = vsel %vm12657_vm11, %v4945_v39, %v4949_v47  ;;  %v4955_v31 = vrot.slane %v11406_v49, 1  ;;  %v11537_v6 = vld [vmem:[#allocation3 + $0x38] sm:$0xcc]  ;;  %v9299_v26 = vld [vmem:[#allocation7 + $0xbe4] ss:$8 sps:$4 sm:$0xff]  }
 0x2ac   : > { %5533 = vmatpush2.bf16.msra.mxu0 %v9272_v51  ;;  %5144 = vmatpush1.bf16.msra.mxu1 %v9275_v52  ;;  %v11542_v30 = vsel %vm12658_vm13, %v5332_v22, %v5336_v4  ;;  %v8401_v20 = vcombine.low %v11537_v6, %v11376_v40  ;;  %v4381_v50 = vor.u32 %v4379_v54, %v11440_v63  ;;  %v4953_v49 = vrot.slane %v11410_v16, 1  ;;  %v9285_v63 = vld [vmem:[#allocation7 + $0xcc0] ss:$8 sps:$4 sm:$0xff]   ;;  %v9288_v12 = vld [vmem:[#allocation7 + $0xbf0] ss:$8 sps:$4 sm:$0xff]  }
 0x2ad   : > { %5534 = vmatprep.subr.bf16.mxu0 %v9280_v29  ;;  %4637 = vmatprep.mubr.bf16.mxu1 %v4394_v19  ;;  %v11548_v43 = vsel %vm12659_vm15, %v4951_v11, %v4955_v31  ;;  %v11553_v45 = vcombine.low %v11385_v58, %v11376_v40  ;;  %v4944_v36 = vsel %vm12660_vm1, %v4942_v55, %v4943_v35  ;;  %v4959_v37 = vrot.slane %v11473_v17, 1  ;;  %v9297_v54 = vld [vmem:[#allocation7 + $0xbe0] ss:$8 sps:$4 sm:$0xff]  }
 0x2ae   : > { %5145 = vmatprep.subr.bf16.mxu1 %v9284_v38  ;;  %v4957_v42 = vrot.slane %v11475_v9, 1  ;;  %v4386_v10 = vsel %vm12661_vm0, %v4381_v50, %v4385_v8  ;;  %v11562_v16 = vsel %vm12662_vm8, %v4949_v47, %v4953_v49  ;;  %v5673_v58 = vshrl.u32 %v11389_v33, 16  ;;  %v9305_v8 = vld [vmem:[#allocation7 + $0xbd4] ss:$8 sps:$4 sm:$0xff]   ;;  %v9300_v50 = vld [vmem:[#allocation7 + $0xca0] ss:$8 sps:$4 sm:$0xff]  }
 0x2af   : > { %v5676_v22 = vshll.u32 %v11389_v33, 16  ;;  %v6072_v35 = vrot.slane %v8401_v20, 2  ;;  %v11567_v17 = vsel %vm12663_vm4, %v4955_v31, %v4959_v37  ;;  %v5681_v5 = vshrl.u32 %v11423_v53, 16  ;;  %v9294_v33 = vld [vmem:[#allocation7 + $0xcb0] ss:$8 sps:$4 sm:$0xff]  }
 0x2b0   : > { %5535 = vmatpush2.bf16.msra.mxu0 %v9278_v3  ;;  %5146 = vmatpush1.bf16.msra.mxu1 %v9282_v0  ;;  %v11570_v9 = vsel %vm12664_vm7, %v4953_v49, %v4957_v42  ;;  %v6076_v51 = vrot.slane %v11423_v53, 2  ;;  %v5675_v52 = vrot.slane %v5673_v58, 1  ;;  %v5684_v29 = vshll.u32 %v11423_v53, 16  ;;  %v9302_v0 = vld [vmem:[#allocation7 + $0xca4] ss:$8 sps:$4 sm:$0xff]  }
 0x2b1   : > { %5536 = vmatprep.subr.bf16.mxu0 %v9287_v2  ;;  %5147 = vmatprep.subr.bf16.mxu1 %v9290_v18  ;;  %v5678_v39 = vrot.slane %v5676_v22, 2  ;;  %v5683_v13 = vrot.slane %v5681_v5, 1  ;;  %v6073_v32 = vrot.slane %v11393_v27, 2  ;;  %v6080_v11 = vrot.slane %v11455_v46, 2  ;;  %v9382_v53 = vld [vmem:[#allocation7 + $0xed0] ss:$8 sps:$4 sm:$0xff]  }
 0x2b2   : > { %v6078_v38 = vrot.slane %v11459_v28, 2  ;;  %v5686_v3 = vrot.slane %v5684_v29, 2  ;;  %v6084_v19 = vrot.slane %v11463_v57, 2  ;;  %v5656_v55 = vshrl.u32 %v11553_v45, 16 }
 0x2b3   : > { %4638 = vmatmul.mubr.bf16.gmra.mxu1 %v4386_v10  ;;  %v5679_v47 = vor.u32 %v5678_v39, %v5675_v52  ;;  %vm12665_vm12 = vcmask 1045504   ;;  %v5659_v20 = vshll.u32 %v11553_v45, 16  ;;  %v5664_v42 = vshrl.u32 %v11393_v27, 16  ;;  %v9311_v39 = vld [vmem:[#allocation7 + $0xbc4] ss:$8 sps:$4 sm:$0xff]  }
 0x2b4   : > { %5537 = vmatpush2.bf16.msra.mxu0 %v9285_v63  ;;  %5148 = vmatpush2.bf16.msra.mxu1 %v9288_v12  ;;  %v11581_v31 = vsel %vm12665_vm12, %v6072_v35, %v6073_v32  ;;  %vm12666_vm2 = vmmov %vm12665_vm12  ;;  %v5687_v49 = vor.u32 %v5686_v3, %v5683_v13  ;;  %v5658_v37 = vrot.slane %v5656_v55, 1  ;;  %v9303_v63 = vld [vmem:[#allocation7 + $0xbd0] ss:$8 sps:$4 sm:$0xff]   ;;  %v5667_v10 = vshll.u32 %v11393_v27, 16 }
 0x2b5   : > { %5163 = vmatprep.mubr.bf16.mxu1 %v4944_v36  ;;  %5538 = vmatprep.subr.bf16.mxu0 %v9296_v24  ;;  %v11586_v2 = vsel %vm12666_vm2, %v6076_v51, %v6080_v11  ;;  %vm12667_vm6 = vmmov %vm12666_vm2  ;;  %v5661_v12 = vrot.slane %v5659_v20, 2  ;;  %v5699_v58 = vshrl.u32 %v11455_v46, 16  ;;  %v5702_v22 = vshll.u32 %v11455_v46, 16  ;;  %v9308_v24 = vld [vmem:[#allocation7 + $0xc94] ss:$8 sps:$4 sm:$0xff]  }
 0x2b6   : > { %v11589_v18 = vsel %vm12667_vm6, %v6073_v32, %v6078_v38  ;;  %5149 = vmatprep.subr.bf16.mxu1 %v9299_v26  ;;  %vm12668_vm9 = vmmov %vm12666_vm2  ;;  %vm12669_vm10 = vsmask.f32 6400  ;;  %v5666_v5 = vrot.slane %v5664_v42, 1  ;;  %v6082_v26 = vrot.slane %v11471_v7, 2  ;;  %v9306_v3 = vld [vmem:[#allocation7 + $0xc90] ss:$8 sps:$4 sm:$0xff]  }
 0x2b7   : > { %v11593_v36 = vsel %vm12668_vm9, %v6080_v11, %v6084_v19  ;;  %v11600_v35 = vsel %vm12669_vm10, %v5679_v47, %v5687_v49  ;;  %v6088_v52 = vrot.slane %v11508_v1, 2  ;;  %v5662_v29 = vor.u32 %v5661_v12, %v5658_v37  ;;  %vm12670_vm14 = vmmov %vm12666_vm2 }
 0x2b8   : > { %5539 = vmatpush2.bf16.msra.mxu0 %v9294_v33  ;;  %5150 = vmatpush2.bf16.msra.mxu1 %v9297_v54  ;;  %v5669_v13 = vrot.slane %v5667_v10, 2  ;;  %v5701_v32 = vrot.slane %v5699_v58, 1  ;;  %v5704_v11 = vrot.slane %v5702_v22, 2  ;;  %v11605_v46 = vsel %vm12670_vm14, %v6078_v38, %v6082_v26  ;;  %vm12671_vm3 = vmmov %vm12666_vm2  ;;  %v9309_v38 = vld [vmem:[#allocation7 + $0xbc0] ss:$8 sps:$4 sm:$0xff]  }
 0x2b9   : > { %5540 = vmatprep.subr.bf16.mxu0 %v9302_v0  ;;  %5151 = vmatprep.subr.bf16.mxu1 %v9305_v8  ;;  %v11610_v33 = vsel %vm12671_vm3, %v6084_v19, %v6088_v52  ;;  %v5690_v54 = vshrl.u32 %v11459_v28, 16  ;;  %v5693_v47 = vshll.u32 %v11459_v28, 16  ;;  %v5717_v8 = vshrl.u32 %v11463_v57, 16  ;;  %v9314_v19 = vld [vmem:[#allocation7 + $0xc84] ss:$8 sps:$4 sm:$0xff]   ;;  %vm12672_vm5 = vmmov %vm12669_vm10 }
 0x2ba   : > { %v5670_v55 = vor.u32 %v5669_v13, %v5666_v5  ;;  %v5705_v0 = vor.u32 %v5704_v11, %v5701_v32  ;;  %v5720_v20 = vshll.u32 %v11463_v57, 16  ;;  %v6086_v12 = vrot.slane %v11515_v60, 2  ;;  %v9317_v10 = vld [vmem:[#allocation7 + $0xbb4] ss:$8 sps:$4 sm:$0xff]   ;;  %vm12673_vm11 = vmmov %vm12672_vm5 }
 0x2bb   : > { %v5692_v37 = vrot.slane %v5690_v54, 1  ;;  %v5695_v42 = vrot.slane %v5693_v47, 2  ;;  %v5719_v22 = vrot.slane %v5717_v8, 1  ;;  %vm12674_vm13 = vmmov %vm12666_vm2  ;;  %v5711_v13 = vshll.u32 %v11471_v7, 16  ;;  %v9320_v11 = vld [vmem:[#allocation7 + $0xe74] ss:$8 sps:$4 sm:$0xff]  }
 0x2bc   : > { %5541 = vmatpush2.bf16.msra.mxu0 %v9300_v50  ;;  %5152 = vmatpush2.bf16.msra.mxu1 %v9303_v63  ;;  %v11618_v28 = vsel %vm12672_vm5, %v5662_v29, %v5670_v55  ;;  %v11621_v58 = vsel %vm12673_vm11, %v5687_v49, %v5705_v0  ;;  %v5722_v5 = vrot.slane %v5720_v20, 2  ;;  %v11626_v50 = vsel %vm12674_vm13, %v6082_v26, %v6086_v12  ;;  %v9315_v49 = vld [vmem:[#allocation7 + $0xbb0] ss:$8 sps:$4 sm:$0xff]   ;;  %vm12675_vm15 = vmmov %vm12672_vm5  ;;  %v9323_v26 = vld [vmem:[#allocation7 + $0xba4] ss:$8 sps:$4 sm:$0xff]  }
 0x2bd   : > { %5542 = vmatprep.subr.bf16.mxu0 %v9308_v24  ;;  %5153 = vmatprep.subr.bf16.mxu1 %v9311_v39  ;;  %v5696_v57 = vor.u32 %v5695_v42, %v5692_v37  ;;  %v5708_v63 = vshrl.u32 %v11471_v7, 16  ;;  %v9312_v24 = vld [vmem:[#allocation7 + $0xc80] ss:$8 sps:$4 sm:$0xff]   ;;  %v5735_v29 = vshrl.u32 %v11508_v1, 16  ;;  %v5738_v32 = vshll.u32 %v11508_v1, 16  ;;  %vm12676_vm1 = vmmov %vm12672_vm5 }
 0x2be   : > { %v5723_v39 = vor.u32 %v5722_v5, %v5719_v22  ;;  %v5713_v20 = vrot.slane %v5711_v13, 2  ;;  %v5322_v42 = vrot.slane %v11553_v45, 1  ;;  %vm12677_vm0 = vmmov %vm12676_vm1  ;;  %vm12682_vm6 = vcmask 1044480   ;;  %v9468_v1 = vld [vmem:[#allocation7 + $0x10f0] ss:$8 sps:$4 sm:$0xff]  }
 0x2bf   : > { %v11633_v54 = vsel %vm12675_vm15, %v5670_v55, %v5696_v57  ;;  %v5710_v47 = vrot.slane %v5708_v63, 1  ;;  %v5737_v7 = vrot.slane %v5735_v29, 1  ;;  %v5740_v37 = vrot.slane %v5738_v32, 2  ;;  %v9318_v55 = vld [vmem:[#allocation7 + $0xe70] ss:$8 sps:$4 sm:$0xff]   ;;  %vm12678_vm8 = vmmov %vm12677_vm0 }
 0x2c0   : > { %5543 = vmatpush2.bf16.msra.mxu0 %v9306_v3  ;;  %5154 = vmatpush2.bf16.msra.mxu1 %v9309_v38  ;;  %v11636_v8 = vsel %vm12676_vm1, %v5705_v0, %v5723_v39  ;;  %v5726_v38 = vshrl.u32 %v11515_v60, 16  ;;  %v9326_v0 = vld [vmem:[#allocation7 + $0xe64] ss:$8 sps:$4 sm:$0xff]   ;;  %v5324_v63 = vsel %vm12663_vm4, %v5322_v42, %v5323_v25  ;;  %v9324_v32 = vld [vmem:[#allocation7 + $0xe60] ss:$8 sps:$4 sm:$0xff]   ;;  %vm12679_vm7 = vmmov %vm12677_vm0  ;;  %vm12690_vm15 = vcmask 1045504  }
 0x2c1   : > { %5544 = vmatprep.subr.bf16.mxu0 %v9314_v19  ;;  %5155 = vmatprep.subr.bf16.mxu1 %v9317_v10  ;;  %v5714_v22 = vor.u32 %v5713_v20, %v5710_v47  ;;  %v11639_v3 = vor.u32 %v5740_v37, %v5737_v7  ;;  %v5729_v19 = vshll.u32 %v11515_v60, 16  ;;  %v9321_v10 = vld [vmem:[#allocation7 + $0xba0] ss:$8 sps:$4 sm:$0xff]   ;;  %v9330_v25 = vld [vmem:[#allocation7 + $0xe50] ss:$8 sps:$4 sm:$0xff]   ;;  %vm12680_vm12 = vmmov %vm12663_vm4 }
 0x2c2   : > { %v5728_v13 = vrot.slane %v5726_v38, 1  ;;  %v9333_v47 = vld [vmem:[#allocation7 + $0xb80] ss:$8 sps:$4 sm:$0xff]   ;;  %v9339_v7 = vld [vmem:[#allocation7 + $0xd70] ss:$8 sps:$4 sm:$0xff]   ;;  %vm12681_vm2 = vmmov %vm12663_vm4 }
 0x2c3   : > { %v11644_v5 = vsel %vm12677_vm0, %v5696_v57, %v5714_v22  ;;  %v11648_v45 = vsel %vm12678_vm8, %v5723_v39, %v11639_v3  ;;  %v5731_v29 = vrot.slane %v5729_v19, 2  ;;  %v9327_v57 = vld [vmem:[#allocation7 + $0xb90] ss:$8 sps:$4 sm:$0xff]   ;;  %v9335_v39 = vld [vmem:[#allocation7 + $0xb84] ss:$8 sps:$4 sm:$0xff]   ;;  %vm12683_vm9 = vmmov %vm12682_vm6 }
 0x2c4   : > { %5545 = vmatpush2.bf16.msra.mxu0 %v9312_v24  ;;  %5156 = vmatpush2.bf16.msra.mxu1 %v9315_v49  ;;  %v9329_v24 = vld [vmem:[#allocation7 + $0xb94] ss:$8 sps:$4 sm:$0xff]   ;;  %v9336_v20 = vld [vmem:[#allocation7 + $0xe40] ss:$8 sps:$4 sm:$0xff]   ;;  %v9347_v42 = vld [vmem:[#allocation7 + $0xd64] ss:$8 sps:$4 sm:$0xff]  }
 0x2c5   : > { %6264 = vmatprep.subr.bf16.mxu0 %v9320_v11  ;;  %5157 = vmatprep.subr.bf16.mxu1 %v9323_v26  ;;  %v11654_v49 = vor.u32 %v5731_v29, %v5728_v13  ;;  %v9332_v11 = vld [vmem:[#allocation7 + $0xe54] ss:$8 sps:$4 sm:$0xff]   ;;  %v6372_v13 = vld [vmem:[#allocation3 + $0x8] sm:$0xff]  ;;  %v9354_v29 = vld [vmem:[#allocation7 + $0xe10] ss:$8 sps:$4 sm:$0xff]  }
 0x2c6   : > { %v9341_v26 = vld [vmem:[#allocation7 + $0xd74] ss:$8 sps:$4 sm:$0xff]   ;;  %vm12684_vm10 = vmmov %vm12682_vm6 }
 0x2c7   : > { %5547 = vmatmul.mubr.bf16.vlgmr.msra.gmra.mxu0 %v5324_v63  ;;  %v11658_v27 = vsel %vm12679_vm7, %v5714_v22, %v11654_v49  ;;  %v9344_v37 = vld [vmem:[#allocation7 + $0xe34] ss:$8 sps:$4 sm:$0xff]   ;;  %v9342_v22 = vld [vmem:[#allocation7 + $0xe30] ss:$8 sps:$4 sm:$0xff]   ;;  %v9360_v63 = vld [vmem:[#allocation7 + $0xd44] ss:$8 sps:$4 sm:$0xff]  }
 0x2c8   : > { %5556 = vmatprep.mubr.bf16.mxu0 %v11493_v21  ;;  %6265 = vmatpush1.bf16.msra.mxu0 %v9318_v55  ;;  %v9338_v21 = vld [vmem:[#allocation7 + $0xe44] ss:$8 sps:$4 sm:$0xff]   ;;  %v5244_v38 = vld [vmem:[#allocation3 + $0x18] sm:$0x11]  ;;  %v9345_v55 = vld [vmem:[#allocation7 + $0xd60] ss:$8 sps:$4 sm:$0xff]  }
 0x2c9   : > { %5158 = vmatpush2.bf16.msra.mxu1 %v9321_v10  ;;  %6266 = vmatprep.subr.bf16.mxu0 %v9326_v0  ;;  %v8334_v19 = vcombine.high %v5244_v38, %v5244_v38  ;;  %v9348_v10 = vld [vmem:[#allocation7 + $0xe20] ss:$8 sps:$4 sm:$0xff]   ;;  %v9356_v0 = vld [vmem:[#allocation7 + $0xe14] ss:$8 sps:$4 sm:$0xff]   ;;  %vm12685_vm14 = vmmov %vm12682_vm6  ;;  %vm12695_vm7 = vsmask.f32 5376 }
 0x2ca   : > { %5159 = vmatprep.subr.bf16.mxu1 %v9329_v24  ;;  %v11666_v24 = vld [vmem:[#allocation3 + $0x40] sm:$0xff]  ;;  %vm12686_vm3 = vmmov %vm12682_vm6 }
 0x2cb   : > { %vm12687_vm5 = vmmov %vm12686_vm3  ;;  %v9486_v60 = vld [vmem:[#allocation7 + $0x10d4] ss:$8 sps:$4 sm:$0xff]  }
 0x2cc   : > { %6267 = vmatpush1.bf16.msra.mxu0 %v9324_v32  ;;  %v8333_v32 = vcombine.low %v5244_v38, %v5244_v38  ;;  %v11693_v38 = vld [vmem:[#allocation3 + $0x50] ss:$-56 sps:$4 sm:$0xff]   ;;  %vm12688_vm11 = vmmov %vm12686_vm3 }
 0x2cd   : > { %5160 = vmatpush2.bf16.msra.mxu1 %v9327_v57  ;;  %6268 = vmatprep.subr.bf16.mxu0 %v9332_v11  ;;  %v6369_v57 = vld [vmem:[#allocation3 + $0x48] sm:$0xff]  ;;  %v8402_v11 = vcombine.high %v11537_v6, %v11376_v40  ;;  %vm12689_vm13 = vmmov %vm12686_vm3 }
 0x2ce   : > { %5161 = vmatprep.subr.bf16.mxu1 %v9335_v39  ;;  %v11673_v39 = vcombine.high %v6369_v57, %v11442_v14  ;;  %vm12691_vm1 = vmmov %vm12686_vm3 }
 0x2cf   : > { %5557 = vmatmul.mubr.bf16.gmra.mxu0 %v11498_v56  ;;  %v9350_v56 = vld [vmem:[#allocation7 + $0xe24] ss:$8 sps:$4 sm:$0xff]   ;;  %vm12692_vm0 = vmmov %vm12691_vm1 }
 0x2d0   : > { %5566 = vmatprep.mubr.bf16.mxu0 %v11501_v44  ;;  %6269 = vmatpush1.bf16.msra.mxu0 %v9330_v25  ;;  %v9353_v44 = vld [vmem:[#allocation7 + $0xd54] ss:$8 sps:$4 sm:$0xff]   ;;  %v6371_v25 = vld [vmem:[#allocation3 + $0x28] sm:$0xff]  ;;  %vm12693_vm8 = vmmov %vm12690_vm15 }
 0x2d1   : > { %5162 = vmatpush2.bf16.msra.mxu1 %v9333_v47  ;;  %6270 = vmatprep.subr.bf16.mxu0 %v9338_v21  ;;  %v7167_v47 = vld [vmem:[#allocation3 + $0x10] sm:$0x88]  ;;  %v11676_v21 = vcombine.low %v6369_v57, %v11442_v14  ;;  %v11685_v6 = vcombine.low %v6371_v25, %v6372_v13  ;;  %vm12694_vm4 = vmmov %vm12693_vm8 }
 0x2d2   : > { %5931 = vmatprep.subr.bf16.mxu1 %v9341_v26  ;;  %v11678_v26 = vcombine.high %v6371_v25, %v6372_v13  ;;  %v9361_v14 = vld [vmem:[#allocation7 + $0xe00] ss:$8 sps:$4 sm:$0xff]  }
 0x2d4   : > { %5164 = vmatmul.mubr.bf16.vlgmr.msra.gmra.mxu1 %v11481_v62  ;;  %6271 = vmatpush1.bf16.msra.mxu0 %v9336_v20  ;;  %v9351_v62 = vld [vmem:[#allocation7 + $0xd50] ss:$8 sps:$4 sm:$0xff]   ;;  %v7213_v13 = vrot.slane %v11678_v26, 3 }
 0x2d5   : > { %5173 = vmatprep.mubr.bf16.mxu1 %v11486_v15  ;;  %5932 = vmatpush1.bf16.msra.mxu1 %v9339_v7  ;;  %v5342_v15 = vrot.slane %v8334_v19, 1  ;;  %v6750_v20 = vld [vmem:[#allocation3] sm:$0x77] }
 0x2d6   : > { %6272 = vmatprep.subr.bf16.mxu0 %v9344_v37  ;;  %5933 = vmatprep.subr.bf16.mxu1 %v9347_v42  ;;  %v11687_v7 = vld [vmem:[#allocation3 + $0x24] ss:$56 sps:$4 sm:$0xff]   ;;  %v11689_v37 = vld [vmem:[#allocation3 + $0x20] ss:$56 sps:$4 sm:$0xff]   ;;  %v11698_v19 = vcombine.low %v6750_v20, %v6750_v20 }
 0x2d7   : > { %5567 = vmatmul.mubr.bf16.gmra.mxu0 %v11504_v48  ;;  %v9358_v48 = vld [vmem:[#allocation7 + $0xd40] ss:$8 sps:$4 sm:$0xff]   ;;  %v5343_v40 = vsel %vm12680_vm12, %v5338_v41, %v5342_v15  ;;  %v11691_v42 = vld [vmem:[#allocation3 + $0x54] ss:$-56 sps:$4 sm:$0xff]   ;;  %v7206_v15 = vrot.slane %v11676_v21, 3 }
 0x2d8   : > { %5576 = vmatprep.mubr.bf16.mxu0 %v11531_v59  ;;  %6273 = vmatpush1.bf16.msra.mxu0 %v9342_v22  ;;  %v9363_v59 = vld [vmem:[#allocation7 + $0xe04] ss:$8 sps:$4 sm:$0xff]   ;;  %v5340_v22 = vrot.slane %v8333_v32, 1  ;;  %v9370_v41 = vld [vmem:[#allocation7 + $0xef4] ss:$8 sps:$4 sm:$0xff]   ;;  %v7215_v32 = vrot.slane %v11689_v37, 3 }
 0x2d9   : > { %5934 = vmatpush1.bf16.msra.mxu1 %v9345_v55  ;;  %6274 = vmatprep.subr.bf16.mxu0 %v9350_v56  ;;  %v9364_v55 = vld [vmem:[#allocation7 + $0xd30] ss:$8 sps:$4 sm:$0xff]   ;;  %v6075_v56 = vrot.slane %v8402_v11, 2  ;;  %v7221_v57 = vrot.slane %v11691_v42, 3  ;;  %vm12696_vm12 = vsmask.f32 6400 }
 0x2da   : > { %5935 = vmatprep.subr.bf16.mxu1 %v9353_v44  ;;  %v11696_v44 = vcombine.high %v6750_v20, %v6750_v20  ;;  %v9368_v11 = vld [vmem:[#allocation7 + $0xef0] ss:$8 sps:$4 sm:$0xff]   ;;  %v9371_v20 = vld [vmem:[#allocation7 + $0xd20] ss:$8 sps:$4 sm:$0xff]  }
 0x2dc   : > { %5174 = vmatmul.mubr.bf16.gmra.mxu1 %v11520_v23  ;;  %6275 = vmatpush1.bf16.msra.mxu0 %v9348_v10  ;;  %v9366_v23 = vld [vmem:[#allocation7 + $0xd34] ss:$8 sps:$4 sm:$0xff]   ;;  %v7209_v10 = vrot.slane %v11673_v39, 3 }
 0x2dd   : > { %5183 = vmatprep.mubr.bf16.mxu1 %v11525_v61  ;;  %5936 = vmatpush1.bf16.msra.mxu1 %v9351_v62  ;;  %v8513_v61 = vcombine.low %v7167_v47, %v11666_v24  ;;  %v9373_v62 = vld [vmem:[#allocation7 + $0xd24] ss:$8 sps:$4 sm:$0xff]  }
 0x2de   : > { %6276 = vmatprep.subr.bf16.mxu0 %v9356_v0  ;;  %5937 = vmatprep.subr.bf16.mxu1 %v9360_v63 }
 0x2df   : > { %5577 = vmatmul.mubr.bf16.gmra.mxu0 %v11542_v30  ;;  %v8514_v30 = vcombine.high %v7167_v47, %v11666_v24  ;;  %v7205_v0 = vrot.slane %v8513_v61, 3  ;;  %v9378_v61 = vld [vmem:[#allocation7 + $0xee4] ss:$8 sps:$4 sm:$0xff]  }
 0x2e0   : > { %5586 = vmatprep.mubr.bf16.mxu0 %v5343_v40  ;;  %6277 = vmatpush1.bf16.msra.mxu0 %v9354_v29  ;;  %v7211_v29 = vrot.slane %v11685_v6, 3 }
 0x2e1   : > { %5938 = vmatpush1.bf16.msra.mxu1 %v9358_v48  ;;  %6278 = vmatprep.subr.bf16.mxu0 %v9363_v59  ;;  %v7208_v63 = vrot.slane %v8514_v30, 3  ;;  %v7217_v48 = vrot.slane %v11687_v7, 3  ;;  %v5341_v59 = vsel %vm12681_vm2, %v5336_v4, %v5340_v22  ;;  %v11715_v47 = vsel %vm12683_vm9, %v7205_v0, %v7206_v15  ;;  %v9381_v22 = vld [vmem:[#allocation7 + $0xd14] ss:$8 sps:$4 sm:$0xff]   ;;  %vm12697_vm2 = vmmov %vm12696_vm12 }
 0x2e2   : > { %5939 = vmatprep.subr.bf16.mxu1 %v9366_v23  ;;  %v7219_v23 = vrot.slane %v11693_v38, 3  ;;  %v11723_v40 = vsel %vm12685_vm14, %v7206_v15, %v7211_v29  ;;  %v11730_v30 = vsel %vm12687_vm5, %v7211_v29, %v7215_v32  ;;  %v6077_v0 = vsel %vm12690_vm15, %v6075_v56, %v6076_v51  ;;  %v9379_v15 = vld [vmem:[#allocation7 + $0xd10] ss:$8 sps:$4 sm:$0xff]   ;;  %v9387_v29 = vld [vmem:[#allocation7 + $0xd04] ss:$8 sps:$4 sm:$0xff]   ;;  %vm12699_vm9 = vmmov %vm12695_vm7 }
 0x2e3   : > { %v11712_v25 = vsel %vm12682_vm6, %v7208_v63, %v7209_v10  ;;  %v11726_v4 = vsel %vm12686_vm3, %v7213_v13, %v7217_v48  ;;  %v9385_v51 = vld [vmem:[#allocation7 + $0xd00] ss:$8 sps:$4 sm:$0xff]   ;;  %v9390_v56 = vld [vmem:[#allocation7 + $0xec4] ss:$8 sps:$4 sm:$0xff]   ;;  %vm12698_vm6 = vmmov %vm12694_vm4 }
 0x2e4   : > { %5184 = vmatmul.mubr.bf16.gmra.mxu1 %v11534_v34  ;;  %6279 = vmatpush1.bf16.msra.mxu0 %v9361_v14  ;;  %v11720_v34 = vsel %vm12684_vm10, %v7209_v10, %v7213_v13  ;;  %v7225_v14 = vrot.slane %v11696_v44, 3  ;;  %v7223_v10 = vrot.slane %v11698_v19, 3  ;;  %v9384_v13 = vld [vmem:[#allocation7 + $0xed4] ss:$8 sps:$4 sm:$0xff]   ;;  %vm12700_vm10 = vmmov %vm12695_vm7 }
 0x2e5   : > { %5193 = vmatprep.mubr.bf16.mxu1 %v11548_v43  ;;  %5940 = vmatpush1.bf16.msra.mxu1 %v9364_v55  ;;  %v11733_v43 = vsel %vm12688_vm11, %v7217_v48, %v7221_v57  ;;  %v11736_v55 = vsel %vm12689_vm13, %v7215_v32, %v7219_v23  ;;  %v9393_v48 = vld [vmem:[#allocation7 + $0xdf4] ss:$8 sps:$4 sm:$0xff]   ;;  %v9388_v32 = vld [vmem:[#allocation7 + $0xec0] ss:$8 sps:$4 sm:$0xff]   ;;  %vm12701_vm14 = vmmov %vm12695_vm7 }
 0x2e6   : > { %6280 = vmatprep.subr.bf16.mxu0 %v9370_v41  ;;  %5941 = vmatprep.subr.bf16.mxu1 %v9373_v62  ;;  %v11743_v41 = vsel %vm12691_vm1, %v7221_v57, %v7225_v14  ;;  %v9376_v62 = vld [vmem:[#allocation7 + $0xee0] ss:$8 sps:$4 sm:$0xff]   ;;  %v11746_v63 = vsel %vm12692_vm0, %v7219_v23, %v7223_v10  ;;  %v9391_v57 = vld [vmem:[#allocation7 + $0xdf0] ss:$8 sps:$4 sm:$0xff]   ;;  %v9402_v23 = vld [vmem:[#allocation7 + $0xea4] ss:$8 sps:$4 sm:$0xff]  }
 0x2e7   : > { %5587 = vmatmul.mubr.bf16.gmra.mxu0 %v5341_v59  ;;  %v9396_v59 = vld [vmem:[#allocation7 + $0xeb4] ss:$8 sps:$4 sm:$0xff]   ;;  %v9403_v14 = vld [vmem:[#allocation7 + $0xdd0] ss:$8 sps:$4 sm:$0xff]   ;;  %v9411_v10 = vld [vmem:[#allocation7 + $0xdc4] ss:$8 sps:$4 sm:$0xff]  }
 0x2e8   : > { %6281 = vmatpush2.bf16.msra.mxu0 %v9368_v11  ;;  %6296 = vmatprep.mubr.bf16.mxu0 %v6077_v0  ;;  %v9399_v11 = vld [vmem:[#allocation7 + $0xde4] ss:$8 sps:$4 sm:$0xff]   ;;  %v9409_v0 = vld [vmem:[#allocation7 + $0xdc0] ss:$8 sps:$4 sm:$0xff]   ;;  %vm12702_vm3 = vmmov %vm12695_vm7 }
 0x2e9   : > { %5942 = vmatpush1.bf16.msra.mxu1 %v9371_v20  ;;  %6282 = vmatprep.subr.bf16.mxu0 %v9378_v61  ;;  %v9405_v20 = vld [vmem:[#allocation7 + $0xdd4] ss:$8 sps:$4 sm:$0xff]   ;;  %v9400_v61 = vld [vmem:[#allocation7 + $0xea0] ss:$8 sps:$4 sm:$0xff]   ;;  %vm12703_vm5 = vmmov %vm12694_vm4 }
 0x2ea   : > { %5943 = vmatprep.subr.bf16.mxu1 %v9381_v22  ;;  %v9408_v22 = vld [vmem:[#allocation7 + $0xe94] ss:$8 sps:$4 sm:$0xff]   ;;  %vm12704_vm11 = vmmov %vm12694_vm4 }
 0x2eb   : > { %vm12705_vm13 = vmmov %vm12702_vm3 }
 0x2ec   : > { %5194 = vmatmul.mubr.bf16.gmra.mxu1 %v11562_v16  ;;  %6283 = vmatpush2.bf16.msra.mxu0 %v9376_v62  ;;  %v9394_v16 = vld [vmem:[#allocation7 + $0xeb0] ss:$8 sps:$4 sm:$0xff]   ;;  %v9414_v62 = vld [vmem:[#allocation7 + $0xe84] ss:$8 sps:$4 sm:$0xff]   ;;  %vm12706_vm15 = vmmov %vm12702_vm3 }
 0x2ed   : > { %5203 = vmatprep.mubr.bf16.mxu1 %v11567_v17  ;;  %5944 = vmatpush1.bf16.msra.mxu1 %v9379_v15  ;;  %v9397_v17 = vld [vmem:[#allocation7 + $0xde0] ss:$8 sps:$4 sm:$0xff]   ;;  %vm12707_vm1 = vmmov %vm12694_vm4 }
 0x2ee   : > { %6284 = vmatprep.subr.bf16.mxu0 %v9384_v13  ;;  %5945 = vmatprep.subr.bf16.mxu1 %v9387_v29  ;;  %v9412_v15 = vld [vmem:[#allocation7 + $0xe80] ss:$8 sps:$4 sm:$0xff]   ;;  %v9415_v13 = vld [vmem:[#allocation7 + $0xdb0] ss:$8 sps:$4 sm:$0xff]   ;;  %v9420_v29 = vld [vmem:[#allocation7 + $0x1074] ss:$8 sps:$4 sm:$0xff]  }
 0x2ef   : > { %vm12708_vm0 = vmmov %vm12707_vm1 }
 0x2f0   : > { %6285 = vmatpush2.bf16.msra.mxu0 %v9382_v53  ;;  %v9423_v53 = vld [vmem:[#allocation7 + $0xda4] ss:$8 sps:$4 sm:$0xff]  }
 0x2f1   : > { %5946 = vmatpush1.bf16.msra.mxu1 %v9385_v51  ;;  %6286 = vmatprep.subr.bf16.mxu0 %v9390_v56  ;;  %v9418_v51 = vld [vmem:[#allocation7 + $0x1070] ss:$8 sps:$4 sm:$0xff]   ;;  %v9421_v56 = vld [vmem:[#allocation7 + $0xda0] ss:$8 sps:$4 sm:$0xff]  }
 0x2f2   : > { %5947 = vmatprep.subr.bf16.mxu1 %v9393_v48  ;;  %v9426_v48 = vld [vmem:[#allocation7 + $0x1064] ss:$8 sps:$4 sm:$0xff]  }
 0x2f4   : > { %5204 = vmatmul.mubr.bf16.gmra.mxu1 %v11570_v9  ;;  %6287 = vmatpush2.bf16.msra.mxu0 %v9388_v32  ;;  %v9406_v9 = vld [vmem:[#allocation7 + $0xe90] ss:$8 sps:$4 sm:$0xff]   ;;  %v9429_v32 = vld [vmem:[#allocation7 + $0xd94] ss:$8 sps:$4 sm:$0xff]  }
 0x2f5   : > { %5948 = vmatpush2.bf16.msra.mxu1 %v9391_v57  ;;  %5963 = vmatprep.mubr.bf16.mxu1 %v11600_v35  ;;  %v9417_v35 = vld [vmem:[#allocation7 + $0xdb4] ss:$8 sps:$4 sm:$0xff]   ;;  %v9424_v57 = vld [vmem:[#allocation7 + $0x1060] ss:$8 sps:$4 sm:$0xff]  }
 0x2f6   : > { %6288 = vmatprep.subr.bf16.mxu0 %v9396_v59  ;;  %5949 = vmatprep.subr.bf16.mxu1 %v9399_v11  ;;  %v9427_v59 = vld [vmem:[#allocation7 + $0xd90] ss:$8 sps:$4 sm:$0xff]   ;;  %v9432_v11 = vld [vmem:[#allocation7 + $0x1054] ss:$8 sps:$4 sm:$0xff]  }
 0x2f8   : > { %6289 = vmatpush2.bf16.msra.mxu0 %v9394_v16  ;;  %v9435_v16 = vld [vmem:[#allocation7 + $0xd84] ss:$8 sps:$4 sm:$0xff]  }
 0x2f9   : > { %5950 = vmatpush2.bf16.msra.mxu1 %v9397_v17  ;;  %6290 = vmatprep.subr.bf16.mxu0 %v9402_v23  ;;  %v9430_v17 = vld [vmem:[#allocation7 + $0x1050] ss:$8 sps:$4 sm:$0xff]   ;;  %v9433_v23 = vld [vmem:[#allocation7 + $0xd80] ss:$8 sps:$4 sm:$0xff]  }
 0x2fa   : > { %5951 = vmatprep.subr.bf16.mxu1 %v9405_v20  ;;  %v9438_v20 = vld [vmem:[#allocation7 + $0x1044] ss:$8 sps:$4 sm:$0xff]  }
 0x2fc   : > { %6291 = vmatpush2.bf16.msra.mxu0 %v9400_v61  ;;  %v9441_v61 = vld [vmem:[#allocation7 + $0xf74] ss:$8 sps:$4 sm:$0xff]  }
 0x2fd   : > { %5952 = vmatpush2.bf16.msra.mxu1 %v9403_v14  ;;  %6292 = vmatprep.subr.bf16.mxu0 %v9408_v22  ;;  %v9444_v14 = vld [vmem:[#allocation7 + $0x1034] ss:$8 sps:$4 sm:$0xff]   ;;  %v9447_v22 = vld [vmem:[#allocation7 + $0xf64] ss:$8 sps:$4 sm:$0xff]  }
 0x2fe   : > { %5953 = vmatprep.subr.bf16.mxu1 %v9411_v10  ;;  %v9442_v10 = vld [vmem:[#allocation7 + $0x1030] ss:$8 sps:$4 sm:$0xff]  }
 0x300   : > { %6293 = vmatpush2.bf16.msra.mxu0 %v9406_v9  ;;  %v5617_v9 = vld [vmem:[#allocation3 + $0x18] sm:$0x33] }
 0x301   : > { %5954 = vmatpush2.bf16.msra.mxu1 %v9409_v0  ;;  %6294 = vmatprep.subr.bf16.mxu0 %v9414_v62  ;;  %v9445_v0 = vld [vmem:[#allocation7 + $0xf60] ss:$8 sps:$4 sm:$0xff]   ;;  %v8368_v62 = vcombine.high %v5617_v9, %v5617_v9 }
 0x302   : > { %5955 = vmatprep.subr.bf16.mxu1 %v9417_v35  ;;  %v9448_v35 = vld [vmem:[#allocation7 + $0x1020] ss:$8 sps:$4 sm:$0xff]  }
 0x304   : > { %6295 = vmatpush2.bf16.msra.mxu0 %v9412_v15  ;;  %v11760_v15 = vld [vmem:[#allocation3 + $0x10] sm:$0xcc] }
 0x305   : > { %5956 = vmatpush2.bf16.msra.mxu1 %v9415_v13  ;;  %7064 = vmatprep.subr.bf16.mxu0 %v9420_v29  ;;  %v9456_v13 = vld [vmem:[#allocation7 + $0x1014] ss:$8 sps:$4 sm:$0xff]   ;;  %v9460_v29 = vld [vmem:[#allocation7 + $0xf44] ss:$8 sps:$4 sm:$0xff]  }
 0x306   : > { %5957 = vmatprep.subr.bf16.mxu1 %v9423_v53  ;;  %v6092_v53 = vrot.slane %v8368_v62, 2 }
 0x307   : > { %6297 = vmatmul.mubr.bf16.vlgmr.msra.gmra.mxu0 %v11581_v31  ;;  %v9436_v31 = vld [vmem:[#allocation7 + $0x1040] ss:$8 sps:$4 sm:$0xff]  }
 0x308   : > { %6306 = vmatprep.mubr.bf16.mxu0 %v11586_v2  ;;  %7065 = vmatpush1.bf16.msra.mxu0 %v9418_v51  ;;  %v9439_v2 = vld [vmem:[#allocation7 + $0xf70] ss:$8 sps:$4 sm:$0xff]   ;;  %v6817_v51 = vshll.u32 %v11673_v39, 16 }
 0x309   : > { %5958 = vmatpush2.bf16.msra.mxu1 %v9421_v56  ;;  %7066 = vmatprep.subr.bf16.mxu0 %v9426_v48  ;;  %v9458_v56 = vld [vmem:[#allocation7 + $0xf40] ss:$8 sps:$4 sm:$0xff]   ;;  %v9463_v48 = vld [vmem:[#allocation7 + $0x1004] ss:$8 sps:$4 sm:$0xff]  }
 0x30a   : > { %5959 = vmatprep.subr.bf16.mxu1 %v9429_v32 }
 0x30c   : > { %7067 = vmatpush1.bf16.msra.mxu0 %v9424_v57 }
 0x30d   : > { %5960 = vmatpush2.bf16.msra.mxu1 %v9427_v59  ;;  %7068 = vmatprep.subr.bf16.mxu0 %v9432_v11  ;;  %v9466_v59 = vld [vmem:[#allocation7 + $0xf34] ss:$8 sps:$4 sm:$0xff]   ;;  %v8367_v11 = vcombine.low %v5617_v9, %v5617_v9 }
 0x30e   : > { %5961 = vmatprep.subr.bf16.mxu1 %v9435_v16 }
 0x30f   : > { %6307 = vmatmul.mubr.bf16.gmra.mxu0 %v11589_v18  ;;  %v9450_v18 = vld [vmem:[#allocation7 + $0x1024] ss:$8 sps:$4 sm:$0xff]  }
 0x310   : > { %6316 = vmatprep.mubr.bf16.mxu0 %v11593_v36  ;;  %7069 = vmatpush1.bf16.msra.mxu0 %v9430_v17  ;;  %v9453_v36 = vld [vmem:[#allocation7 + $0xf54] ss:$8 sps:$4 sm:$0xff]   ;;  %v6819_v17 = vrot.slane %v6817_v51, 3 }
 0x311   : > { %5962 = vmatpush2.bf16.msra.mxu1 %v9433_v23  ;;  %7070 = vmatprep.subr.bf16.mxu0 %v9438_v20  ;;  %v5753_v23 = vshrl.u32 %v8368_v62, 16  ;;  %v5756_v20 = vshll.u32 %v8368_v62, 16 }
 0x312   : > { %6647 = vmatprep.subr.bf16.mxu1 %v9441_v61  ;;  %v9464_v61 = vld [vmem:[#allocation7 + $0xf30] ss:$8 sps:$4 sm:$0xff]  }
 0x313   : > { %v5758_v9 = vrot.slane %v5756_v20, 2  ;;  %v9496_v20 = vld [vmem:[#allocation7 + $0x10b0] ss:$8 sps:$4 sm:$0xff]  }
 0x314   : > { %5964 = vmatmul.mubr.bf16.vlgmr.msra.gmra.mxu1 %v11618_v28  ;;  %7071 = vmatpush1.bf16.msra.mxu0 %v9436_v31  ;;  %v9451_v28 = vld [vmem:[#allocation7 + $0xf50] ss:$8 sps:$4 sm:$0xff]  }
 0x315   : > { %5973 = vmatprep.mubr.bf16.mxu1 %v11621_v58  ;;  %6648 = vmatpush1.bf16.msra.mxu1 %v9439_v2  ;;  %v11764_v58 = vcombine.high %v11760_v15, %v11666_v24 }
 0x316   : > { %7072 = vmatprep.subr.bf16.mxu0 %v9444_v14  ;;  %6649 = vmatprep.subr.bf16.mxu1 %v9447_v22  ;;  %v6090_v14 = vrot.slane %v8367_v11, 2  ;;  %v9470_v22 = vld [vmem:[#allocation7 + $0x10f4] ss:$8 sps:$4 sm:$0xff]  }
 0x317   : > { %6317 = vmatmul.mubr.bf16.gmra.mxu0 %v11605_v46  ;;  %v6814_v46 = vshrl.u32 %v11673_v39, 16  ;;  %v6806_v32 = vshrl.u32 %v11764_v58, 16  ;;  %v6809_v57 = vshll.u32 %v11764_v58, 16 }
 0x318   : > { %6326 = vmatprep.mubr.bf16.mxu0 %v11610_v33  ;;  %7073 = vmatpush1.bf16.msra.mxu0 %v9442_v10  ;;  %v9454_v33 = vld [vmem:[#allocation7 + $0x1010] ss:$8 sps:$4 sm:$0xff]   ;;  %v6091_v62 = vsel %vm12694_vm4, %v6086_v12, %v6090_v14  ;;  %vm12710_vm4 = vmmov %vm12702_vm3 }
 0x319   : > { %6650 = vmatpush1.bf16.msra.mxu1 %v9445_v0  ;;  %7074 = vmatprep.subr.bf16.mxu0 %v9450_v18  ;;  %v6816_v16 = vrot.slane %v6814_v46, 2  ;;  %v6808_v31 = vrot.slane %v6806_v32, 2  ;;  %v6811_v2 = vrot.slane %v6809_v57, 3  ;;  %v9471_v0 = vld [vmem:[#allocation7 + $0xf20] ss:$8 sps:$4 sm:$0xff]  }
 0x31a   : > { %6651 = vmatprep.subr.bf16.mxu1 %v9453_v36  ;;  %v9480_v36 = vld [vmem:[#allocation7 + $0x10e4] ss:$8 sps:$4 sm:$0xff]   ;;  %v9495_v57 = vld [vmem:[#allocation7 + $0xff4] ss:$8 sps:$4 sm:$0xff]   ;;  %v9505_v14 = vld [vmem:[#allocation7 + $0xfd0] ss:$8 sps:$4 sm:$0xff]  }
 0x31b   : > { %v11776_v10 = vor.u32 %v6819_v17, %v6816_v16  ;;  %v6812_v18 = vor.u32 %v6811_v2, %v6808_v31  ;;  %v9489_v46 = vld [vmem:[#allocation7 + $0xf04] ss:$8 sps:$4 sm:$0xff]   ;;  %v6458_v16 = vrot.slane %v11764_v58, 2  ;;  %v9507_v2 = vld [vmem:[#allocation7 + $0xfd4] ss:$8 sps:$4 sm:$0xff]   ;;  %v11797_v58 = vcombine.low %v11760_v15, %v11666_v24 }
 0x31c   : > { %5974 = vmatmul.mubr.bf16.gmra.mxu1 %v11633_v54  ;;  %7075 = vmatpush1.bf16.msra.mxu0 %v9448_v35  ;;  %v6093_v54 = vsel %vm12693_vm8, %v6088_v52, %v6092_v53  ;;  %v5755_v52 = vrot.slane %v5753_v23, 1  ;;  %v9483_v35 = vld [vmem:[#allocation7 + $0xf14] ss:$8 sps:$4 sm:$0xff]   ;;  %v9481_v53 = vld [vmem:[#allocation7 + $0xf10] ss:$8 sps:$4 sm:$0xff]   ;;  %vm12709_vm8 = vmmov %vm12702_vm3 }
 0x31d   : > { %5983 = vmatprep.mubr.bf16.mxu1 %v11636_v8  ;;  %6652 = vmatpush1.bf16.msra.mxu1 %v9451_v28  ;;  %v9461_v8 = vld [vmem:[#allocation7 + $0x1000] ss:$8 sps:$4 sm:$0xff]   ;;  %v5744_v28 = vshrl.u32 %v8367_v11, 16  ;;  %v9492_v32 = vld [vmem:[#allocation7 + $0x10c4] ss:$8 sps:$4 sm:$0xff]   ;;  %v6789_v24 = vshrl.u32 %v11797_v58, 16 }
 0x31e   : > { %7076 = vmatprep.subr.bf16.mxu0 %v9456_v13  ;;  %6653 = vmatprep.subr.bf16.mxu1 %v9460_v29  ;;  %v5747_v13 = vshll.u32 %v8367_v11, 16  ;;  %v5759_v29 = vor.u32 %v5758_v9, %v5755_v52  ;;  %v9490_v11 = vld [vmem:[#allocation7 + $0x10c0] ss:$8 sps:$4 sm:$0xff]   ;;  %v9501_v17 = vld [vmem:[#allocation7 + $0xfe4] ss:$8 sps:$4 sm:$0xff]   ;;  %v6800_v52 = vshll.u32 %v11676_v21, 16 }
 0x31f   : > { %6327 = vmatmul.mubr.bf16.gmra.mxu0 %v11626_v50  ;;  %v9473_v50 = vld [vmem:[#allocation7 + $0xf24] ss:$8 sps:$4 sm:$0xff]   ;;  %v5746_v12 = vrot.slane %v5744_v28, 1  ;;  %v6832_v9 = vshrl.u32 %v11678_v26, 16  ;;  %v6792_v15 = vshll.u32 %v11797_v58, 16 }
 0x320   : > { %6336 = vmatprep.mubr.bf16.mxu0 %v6093_v54  ;;  %7077 = vmatpush1.bf16.msra.mxu0 %v9454_v33  ;;  %v5749_v51 = vrot.slane %v5747_v13, 2  ;;  %v5760_v33 = vsel %vm12696_vm12, %v11639_v3, %v5759_v29  ;;  %v6459_v54 = vrot.slane %v11673_v39, 2  ;;  %v9498_v3 = vld [vmem:[#allocation7 + $0x10b4] ss:$8 sps:$4 sm:$0xff]   ;;  %v9504_v31 = vld [vmem:[#allocation7 + $0x10a4] ss:$8 sps:$4 sm:$0xff]   ;;  %vm12712_vm12 = vmmov %vm12708_vm0 }
 0x321   : > { %6654 = vmatpush1.bf16.msra.mxu1 %v9458_v56  ;;  %7078 = vmatprep.subr.bf16.mxu0 %v9463_v48  ;;  %v9484_v56 = vld [vmem:[#allocation7 + $0x10d0] ss:$8 sps:$4 sm:$0xff]   ;;  %v9487_v48 = vld [vmem:[#allocation7 + $0xf00] ss:$8 sps:$4 sm:$0xff]   ;;  %v6802_v28 = vrot.slane %v6800_v52, 3  ;;  %v6834_v13 = vrot.slane %v6832_v9, 2 }
 0x322   : > { %6655 = vmatprep.subr.bf16.mxu1 %v9466_v59  ;;  %v5750_v59 = vor.u32 %v5749_v51, %v5746_v12  ;;  %v6460_v23 = vsel %vm12698_vm6, %v6458_v16, %v6459_v54  ;;  %v9514_v29 = vld [vmem:[#allocation7 + $0x1080] ss:$8 sps:$4 sm:$0xff]   ;;  %v9522_v51 = vld [vmem:[#allocation7 + $0xfa4] ss:$8 sps:$4 sm:$0xff]   ;;  %v9525_v16 = vld [vmem:[#allocation7 + $0xf94] ss:$8 sps:$4 sm:$0xff]  }
 0x323   : > { %v6868_v9 = vshrl.u32 %v11691_v42, 16  ;;  %vm12714_vm6 = vmmov %vm12708_vm0 }
 0x324   : > { %5984 = vmatmul.mubr.bf16.gmra.mxu1 %v11644_v5  ;;  %7079 = vmatpush1.bf16.msra.mxu0 %v9461_v8  ;;  %v6821_v5 = vsel %vm12695_vm7, %v6812_v18, %v11776_v10  ;;  %v5751_v8 = vsel %vm12697_vm2, %v11654_v49, %v5750_v59  ;;  %v9502_v49 = vld [vmem:[#allocation7 + $0x10a0] ss:$8 sps:$4 sm:$0xff]   ;;  %v9508_v18 = vld [vmem:[#allocation7 + $0x1090] ss:$8 sps:$4 sm:$0xff]   ;;  %vm12711_vm7 = vmmov %vm12708_vm0 }
 0x325   : > { %5993 = vmatprep.mubr.bf16.mxu1 %v11648_v45  ;;  %6656 = vmatpush1.bf16.msra.mxu1 %v9464_v61  ;;  %v9478_v45 = vld [vmem:[#allocation7 + $0x10e0] ss:$8 sps:$4 sm:$0xff]   ;;  %vm12713_vm2 = vmmov %vm12702_vm3 }
 0x326   : > { %7080 = vmatprep.subr.bf16.mxu0 %v9470_v22  ;;  %6657 = vmatprep.subr.bf16.mxu1 %v9473_v50  ;;  %v9499_v61 = vld [vmem:[#allocation7 + $0xfe0] ss:$8 sps:$4 sm:$0xff]   ;;  %v9510_v22 = vld [vmem:[#allocation7 + $0x1094] ss:$8 sps:$4 sm:$0xff]   ;;  %v9513_v50 = vld [vmem:[#allocation7 + $0xfc4] ss:$8 sps:$4 sm:$0xff]  }
 0x327   : > { %6337 = vmatmul.mubr.bf16.gmra.mxu0 %v6091_v62  ;;  %v9516_v62 = vld [vmem:[#allocation7 + $0x1084] ss:$8 sps:$4 sm:$0xff]  }
 0x328   : > { %7081 = vmatpush2.bf16.msra.mxu0 %v9468_v1  ;;  %7096 = vmatprep.mubr.bf16.mxu0 %v6821_v5  ;;  %v6797_v1 = vshrl.u32 %v11676_v21, 16 }
 0x329   : > { %6658 = vmatpush1.bf16.msra.mxu1 %v9471_v0  ;;  %7082 = vmatprep.subr.bf16.mxu0 %v9480_v36  ;;  %v6835_v0 = vshll.u32 %v11678_v26, 16  ;;  %v9511_v36 = vld [vmem:[#allocation7 + $0xfc0] ss:$8 sps:$4 sm:$0xff]  }
 0x32a   : > { %6659 = vmatprep.subr.bf16.mxu1 %v9483_v35  ;;  %v9519_v35 = vld [vmem:[#allocation7 + $0xfb4] ss:$8 sps:$4 sm:$0xff]   ;;  %v6799_v5 = vrot.slane %v6797_v1, 2 }
 0x32c   : > { %5994 = vmatmul.mubr.bf16.gmra.mxu1 %v11658_v27  ;;  %7083 = vmatpush2.bf16.msra.mxu0 %v9478_v45  ;;  %v9493_v27 = vld [vmem:[#allocation7 + $0xff0] ss:$8 sps:$4 sm:$0xff]   ;;  %v6837_v45 = vrot.slane %v6835_v0, 3  ;;  %v6803_v12 = vor.u32 %v6802_v28, %v6799_v5  ;;  %v6871_v0 = vshll.u32 %v11691_v42, 16  ;;  %v6456_v28 = vrot.slane %v11676_v21, 2 }
 0x32d   : > { %6003 = vmatprep.mubr.bf16.mxu1 %v5760_v33  ;;  %6660 = vmatpush1.bf16.msra.mxu1 %v9481_v53  ;;  %v6791_v53 = vrot.slane %v6789_v24, 2  ;;  %v6823_v33 = vshrl.u32 %v11685_v6, 16 }
 0x32e   : > { %7084 = vmatprep.subr.bf16.mxu0 %v9486_v60  ;;  %6661 = vmatprep.subr.bf16.mxu1 %v9489_v46  ;;  %v6794_v60 = vrot.slane %v6792_v15, 3  ;;  %v9517_v46 = vld [vmem:[#allocation7 + $0xfb0] ss:$8 sps:$4 sm:$0xff]   ;;  %v9533_v15 = vld [vmem:[#allocation7 + $0x1174] ss:$8 sps:$4 sm:$0xff]  }
 0x330   : > { %7085 = vmatpush2.bf16.msra.mxu0 %v9484_v56  ;;  %v6826_v56 = vshll.u32 %v11685_v6, 16  ;;  %v6795_v59 = vor.u32 %v6794_v60, %v6791_v53  ;;  %v6455_v60 = vrot.slane %v11797_v58, 2 }
 0x331   : > { %6662 = vmatpush1.bf16.msra.mxu1 %v9487_v48  ;;  %7086 = vmatprep.subr.bf16.mxu0 %v9492_v32  ;;  %v6838_v48 = vor.u32 %v6837_v45, %v6834_v13  ;;  %v6850_v32 = vshrl.u32 %v11687_v7, 16  ;;  %v6870_v13 = vrot.slane %v6868_v9, 2  ;;  %v6873_v45 = vrot.slane %v6871_v0, 3  ;;  %v9540_v0 = vld [vmem:[#allocation7 + $0x1150] ss:$8 sps:$4 sm:$0xff]  }
 0x332   : > { %6663 = vmatprep.subr.bf16.mxu1 %v9495_v57  ;;  %v6853_v57 = vshll.u32 %v11687_v7, 16  ;;  %v6457_v21 = vsel %vm12703_vm5, %v6455_v60, %v6456_v28  ;;  %v9545_v60 = vld [vmem:[#allocation7 + $0x1140] ss:$8 sps:$4 sm:$0xff]  }
 0x334   : > { %6004 = vmatmul.mubr.bf16.gmra.mxu1 %v5751_v8  ;;  %7087 = vmatpush2.bf16.msra.mxu0 %v9490_v11  ;;  %v9520_v11 = vld [vmem:[#allocation7 + $0xfa0] ss:$8 sps:$4 sm:$0xff]  }
 0x335   : > { %6664 = vmatpush2.bf16.msra.mxu1 %v9493_v27  ;;  %6679 = vmatprep.mubr.bf16.mxu1 %v6460_v23  ;;  %v6804_v27 = vsel %vm12699_vm9, %v6795_v59, %v6803_v12  ;;  %v6839_v23 = vsel %vm12700_vm10, %v11776_v10, %v6838_v48  ;;  %v6889_v59 = vshll.u32 %v11696_v44, 16  ;;  %vm12715_vm9 = vmmov %vm12708_vm0 }
 0x336   : > { %7088 = vmatprep.subr.bf16.mxu0 %v9498_v3  ;;  %6665 = vmatprep.subr.bf16.mxu1 %v9501_v17  ;;  %v6825_v3 = vrot.slane %v6823_v33, 2  ;;  %v6828_v17 = vrot.slane %v6826_v56, 3  ;;  %v6859_v33 = vshrl.u32 %v11693_v38, 16  ;;  %v6862_v56 = vshll.u32 %v11693_v38, 16  ;;  %vm12716_vm10 = vmmov %vm12708_vm0 }
 0x338   : > { %7089 = vmatpush2.bf16.msra.mxu0 %v9496_v20  ;;  %v6852_v20 = vrot.slane %v6850_v32, 2 }
 0x339   : > { %6666 = vmatpush2.bf16.msra.mxu1 %v9499_v61  ;;  %7090 = vmatprep.subr.bf16.mxu0 %v9504_v31  ;;  %v6855_v61 = vrot.slane %v6853_v57, 3  ;;  %v6874_v57 = vor.u32 %v6873_v45, %v6870_v13 }
 0x33a   : > { %6667 = vmatprep.subr.bf16.mxu1 %v9507_v2  ;;  %v9523_v2 = vld [vmem:[#allocation7 + $0xf90] ss:$8 sps:$4 sm:$0xff]  }
 0x33b   : > { %v6856_v52 = vor.u32 %v6855_v61, %v6852_v20  ;;  %v9542_v20 = vld [vmem:[#allocation7 + $0x1154] ss:$8 sps:$4 sm:$0xff]   ;;  %v6861_v61 = vrot.slane %v6859_v33, 2 }
 0x33c   : > { %7091 = vmatpush2.bf16.msra.mxu0 %v9502_v49  ;;  %v6829_v49 = vor.u32 %v6828_v17, %v6825_v3  ;;  %v9537_v3 = vld [vmem:[#allocation7 + $0x1160] ss:$8 sps:$4 sm:$0xff]  }
 0x33d   : > { %6668 = vmatpush2.bf16.msra.mxu1 %v9505_v14  ;;  %7092 = vmatprep.subr.bf16.mxu0 %v9510_v22  ;;  %v9528_v14 = vld [vmem:[#allocation7 + $0xf84] ss:$8 sps:$4 sm:$0xff]   ;;  %v6841_v22 = vshrl.u32 %v11689_v37, 16  ;;  %v6857_v5 = vsel %vm12702_vm3, %v6838_v48, %v6856_v52 }
 0x33e   : > { %6669 = vmatprep.subr.bf16.mxu1 %v9513_v50  ;;  %v6844_v50 = vshll.u32 %v11689_v37, 16  ;;  %v6830_v24 = vsel %vm12701_vm14, %v6803_v12, %v6829_v49  ;;  %vm12742_vm14 = vcmask 1044480  }
 0x33f   : > { %vm12744_vm3 = vmmov %vm12742_vm14 }
 0x340   : > { %7093 = vmatpush2.bf16.msra.mxu0 %v9508_v18  ;;  %v9526_v18 = vld [vmem:[#allocation7 + $0xf80] ss:$8 sps:$4 sm:$0xff]   ;;  %vm12745_vm5 = vmmov %vm12744_vm3 }
 0x341   : > { %6670 = vmatpush2.bf16.msra.mxu1 %v9511_v36  ;;  %7094 = vmatprep.subr.bf16.mxu0 %v9516_v62  ;;  %v6843_v36 = vrot.slane %v6841_v22, 2  ;;  %v6846_v62 = vrot.slane %v6844_v50, 3  ;;  %v6891_v22 = vrot.slane %v6889_v59, 3  ;;  %v9548_v59 = vld [vmem:[#allocation7 + $0x1130] ss:$8 sps:$4 sm:$0xff]  }
 0x342   : > { %6671 = vmatprep.subr.bf16.mxu1 %v9519_v35 }
 0x343   : > { %v6847_v12 = vor.u32 %v6846_v62, %v6843_v36 }
 0x344   : > { %7095 = vmatpush2.bf16.msra.mxu0 %v9514_v29  ;;  %v6463_v29 = vrot.slane %v11678_v26, 2  ;;  %v6886_v26 = vshrl.u32 %v11696_v44, 16  ;;  %v6864_v44 = vrot.slane %v6862_v56, 3 }
 0x345   : > { %6672 = vmatpush2.bf16.msra.mxu1 %v9517_v46  ;;  %v9531_v46 = vld [vmem:[#allocation7 + $0x1170] ss:$8 sps:$4 sm:$0xff]  }
 0x346   : > { %6673 = vmatprep.subr.bf16.mxu1 %v9522_v51  ;;  %v9539_v51 = vld [vmem:[#allocation7 + $0x1164] ss:$8 sps:$4 sm:$0xff]  }
 0x347   : > { %7097 = vmatmul.mubr.bf16.vlgmr.msra.gmra.mxu0 %v6804_v27  ;;  %v4852_v8 = vpop.f32.mrf.mxu0 }
 0x348   : > { %7106 = vmatprep.mubr.bf16.mxu0 %v6839_v23  ;;  %v6848_v23 = vsel %vm12705_vm13, %v6829_v49, %v6847_v12  ;;  %vm12747_vm13 = vmmov %vm12744_vm3 }
 0x349   : > { %6674 = vmatpush2.bf16.msra.mxu1 %v9520_v11  ;;  %v4854_v31 = vpop.f32.mrf.mxu0  ;;  %v6464_v11 = vsel %vm12704_vm11, %v6459_v54, %v6463_v29  ;;  %v6461_v54 = vrot.slane %v11685_v6, 2  ;;  %v6880_v6 = vshll.u32 %v11698_v19, 16  ;;  %vm12746_vm11 = vmmov %vm12744_vm3 }
 0x34a   : > { %6675 = vmatprep.subr.bf16.mxu1 %v9525_v16 }
 0x34b   : > { %v4856_v1 = vpop.f32.mrf.mxu0  ;;  %v6462_v62 = vsel %vm12707_vm1, %v6456_v28, %v6461_v54  ;;  %v6882_v28 = vrot.slane %v6880_v6, 3  ;;  %vm12749_vm1 = vmmov %vm12744_vm3 }
 0x34d   : > { %6676 = vmatpush2.bf16.msra.mxu1 %v9523_v2  ;;  %v4858_v10 = vpop.f32.mrf.mxu0  ;;  %v6875_v2 = vsel %vm12706_vm15, %v6856_v52, %v6874_v57  ;;  %v6877_v52 = vshrl.u32 %v11698_v19, 16  ;;  %v9550_v19 = vld [vmem:[#allocation7 + $0x1134] ss:$8 sps:$4 sm:$0xff]   ;;  %vm12748_vm15 = vmmov %vm12744_vm3 }
 0x34e   : > { %6677 = vmatprep.subr.bf16.mxu1 %v9528_v14  ;;  %v6888_v14 = vrot.slane %v6886_v26, 2 }
 0x34f   : > { %7107 = vmatmul.mubr.bf16.gmra.mxu0 %v6830_v24  ;;  %v4862_v35 = vpop.f32.mrf.mxu0  ;;  %v6865_v24 = vor.u32 %v6864_v44, %v6861_v61  ;;  %v6879_v33 = vrot.slane %v6877_v52, 2 }
 0x350   : > { %7116 = vmatprep.mubr.bf16.mxu0 %v6857_v5  ;;  %v6892_v5 = vor.u32 %v6891_v22, %v6888_v14  ;;  %v9557_v14 = vld [vmem:[#allocation7 + $0x1114] ss:$8 sps:$4 sm:$0xff]   ;;  %v6469_v22 = vrot.slane %v11693_v38, 2 }
 0x351   : > { %6678 = vmatpush2.bf16.msra.mxu1 %v9526_v18  ;;  %v4864_v53 = vpop.f32.mrf.mxu0 }
 0x352   : > { %7397 = vmatprep.subr.bf16.mxu1 %v9533_v15  ;;  %v9547_v15 = vld [vmem:[#allocation7 + $0x1144] ss:$8 sps:$4 sm:$0xff]  }
 0x353   : > { %v11823_v48 = vpop.f32.mrf.mxu0  ;;  %v4599_v32 = vpop.f32.mrf.mxu1 }
 0x354   : > { %6680 = vmatmul.mubr.bf16.vlgmr.msra.gmra.mxu1 %v6457_v21  ;;  %v11828_v58 = vadd.f32 %v4852_v8, %v4599_v32 }
 0x355   : > { %6689 = vmatprep.mubr.bf16.mxu1 %v6464_v11  ;;  %7398 = vmatpush1.bf16.msra.mxu1 %v9531_v46  ;;  %v4868_v27 = vpop.f32.mrf.mxu0  ;;  %v4601_v16 = vpop.f32.mrf.mxu1  ;;  %v6377_v11 = vld [vmem:[#allocation3] sm:$0x33] }
 0x356   : > { %v11833_v17 = vadd.f32 %v4854_v31, %v4601_v16  ;;  %7399 = vmatprep.subr.bf16.mxu1 %v9539_v51  ;;  %v6467_v31 = vrot.slane %v11687_v7, 2  ;;  %v6866_v51 = vsel %vm12709_vm8, %v6847_v12, %v6865_v24  ;;  %v8446_v61 = vcombine.high %v6377_v11, %v6377_v11 }
 0x357   : > { %7117 = vmatmul.mubr.bf16.gmra.mxu0 %v6848_v23  ;;  %v4872_v8 = vpop.f32.mrf.mxu0  ;;  %v4603_v39 = vpop.f32.mrf.mxu1  ;;  %v9554_v23 = vld [vmem:[#allocation7 + $0x1124] ss:$8 sps:$4 sm:$0xff]  }
 0x358   : > { %7126 = vmatprep.mubr.bf16.mxu0 %v6875_v2  ;;  %v11838_v50 = vadd.f32 %v4856_v1, %v4603_v39  ;;  %v6468_v13 = vsel %vm12708_vm0, %v6463_v29, %v6467_v31  ;;  %v6465_v29 = vrot.slane %v11689_v37, 2  ;;  %v9552_v2 = vld [vmem:[#allocation7 + $0x1120] ss:$8 sps:$4 sm:$0xff]   ;;  %vm12750_vm0 = vmmov %vm12749_vm1 }
 0x359   : > { %7400 = vmatpush1.bf16.msra.mxu1 %v9537_v3  ;;  %v4874_v49 = vpop.f32.mrf.mxu0  ;;  %v4605_v9 = vpop.f32.mrf.mxu1  ;;  %v6883_v3 = vor.u32 %v6882_v28, %v6879_v33  ;;  %vm12751_vm8 = vmmov %vm12750_vm0 }
 0x35a   : > { %v11841_v18 = vadd.f32 %v4858_v10, %v4605_v9  ;;  %7401 = vmatprep.subr.bf16.mxu1 %v9542_v20  ;;  %v6475_v9 = vrot.slane %v8446_v61, 2  ;;  %v6470_v6 = vsel %vm12714_vm6, %v6465_v29, %v6469_v22  ;;  %vm12772_vm6 = vmmov %vm12750_vm0 }
 0x35b   : > { %v4876_v36 = vpop.f32.mrf.mxu0  ;;  %v4609_v1 = vpop.f32.mrf.mxu1 }
 0x35c   : > { %6690 = vmatmul.mubr.bf16.gmra.mxu1 %v6462_v62  ;;  %v11846_v7 = vadd.f32 %v4862_v35, %v4609_v1  ;;  %v6893_v35 = vsel %vm12710_vm4, %v6874_v57, %v6892_v5  ;;  %v6466_v57 = vsel %vm12711_vm7, %v6461_v54, %v6465_v29  ;;  %v8445_v62 = vcombine.low %v6377_v11, %v6377_v11  ;;  %v9568_v11 = vld [vmem:[#allocation7 + $0x11e0] ss:$8 sps:$4 sm:$0xff]   ;;  %vm12752_vm4 = vmmov %vm12750_vm0 }
 0x35d   : > { %6699 = vmatprep.mubr.bf16.mxu1 %v6468_v13  ;;  %7402 = vmatpush1.bf16.msra.mxu1 %v9540_v0  ;;  %v4878_v10 = vpop.f32.mrf.mxu0  ;;  %v4611_v45 = vpop.f32.mrf.mxu1  ;;  %v9559_v13 = vld [vmem:[#allocation7 + $0x1100] ss:$8 sps:$4 sm:$0xff]   ;;  %vm12753_vm7 = vmmov %vm12750_vm0 }
 0x35e   : > { %v11849_v46 = vadd.f32 %v4864_v53, %v4611_v45  ;;  %7403 = vmatprep.subr.bf16.mxu1 %v9547_v15  ;;  %v6471_v53 = vrot.slane %v11691_v42, 2  ;;  %v9555_v15 = vld [vmem:[#allocation7 + $0x1110] ss:$8 sps:$4 sm:$0xff]  }
 0x35f   : > { %7127 = vmatmul.mubr.bf16.gmra.mxu0 %v6866_v51  ;;  %v4882_v56 = vpop.f32.mrf.mxu0  ;;  %v4613_v21 = vpop.f32.mrf.mxu1  ;;  %v6473_v51 = vrot.slane %v8445_v62, 2  ;;  %v9586_v62 = vld [vmem:[#allocation7 + $0x1180] ss:$8 sps:$4 sm:$0xff]  }
 0x360   : > { %7136 = vmatprep.mubr.bf16.mxu0 %v6893_v35  ;;  %v11855_v32 = vadd.f32 %v11823_v48, %v4613_v21  ;;  %v6472_v48 = vsel %vm12712_vm12, %v6467_v31, %v6471_v53  ;;  %v6476_v38 = vsel %vm12715_vm9, %v6471_v53, %v6475_v9  ;;  %v9570_v21 = vld [vmem:[#allocation7 + $0x11e4] ss:$8 sps:$4 sm:$0xff]   ;;  %v9585_v9 = vld [vmem:[#allocation7 + $0x1194] ss:$8 sps:$4 sm:$0xff]   ;;  %vm12759_vm12 = vmmov %vm12750_vm0 }
 0x361   : > { %7404 = vmatpush1.bf16.msra.mxu1 %v9545_v60  ;;  %v4884_v26 = vpop.f32.mrf.mxu0  ;;  %v4615_v12 = vpop.f32.mrf.mxu1  ;;  %v6474_v29 = vsel %vm12716_vm10, %v6469_v22, %v6473_v51  ;;  %v9580_v22 = vld [vmem:[#allocation7 + $0x11a0] ss:$8 sps:$4 sm:$0xff]   ;;  %vm12778_vm9 = vmmov %vm12750_vm0 }
 0x362   : > { %v11858_v16 = vadd.f32 %v4868_v27, %v4615_v12  ;;  %7405 = vmatprep.subr.bf16.mxu1 %v9550_v19  ;;  %v6884_v27 = vsel %vm12713_vm2, %v6865_v24, %v6883_v3  ;;  %vm12763_vm2 = vmmov %vm12750_vm0 }
 0x363   : > { %v4619_v20 = vpop.f32.mrf.mxu1  ;;  %v4886_v42 = vpop.f32.mrf.mxu0  ;;  %vm12782_vm10 = vmmov %vm12750_vm0 }
 0x364   : > { %6700 = vmatmul.mubr.bf16.gmra.mxu1 %v6466_v57  ;;  %v11861_v37 = vadd.f32 %v4872_v8, %v4619_v20 }
 0x365   : > { %6709 = vmatprep.mubr.bf16.mxu1 %v6472_v48  ;;  %7406 = vmatpush1.bf16.msra.mxu1 %v9548_v59  ;;  %v4621_v44 = vpop.f32.mrf.mxu1  ;;  %v4888_v31 = vpop.f32.mrf.mxu0 }
 0x366   : > { %v11864_v39 = vadd.f32 %v4874_v49, %v4621_v44  ;;  %7407 = vmatprep.subr.bf16.mxu1 %v9554_v23  ;;  %v9561_v49 = vld [vmem:[#allocation7 + $0x1104] ss:$8 sps:$4 sm:$0xff]   ;;  %v9573_v23 = vld [vmem:[#allocation7 + $0x11d4] ss:$8 sps:$4 sm:$0xff]  }
 0x367   : > { %7137 = vmatmul.mubr.bf16.gmra.mxu0 %v6884_v27  ;;  %v4623_v54 = vpop.f32.mrf.mxu1  ;;  %v9574_v27 = vld [vmem:[#allocation7 + $0x11c0] ss:$8 sps:$4 sm:$0xff]  }
 0x368   : > { %v11868_v8 = vadd.f32 %v4876_v36, %v4623_v54  ;;  %v4892_v36 = vpop.f32.mrf.mxu0  ;;  %v9582_v54 = vld [vmem:[#allocation7 + $0x11a4] ss:$8 sps:$4 sm:$0xff]  }
 0x369   : > { %7408 = vmatpush1.bf16.msra.mxu1 %v9552_v2  ;;  %v4625_v0 = vpop.f32.mrf.mxu1  ;;  %v9576_v2 = vld [vmem:[#allocation7 + $0x11c4] ss:$8 sps:$4 sm:$0xff]  }
 0x36a   : > { %v11870_v52 = vadd.f32 %v4878_v10, %v4625_v0  ;;  %7409 = vmatprep.subr.bf16.mxu1 %v9557_v14  ;;  %v9565_v10 = vld [vmem:[#allocation7 + $0x11f4] ss:$8 sps:$4 sm:$0xff]   ;;  %v4894_v33 = vpop.f32.mrf.mxu0  ;;  %v9577_v14 = vld [vmem:[#allocation7 + $0x11b0] ss:$8 sps:$4 sm:$0xff]  }
 0x36b   : > { %v4629_v24 = vpop.f32.mrf.mxu1 }
 0x36c   : > { %6710 = vmatmul.mubr.bf16.gmra.mxu1 %v6470_v6  ;;  %v11873_v1 = vadd.f32 %v4882_v56, %v4629_v24  ;;  %v9563_v56 = vld [vmem:[#allocation7 + $0x11f0] ss:$8 sps:$4 sm:$0xff]   ;;  %v4896_v12 = vpop.f32.mrf.mxu0 }
 0x36d   : > { %6719 = vmatprep.mubr.bf16.mxu1 %v6476_v38  ;;  %7410 = vmatpush1.bf16.msra.mxu1 %v9555_v15  ;;  %v4631_v5 = vpop.f32.mrf.mxu1  ;;  %v9583_v15 = vld [vmem:[#allocation7 + $0x1190] ss:$8 sps:$4 sm:$0xff]  }
 0x36e   : > { %v11876_v45 = vadd.f32 %v4884_v26, %v4631_v5  ;;  %7411 = vmatprep.subr.bf16.mxu1 %v9561_v49  ;;  %v4898_v48 = vpop.f32.mrf.mxu0  ;;  %v9588_v49 = vld [vmem:[#allocation7 + $0x1184] ss:$8 sps:$4 sm:$0xff]  }
 0x36f   : > { %v4633_v60 = vpop.f32.mrf.mxu1 }
 0x370   : > { %v11878_v19 = vadd.f32 %v4886_v42, %v4633_v60  ;;  %v9571_v42 = vld [vmem:[#allocation7 + $0x11d0] ss:$8 sps:$4 sm:$0xff]  }
 0x371   : > { %7412 = vmatpush1.bf16.msra.mxu1 %v9559_v13  ;;  %v4635_v28 = vpop.f32.mrf.mxu1 }
 0x372   : > { %v11880_v35 = vadd.f32 %v4888_v31, %v4635_v28  ;;  %7413 = vmatprep.subr.bf16.mxu1 %v9565_v10 }
 0x373   : > { %v4639_v53 = vpop.f32.mrf.mxu1 }
 0x374   : > { %6720 = vmatmul.mubr.bf16.gmra.mxu1 %v6474_v29  ;;  %v11883_v26 = vadd.f32 %v4892_v36, %v4639_v53 }
 0x375   : > { %7414 = vmatpush2.bf16.msra.mxu1 %v9563_v56  ;;  %7429 = vmatprep.mubr.bf16.mxu1 %v11712_v25  ;;  %v4641_v59 = vpop.f32.mrf.mxu1  ;;  %v9579_v25 = vld [vmem:[#allocation7 + $0x11b4] ss:$8 sps:$4 sm:$0xff]  }
 0x376   : > { %v11886_v3 = vadd.f32 %v4894_v33, %v4641_v59  ;;  %7415 = vmatprep.subr.bf16.mxu1 %v9570_v21 }
 0x377   : > { %v4643_v57 = vpop.f32.mrf.mxu1 }
 0x378   : > { %v11888_v20 = vadd.f32 %v4896_v12, %v4643_v57 }
 0x379   : > { %7416 = vmatpush2.bf16.msra.mxu1 %v9568_v11  ;;  %v4645_v61 = vpop.f32.mrf.mxu1 }
 0x37a   : > { %v11890_v44 = vadd.f32 %v4898_v48, %v4645_v61  ;;  %7417 = vmatprep.subr.bf16.mxu1 %v9573_v23 }
 0x37d   : > { %7418 = vmatpush2.bf16.msra.mxu1 %v9571_v42 }
 0x37e   : > { %7419 = vmatprep.subr.bf16.mxu1 %v9576_v2 }
 0x381   : > { %7420 = vmatpush2.bf16.msra.mxu1 %v9574_v27 }
 0x382   : > { %7421 = vmatprep.subr.bf16.mxu1 %v9579_v25 }
 0x385   : > { %7422 = vmatpush2.bf16.msra.mxu1 %v9577_v14 }
 0x386   : > { %7423 = vmatprep.subr.bf16.mxu1 %v9582_v54 }
 0x387   : > { %v5548_v31 = vpop.f32.mrf.mxu0 }
 0x389   : > { %v5550_v0 = vpop.f32.mrf.mxu0  ;;  %7424 = vmatpush2.bf16.msra.mxu1 %v9580_v22 }
 0x38a   : > { %7425 = vmatprep.subr.bf16.mxu1 %v9585_v9 }
 0x38b   : > { %v5552_v6 = vpop.f32.mrf.mxu0 }
 0x38d   : > { %v5554_v24 = vpop.f32.mrf.mxu0  ;;  %7426 = vmatpush2.bf16.msra.mxu1 %v9583_v15 }
 0x38e   : > { %7427 = vmatprep.subr.bf16.mxu1 %v9588_v49 }
 0x38f   : > { %v5558_v38 = vpop.f32.mrf.mxu0 }
 0x391   : > { %v5560_v36 = vpop.f32.mrf.mxu0  ;;  %7428 = vmatpush2.bf16.msra.mxu1 %v9586_v62 }
 0x393   : > { %v5562_v5 = vpop.f32.mrf.mxu0 }
 0x394   : > { %v5165_v13 = vpop.f32.mrf.mxu1  ;;  %7430 = vmatmul.mubr.bf16.vlgmr.msra.gmra.mxu1 %v11715_v47 }
 0x395   : > { %v5214_v10 = vadd.f32 %v5165_v13, %v11828_v58  ;;  %v5564_v60 = vpop.f32.mrf.mxu0  ;;  %7439 = vmatprep.mubr.bf16.mxu1 %v11720_v34 }
 0x396   : > { %v5167_v51 = vpop.f32.mrf.mxu1 }
 0x397   : > { %v5215_v33 = vadd.f32 %v5167_v51, %v11833_v17  ;;  %v5568_v28 = vpop.f32.mrf.mxu0  ;;  %v11896_v56 = vadd.f32 %v5548_v31, %v5214_v10 }
 0x398   : > { %v5169_v21 = vpop.f32.mrf.mxu1 }
 0x399   : > { %v5216_v29 = vadd.f32 %v5169_v21, %v11838_v50  ;;  %v5570_v53 = vpop.f32.mrf.mxu0  ;;  %v11899_v12 = vadd.f32 %v5550_v0, %v5215_v33 }
 0x39a   : > { %v5171_v59 = vpop.f32.mrf.mxu1 }
 0x39b   : > { %v5217_v47 = vadd.f32 %v5171_v59, %v11841_v18  ;;  %v5572_v11 = vpop.f32.mrf.mxu0  ;;  %v11902_v58 = vadd.f32 %v5552_v6, %v5216_v29 }
 0x39c   : > { %v5175_v23 = vpop.f32.mrf.mxu1  ;;  %7440 = vmatmul.mubr.bf16.gmra.mxu1 %v11723_v40 }
 0x39d   : > { %v5218_v34 = vadd.f32 %v5175_v23, %v11846_v7  ;;  %v5574_v17 = vpop.f32.mrf.mxu0  ;;  %7449 = vmatprep.mubr.bf16.mxu1 %v11726_v4  ;;  %v11907_v57 = vadd.f32 %v5554_v24, %v5217_v47 }
 0x39e   : > { %v5177_v50 = vpop.f32.mrf.mxu1 }
 0x39f   : > { %v5219_v48 = vadd.f32 %v5177_v50, %v11849_v46  ;;  %v11910_v61 = vadd.f32 %v5558_v38, %v5218_v34  ;;  %v5578_v42 = vpop.f32.mrf.mxu0 }
 0x3a0   : > { %v5179_v18 = vpop.f32.mrf.mxu1 }
 0x3a1   : > { %v5220_v2 = vadd.f32 %v5179_v18, %v11855_v32  ;;  %v11913_v27 = vadd.f32 %v5560_v36, %v5219_v48  ;;  %v5580_v14 = vpop.f32.mrf.mxu0 }
 0x3a2   : > { %v5181_v25 = vpop.f32.mrf.mxu1 }
 0x3a3   : > { %v5221_v40 = vadd.f32 %v5181_v25, %v11858_v16  ;;  %v11916_v7 = vadd.f32 %v5562_v5, %v5220_v2  ;;  %v5582_v31 = vpop.f32.mrf.mxu0 }
 0x3a4   : > { %v5185_v4 = vpop.f32.mrf.mxu1  ;;  %7450 = vmatmul.mubr.bf16.gmra.mxu1 %v11730_v30 }
 0x3a5   : > { %v5222_v54 = vadd.f32 %v5185_v4, %v11861_v37  ;;  %7459 = vmatprep.mubr.bf16.mxu1 %v11733_v43  ;;  %v5604_v46 = vadd.f32 %v5564_v60, %v5221_v40  ;;  %v5584_v62 = vpop.f32.mrf.mxu0 }
 0x3a6   : > { %v5187_v22 = vpop.f32.mrf.mxu1 }
 0x3a7   : > { %v5223_v9 = vadd.f32 %v5187_v22, %v11864_v39  ;;  %v5605_v32 = vadd.f32 %v5568_v28, %v5222_v54  ;;  %v5588_v5 = vpop.f32.mrf.mxu0 }
 0x3a8   : > { %v5189_v0 = vpop.f32.mrf.mxu1 }
 0x3a9   : > { %v5224_v15 = vadd.f32 %v5189_v0, %v11868_v8  ;;  %v5606_v16 = vadd.f32 %v5570_v53, %v5223_v9  ;;  %v5590_v33 = vpop.f32.mrf.mxu0 }
 0x3aa   : > { %v5191_v49 = vpop.f32.mrf.mxu1 }
 0x3ab   : > { %v5225_v6 = vadd.f32 %v5191_v49, %v11870_v52  ;;  %v5607_v24 = vadd.f32 %v5572_v11, %v5224_v15  ;;  %v5592_v29 = vpop.f32.mrf.mxu0 }
 0x3ac   : > { %v5195_v30 = vpop.f32.mrf.mxu1  ;;  %7460 = vmatmul.mubr.bf16.gmra.mxu1 %v11736_v55 }
 0x3ad   : > { %v5226_v43 = vadd.f32 %v5195_v30, %v11873_v1  ;;  %7469 = vmatprep.mubr.bf16.mxu1 %v11743_v41  ;;  %v5608_v37 = vadd.f32 %v5574_v17, %v5225_v6  ;;  %v5594_v23 = vpop.f32.mrf.mxu0 }
 0x3ae   : > { %v5197_v39 = vpop.f32.mrf.mxu1 }
 0x3af   : > { %v5227_v38 = vadd.f32 %v5197_v39, %v11876_v45  ;;  %v5609_v36 = vadd.f32 %v5578_v42, %v5226_v43 }
 0x3b0   : > { %v5199_v8 = vpop.f32.mrf.mxu1 }
 0x3b1   : > { %v5228_v13 = vadd.f32 %v5199_v8, %v11878_v19  ;;  %v5610_v10 = vadd.f32 %v5580_v14, %v5227_v38 }
 0x3b2   : > { %v5201_v52 = vpop.f32.mrf.mxu1 }
 0x3b3   : > { %v5229_v60 = vadd.f32 %v5201_v52, %v11880_v35  ;;  %v5611_v51 = vadd.f32 %v5582_v31, %v5228_v13 }
 0x3b4   : > { %v5205_v55 = vpop.f32.mrf.mxu1  ;;  %7470 = vmatmul.mubr.bf16.gmra.mxu1 %v11746_v63 }
 0x3b5   : > { %v5230_v41 = vadd.f32 %v5205_v55, %v11883_v26  ;;  %v5612_v1 = vadd.f32 %v5584_v62, %v5229_v60 }
 0x3b6   : > { %v5207_v28 = vpop.f32.mrf.mxu1 }
 0x3b7   : > { %v5231_v45 = vadd.f32 %v5207_v28, %v11886_v3  ;;  %v5613_v21 = vadd.f32 %v5588_v5, %v5230_v41 }
 0x3b8   : > { %v5209_v53 = vpop.f32.mrf.mxu1 }
 0x3b9   : > { %v5232_v19 = vadd.f32 %v5209_v53, %v11888_v20  ;;  %v5614_v59 = vadd.f32 %v5590_v33, %v5231_v45 }
 0x3ba   : > { %v5211_v47 = vpop.f32.mrf.mxu1 }
 0x3bb   : > { %v5233_v35 = vadd.f32 %v5211_v47, %v11890_v44  ;;  %v5615_v11 = vadd.f32 %v5592_v29, %v5232_v19 }
 0x3bd   : > { %v5616_v34 = vadd.f32 %v5594_v23, %v5233_v35 }
 0x3c7   : > { %v11950_v25 = vpop.f32.mrf.mxu0 }
 0x3c9   : > { %v11958_v14 = vpop.f32.mrf.mxu0 }
 0x3cb   : > { %v11964_v22 = vpop.f32.mrf.mxu0 }
 0x3cd   : > { %v11970_v15 = vpop.f32.mrf.mxu0 }
 0x3cf   : > { %v11976_v62 = vpop.f32.mrf.mxu0 }
 0x3d1   : > { %v11982_v39 = vpop.f32.mrf.mxu0 }
 0x3d3   : > { %v11988_v8 = vpop.f32.mrf.mxu0 }
 0x3d4   : > { %v5965_v17 = vpop.f32.mrf.mxu1 }
 0x3d5   : > { %v11936_v63 = vadd.f32 %v5965_v17, %v11896_v56  ;;  %v11994_v60 = vpop.f32.mrf.mxu0 }
 0x3d6   : > { %v5967_v26 = vpop.f32.mrf.mxu1 }
 0x3d7   : > { %v11939_v50 = vadd.f32 %v5967_v26, %v11899_v12  ;;  %v11998_v33 = vpop.f32.mrf.mxu0 }
 0x3d8   : > { %v5969_v3 = vpop.f32.mrf.mxu1 }
 0x3d9   : > { %v11942_v48 = vadd.f32 %v5969_v3, %v11902_v58  ;;  %v12000_v55 = vpop.f32.mrf.mxu0 }
 0x3da   : > { %v5971_v20 = vpop.f32.mrf.mxu1 }
 0x3db   : > { %v11945_v42 = vadd.f32 %v5971_v20, %v11907_v57  ;;  %v12002_v41 = vpop.f32.mrf.mxu0 }
 0x3dc   : > { %v5975_v44 = vpop.f32.mrf.mxu1 }
 0x3dd   : > { %v11948_v18 = vadd.f32 %v5975_v44, %v11910_v61 }
 0x3de   : > { %v5977_v2 = vpop.f32.mrf.mxu1 }
 0x3df   : > { %v11953_v56 = vadd.f32 %v5977_v2, %v11913_v27 }
 0x3e0   : > { %v5979_v12 = vpop.f32.mrf.mxu1 }
 0x3e1   : > { %v11956_v40 = vadd.f32 %v5979_v12, %v11916_v7 }
 0x3e2   : > { %v5981_v58 = vpop.f32.mrf.mxu1 }
 0x3e3   : > { %v11960_v4 = vadd.f32 %v5981_v58, %v5604_v46 }
 0x3e4   : > { %v5985_v57 = vpop.f32.mrf.mxu1 }
 0x3e5   : > { %v11962_v54 = vadd.f32 %v5985_v57, %v5605_v32 }
 0x3e6   : > { %v5987_v61 = vpop.f32.mrf.mxu1 }
 0x3e7   : > { %v11966_v9 = vadd.f32 %v5987_v61, %v5606_v16 }
 0x3e8   : > { %v5989_v31 = vpop.f32.mrf.mxu1 }
 0x3e9   : > { %v11968_v27 = vadd.f32 %v5989_v31, %v5607_v24 }
 0x3ea   : > { %v5991_v0 = vpop.f32.mrf.mxu1 }
 0x3eb   : > { %v11972_v7 = vadd.f32 %v5991_v0, %v5608_v37 }
 0x3ec   : > { %v5995_v49 = vpop.f32.mrf.mxu1 }
 0x3ed   : > { %v11974_v6 = vadd.f32 %v5995_v49, %v5609_v36 }
 0x3ee   : > { %v5997_v46 = vpop.f32.mrf.mxu1 }
 0x3ef   : > { %v11978_v32 = vadd.f32 %v5997_v46, %v5610_v10 }
 0x3f0   : > { %v5999_v30 = vpop.f32.mrf.mxu1 }
 0x3f1   : > { %v11980_v43 = vadd.f32 %v5999_v30, %v5611_v51 }
 0x3f2   : > { %v6001_v16 = vpop.f32.mrf.mxu1 }
 0x3f3   : > { %v11984_v24 = vadd.f32 %v6001_v16, %v5612_v1  ;;  %v12004_v1 = vpop.f32.mrf.mxu0 }
 0x3f4   : > { %v6005_v38 = vpop.f32.mrf.mxu1 }
 0x3f5   : > { %v11986_v5 = vadd.f32 %v6005_v38, %v5613_v21  ;;  %v12006_v28 = vpop.f32.mrf.mxu0 }
 0x3f6   : > { %v6007_v37 = vpop.f32.mrf.mxu1 }
 0x3f7   : > { %12717 = vst [vmem:[#allocation20_spill] sm:$0xff] %v11986_v5  ;;  %v11990_v36 = vadd.f32 %v6007_v37, %v5614_v59  ;;  %v12008_v45 = vpop.f32.mrf.mxu0 }
 0x3f8   : > { %v6009_v13 = vpop.f32.mrf.mxu1 }
 0x3f9   : > { %12718 = vst [vmem:[#allocation30_spill] sm:$0xff] %v11990_v36  ;;  %v11992_v52 = vadd.f32 %v6009_v13, %v5615_v11  ;;  %v12012_v53 = vpop.f32.mrf.mxu0 }
 0x3fa   : > { %v6011_v10 = vpop.f32.mrf.mxu1 }
 0x3fb   : > { %12719 = vst [vmem:[#allocation38_spill] sm:$0xff] %v11992_v52  ;;  %v11996_v51 = vadd.f32 %v6011_v10, %v5616_v34  ;;  %v12018_v47 = vpop.f32.mrf.mxu0  ;;  %v445_v52 = vld [vmem:[#allocation9 + $0x2] ss:$4 sm:$0x3] }
 0x3fd   : > { %12720 = vst [vmem:[#allocation22_spill] sm:$0xff] %v11996_v51  ;;  %v12024_v23 = vpop.f32.mrf.mxu0  ;;  %v7564_v51 = vld [vmem:[%s9921_s6 + $0x20] sm:$0xff] }
 0x3fe   : > { %12721 = vst [vmem:[#allocation31_spill] sm:$0xff] %v12024_v23 }
 0x3ff   : > { %v12030_v26 = vpop.f32.mrf.mxu0 }
 0x400   : > { %12723 = vst [vmem:[#allocation32_spill] sm:$0xff] %v12030_v26 }
 0x401   : > { %v12034_v20 = vpop.f32.mrf.mxu0 }
 0x402   : > { %12725 = vst [vmem:[#allocation26_spill] sm:$0xff] %v12034_v20 }
 0x403   : > { %v12038_v2 = vpop.f32.mrf.mxu0 }
 0x404   : > { %12727 = vst [vmem:[#allocation28_spill] sm:$0xff] %v12038_v2  ;;  %v7562_v2 = vld [vmem:[%s9921_s6 + $0x10] sm:$0xf8] }
 0x405   : > { %v7607_v36 = vrot.slane %v7562_v2, 3 }
 0x407   : > { %v12040_v12 = vpop.f32.mrf.mxu0 }
 0x409   : > { %v12044_v57 = vpop.f32.mrf.mxu0 }
 0x40b   : > { %v12048_v31 = vpop.f32.mrf.mxu0 }
 0x40d   : > { %v12052_v49 = vpop.f32.mrf.mxu0 }
 0x40f   : > { %v12056_v30 = vpop.f32.mrf.mxu0 }
 0x410   : > { %12732 = vst [vmem:[#allocation40_spill] sm:$0xff] %v12056_v30 }
 0x411   : > { %v12060_v38 = vpop.f32.mrf.mxu0 }
 0x412   : > { %12734 = vst [vmem:[#allocation43_spill] sm:$0xff] %v12060_v38  ;;  %v7570_v38 = vld [vmem:[%s9921_s6 + $0x50] sm:$0xff] }
 0x413   : > { %v12064_v13 = vpop.f32.mrf.mxu0 }
 0x414   : > { %v6681_v21 = vpop.f32.mrf.mxu1  ;;  %12736 = vst [vmem:[#allocation44_spill] sm:$0xff] %v12064_v13  ;;  %v7568_v13 = vld [vmem:[%s9921_s6 + $0x40] sm:$0xff] }
 0x415   : > { %v12070_v20 = vpop.f32.mrf.mxu0  ;;  %v7617_v30 = vrot.slane %v7568_v13, 3 }
 0x416   : > { %v12010_v29 = vpop.f32.mrf.mxu1  ;;  %12738 = vst [vmem:[#allocation47_spill] sm:$0xff] %v12070_v20 }
 0x418   : > { %v12014_v19 = vpop.f32.mrf.mxu1 }
 0x41a   : > { %v12016_v59 = vpop.f32.mrf.mxu1 }
 0x41c   : > { %v12020_v35 = vpop.f32.mrf.mxu1 }
 0x41e   : > { %v12022_v11 = vpop.f32.mrf.mxu1 }
 0x420   : > { %v12026_v34 = vpop.f32.mrf.mxu1 }
 0x422   : > { %v12028_v17 = vpop.f32.mrf.mxu1 }
 0x423   : > { %12722 = vst [vmem:[#allocation23_spill] sm:$0xff] %v12028_v17  ;;  %v7571_v17 = vld [vmem:[%s9921_s6 + $0x58] sm:$0xff] }
 0x424   : > { %v12032_v3 = vpop.f32.mrf.mxu1 }
 0x425   : > { %12724 = vst [vmem:[#allocation33_spill] sm:$0xff] %v12032_v3  ;;  %v6348_v3 = vadd.f32 %v11958_v14, %v11939_v50 }
 0x426   : > { %v12036_v44 = vpop.f32.mrf.mxu1 }
 0x427   : > { %12726 = vst [vmem:[#allocation34_spill] sm:$0xff] %v12036_v44  ;;  %v12740_v44 = vld [vmem:[#allocation56_spill] sm:$0xff] }
 0x428   : > { %v12042_v58 = vpop.f32.mrf.mxu1  ;;  %v12081_v23 = vrot.slane %v445_v52, %v12740_v44 }
 0x429   : > { %12728 = vst [vmem:[#allocation35_spill] sm:$0xff] %v12042_v58  ;;  %v7567_v58 = vld [vmem:[%s9921_s6 + $0x38] sm:$0xff] }
 0x42a   : > { %v12046_v61 = vpop.f32.mrf.mxu1 }
 0x42b   : > { %12729 = vst [vmem:[#allocation39_spill] sm:$0xff] %v12046_v61  ;;  %v7608_v61 = vrot.slane %v7564_v51, 3  ;;  %v6349_v51 = vadd.f32 %v11964_v22, %v11942_v48  ;;  %v12743_v22 = vld [vmem:[#allocation57_spill] sm:$0xff] }
 0x42c   : > { %v12050_v0 = vpop.f32.mrf.mxu1 }
 0x42d   : > { %12730 = vst [vmem:[#allocation29_spill] sm:$0xff] %v12050_v0  ;;  %v7565_v0 = vld [vmem:[%s9921_s6 + $0x28] sm:$0xff]  ;;  %v12102_v14 = vsel %vm12742_vm14, %v7607_v36, %v7608_v61  ;;  %v7621_v36 = vrot.slane %v7570_v38, 3  ;;  %vm12783_vm14 = vmmov %vm12750_vm0 }
 0x42e   : > { %v12054_v46 = vpop.f32.mrf.mxu1  ;;  %v7611_v20 = vrot.slane %v7565_v0, 3  ;;  %v6350_v0 = vadd.f32 %v11970_v15, %v11945_v42  ;;  %v7572_v42 = vld [vmem:[%s9921_s6 + $0x60] sm:$0xff] }
 0x42f   : > { %12731 = vst [vmem:[#allocation37_spill] sm:$0xff] %v12054_v46  ;;  %v7563_v46 = vld [vmem:[%s9921_s6 + $0x18] sm:$0xf8]  ;;  %v7625_v38 = vrot.slane %v7572_v42, 3 }
 0x430   : > { %v12058_v16 = vpop.f32.mrf.mxu1  ;;  %v7610_v5 = vrot.slane %v7563_v46, 3  ;;  %v6351_v46 = vadd.f32 %v11976_v62, %v11948_v18  ;;  %v6352_v18 = vadd.f32 %v11982_v39, %v11953_v56  ;;  %v12128_v56 = vld [vmem:[%s9921_s6 + $0x68] sm:$0xff]  ;;  %v6355_v39 = vadd.f32 %v11998_v33, %v11962_v54 }
 0x431   : > { %12733 = vst [vmem:[#allocation41_spill] sm:$0xff] %v12058_v16  ;;  %v447_v16 = vld [vmem:[#allocation9 + $0x3] ss:$4 sm:$0x3]  ;;  %v12151_v54 = vadd.f32 %v12002_v41, %v11968_v27 }
 0x432   : > { %v12062_v37 = vpop.f32.mrf.mxu1  ;;  %v12091_v2 = vrot.slane %v447_v16, %v12740_v44  ;;  %v12105_v44 = vrot.slane %v445_v52, %v12743_v22  ;;  %v12115_v15 = vsel %vm12744_vm3, %v7610_v5, %v7611_v20  ;;  %v6353_v52 = vadd.f32 %v11988_v8, %v11956_v40  ;;  %vm12784_vm3 = vmmov %vm12750_vm0 }
 0x433   : > { %12735 = vst [vmem:[#allocation42_spill] sm:$0xff] %v12062_v37  ;;  %v7566_v37 = vld [vmem:[%s9921_s6 + $0x30] sm:$0xff]  ;;  %v6732_v40 = vadd.f32 %v12014_v19, %v6349_v51  ;;  %v12157_v19 = vsel %vm12749_vm1, %v7617_v30, %v7621_v36 }
 0x434   : > { %v12066_v10 = vpop.f32.mrf.mxu1 }
 0x435   : > { %12737 = vst [vmem:[#allocation46_spill] sm:$0xff] %v12066_v10  ;;  %v6347_v10 = vadd.f32 %v11950_v25, %v11936_v63  ;;  %v7613_v63 = vrot.slane %v7566_v37, 3  ;;  %v7569_v25 = vld [vmem:[%s9921_s6 + $0x48] sm:$0xff]  ;;  %v12108_v37 = vrot.slane %v447_v16, %v12743_v22  ;;  %v6354_v16 = vadd.f32 %v11994_v60, %v11960_v4 }
 0x436   : > { %v12074_v26 = vpop.f32.mrf.mxu1  ;;  %v7619_v62 = vrot.slane %v7569_v25, 3  ;;  %v12140_v4 = vadd.f32 %v12000_v55, %v11966_v9  ;;  %v7627_v9 = vrot.slane %v12128_v56, 3  ;;  %v6733_v55 = vadd.f32 %v12016_v59, %v6350_v0 }
 0x437   : > { %12739 = vst [vmem:[#allocation49_spill] sm:$0xff] %v12074_v26  ;;  %v12086_v26 = vpop.f32.mrf.mxu0  ;;  %v6730_v48 = vadd.f32 %v6681_v21, %v6347_v10  ;;  %v6731_v21 = vadd.f32 %v12010_v29, %v6348_v3  ;;  %v12125_v13 = vsel %vm12745_vm5, %v7608_v61, %v7613_v63  ;;  %v7623_v3 = vrot.slane %v7571_v17, 3  ;;  %v12147_v61 = vld [vmem:[%s9921_s6 + $0x70] sm:$0xff]  ;;  %vm12785_vm5 = vmmov %vm12750_vm0 }
 0x438   : > { %12741 = vst [vmem:[#allocation45_spill] sm:$0xff] %v12086_v26  ;;  %v12099_v50 = vpop.f32.mrf.mxu1  ;;  %v7615_v26 = vrot.slane %v7567_v58, 3  ;;  %v12144_v60 = vsel %vm12747_vm13, %v7613_v63, %v7617_v30  ;;  %v12176_v59 = vsel %vm12751_vm8, %v7621_v36, %v7625_v38  ;;  %v7629_v51 = vrot.slane %v12147_v61, 3 }
 0x439   : > { %v12118_v58 = vpop.f32.mrf.mxu0  ;;  %v7147_v8 = vadd.f32 %v12040_v12, %v6730_v48  ;;  %v12165_v12 = vadd.f32 %v12004_v1, %v11972_v7  ;;  %v7148_v41 = vadd.f32 %v12044_v57, %v6731_v21  ;;  %v12173_v10 = vsel %vm12750_vm0, %v7619_v62, %v7623_v3 }
 0x43a   : > { %v12132_v5 = vpop.f32.mrf.mxu1  ;;  %v12135_v29 = vsel %vm12746_vm11, %v7611_v20, %v7615_v26  ;;  %v12154_v17 = vsel %vm12748_vm15, %v7615_v26, %v7619_v62  ;;  %v12170_v26 = vadd.f32 %v12006_v28, %v11974_v6  ;;  %v12181_v7 = vadd.f32 %v12008_v45, %v11978_v32  ;;  %v12186_v28 = vld [vmem:[%s9921_s6 + $0x78] sm:$0xff]  ;;  %vm12786_vm11 = vmmov %vm12750_vm0 }
 0x43b   : > { %v12161_v20 = vpop.f32.mrf.mxu0  ;;  %v7149_v6 = vadd.f32 %v12048_v31, %v6732_v40  ;;  %v6734_v63 = vadd.f32 %v12020_v35, %v6351_v46  ;;  %v6735_v25 = vadd.f32 %v12022_v11, %v6352_v18  ;;  %v12192_v0 = vadd.f32 %v12012_v53, %v11980_v43  ;;  %v12204_v46 = vld [vmem:[%s9921_s6 + $0x80] sm:$0xff] }
 0x43c   : > { %v12196_v32 = vsel %vm12752_vm4, %v7623_v3, %v7627_v9  ;;  %v7150_v35 = vadd.f32 %v12052_v49, %v6733_v55  ;;  %v6736_v11 = vadd.f32 %v12026_v34, %v6353_v52  ;;  %v12209_v43 = vadd.f32 %v12018_v47, %v11984_v24  ;;  %v12754_v3 = vld [vmem:[#allocation23_spill] sm:$0xff]  ;;  %v12755_v52 = vld [vmem:[#allocation40_spill] sm:$0xff] }
 0x43d   : > { %v12198_v45 = vpop.f32.mrf.mxu0  ;;  %v12212_v18 = vsel %vm12753_vm7, %v7625_v38, %v7629_v51  ;;  %v7631_v62 = vrot.slane %v12186_v28, 3  ;;  %v6737_v34 = vadd.f32 %v12754_v3, %v6354_v16  ;;  %v7151_v40 = vadd.f32 %v12755_v52, %v6734_v63  ;;  %v12756_v47 = vld [vmem:[#allocation43_spill] sm:$0xff]  ;;  %v12258_v52 = vld [vmem:[%s9921_s6 + $0x88] sm:$0xff] }
 0x43e   : > { %v7633_v38 = vrot.slane %v12204_v46, 3 }
 0x43f   : > { %v12222_v61 = vpop.f32.mrf.mxu0  ;;  %v12232_v63 = vsel %vm12759_vm12, %v7627_v9, %v7631_v62 }
 0x454   : > { %v7431_v33 = vpop.f32.mrf.mxu1 }
 0x455   : > { %v7480_v27 = vadd.f32 %v7431_v33, %v7147_v8  ;;  %v7152_v8 = vadd.f32 %v12756_v47, %v6735_v25 }
 0x456   : > { %v7433_v30 = vpop.f32.mrf.mxu1 }
 0x457   : > { %v7511_v1 = vmul.f32 %v12081_v23, %v7480_v27  ;;  %v7481_v57 = vadd.f32 %v7433_v30, %v7148_v41  ;;  %v12757_v41 = vld [vmem:[#allocation33_spill] sm:$0xff] }
 0x458   : > { %v7435_v48 = vpop.f32.mrf.mxu1  ;;  %v6738_v30 = vadd.f32 %v12757_v41, %v6355_v39 }
 0x459   : > { %v7542_v22 = vadd.f32 %v12091_v2, %v7511_v1  ;;  %v7512_v31 = vmul.f32 %v12105_v44, %v7481_v57  ;;  %v7482_v42 = vadd.f32 %v7435_v48, %v7149_v6  ;;  %v12758_v57 = vld [vmem:[#allocation44_spill] sm:$0xff] }
 0x45a   : > { %v7437_v53 = vpop.f32.mrf.mxu1  ;;  %v7153_v6 = vadd.f32 %v12758_v57, %v6736_v11  ;;  %v12762_v11 = vld [vmem:[#allocation47_spill] sm:$0xff]  ;;  %v12769_v57 = vld [vmem:[#allocation32_spill] sm:$0xff] }
 0x45b   : > { %v7669_v36 = vadd.f32 %v12102_v14, %v7542_v22  ;;  %v7543_v21 = vadd.f32 %v12108_v37, %v7512_v31  ;;  %v7513_v49 = vmul.f32 %v12081_v23, %v7482_v42  ;;  %v7483_v56 = vadd.f32 %v7437_v53, %v7150_v35  ;;  %v12760_v22 = vld [vmem:[#allocation20_spill] sm:$0xff]  ;;  %v12761_v31 = vld [vmem:[#allocation31_spill] sm:$0xff] }
 0x45c   : > { %v7441_v24 = vpop.f32.mrf.mxu1  ;;  %v12243_v42 = vadd.f32 %v12761_v31, %v12760_v22  ;;  %v7154_v53 = vadd.f32 %v12762_v11, %v6737_v34  ;;  %v12765_v34 = vld [vmem:[#allocation35_spill] sm:$0xff]  ;;  %v12770_v31 = vld [vmem:[#allocation29_spill] sm:$0xff] }
 0x45d   : > { %v7689_v33 = vmax.f32 %v7669_v36, 0.0  ;;  %v7670_v14 = vadd.f32 %v12115_v15, %v7543_v21  ;;  %v7544_v55 = vadd.f32 %v12091_v2, %v7513_v49  ;;  %v7514_v27 = vmul.f32 %v12105_v44, %v7483_v56  ;;  %v12252_v21 = vpop.f32.mrf.mxu0 }
 0x45e   : > { %v7484_v1 = vadd.f32 %v7441_v24, %v7151_v40  ;;  %v7443_v16 = vpop.f32.mrf.mxu1  ;;  %v12250_v36 = vsel %vm12763_vm2, %v7629_v51, %v7633_v38  ;;  %v12764_v40 = vld [vmem:[#allocation34_spill] sm:$0xff]  ;;  %v6740_v47 = vadd.f32 %v12765_v34, %v12151_v54 }
 0x45f   : > { %7709 = vst [vmem:[%s12236_s20] sm:$0xff] %v7689_v33  ;;  %v7690_v15 = vmax.f32 %v7670_v14, 0.0  ;;  %v7671_v25 = vadd.f32 %v12125_v13, %v7544_v55  ;;  %v7545_v39 = vadd.f32 %v12108_v37, %v7514_v27  ;;  %v7485_v48 = vadd.f32 %v7443_v16, %v7152_v8  ;;  %v12766_v33 = vld [vmem:[#allocation45_spill] sm:$0xff] }
 0x460   : > { %v7515_v9 = vmul.f32 %v12081_v23, %v7484_v1  ;;  %v7445_v35 = vpop.f32.mrf.mxu1  ;;  %v6739_v24 = vadd.f32 %v12764_v40, %v12140_v4  ;;  %v7155_v14 = vadd.f32 %v12766_v33, %v6738_v30  ;;  %v12767_v1 = vld [vmem:[#allocation39_spill] sm:$0xff]  ;;  %v12768_v4 = vld [vmem:[#allocation30_spill] sm:$0xff]  ;;  %v7132_v30 = vpop.f32.mrf.mxu0  ;;  %v12771_v40 = vld [vmem:[#allocation37_spill] sm:$0xff] }
 0x461   : > { %7710 = vst [vmem:[%s12236_s20 + $0x8] sm:$0xff] %v7690_v15  ;;  %v7691_v13 = vmax.f32 %v7671_v25, 0.0  ;;  %v7672_v49 = vadd.f32 %v12135_v29, %v7545_v39  ;;  %v7516_v56 = vmul.f32 %v12105_v44, %v7485_v48  ;;  %v7486_v3 = vadd.f32 %v7445_v35, %v7153_v6  ;;  %v12773_v33 = vld [vmem:[#allocation38_spill] sm:$0xff] }
 0x462   : > { %v7546_v51 = vadd.f32 %v12091_v2, %v7515_v9  ;;  %v7447_v8 = vpop.f32.mrf.mxu1  ;;  %v6741_v16 = vadd.f32 %v12767_v1, %v12165_v12  ;;  %v12273_v6 = vadd.f32 %v12769_v57, %v12768_v4  ;;  %v7635_v25 = vrot.slane %v12258_v52, 3  ;;  %v12775_v4 = vld [vmem:[#allocation41_spill] sm:$0xff] }
 0x463   : > { %7711 = vst [vmem:[%s12236_s20 + $0x10] sm:$0xff] %v7691_v13  ;;  %v7692_v55 = vmax.f32 %v7672_v49, 0.0  ;;  %v7547_v29 = vadd.f32 %v12108_v37, %v7516_v56  ;;  %v7517_v27 = vmul.f32 %v12081_v23, %v7486_v3  ;;  %v7487_v41 = vadd.f32 %v7447_v8, %v7154_v53  ;;  %v12289_v3 = vld [vmem:[%s9921_s6 + $0x90] sm:$0xff] }
 0x464   : > { %v7673_v54 = vadd.f32 %v12144_v60, %v7546_v51  ;;  %v7451_v15 = vpop.f32.mrf.mxu1  ;;  %v6742_v9 = vadd.f32 %v12770_v31, %v12170_v26  ;;  %v7156_v60 = vadd.f32 %v12118_v58, %v6739_v24  ;;  %v7157_v53 = vadd.f32 %v12161_v20, %v6740_v47  ;;  %v7134_v20 = vpop.f32.mrf.mxu0 }
 0x465   : > { %7712 = vst [vmem:[%s12236_s20 + $0x18] sm:$0xff] %v7692_v55  ;;  %v7674_v39 = vadd.f32 %v12154_v17, %v7547_v29  ;;  %v7548_v48 = vadd.f32 %v12091_v2, %v7517_v27  ;;  %v7518_v22 = vmul.f32 %v12105_v44, %v7487_v41  ;;  %v7488_v12 = vadd.f32 %v7451_v15, %v7155_v14  ;;  %v12774_v14 = vld [vmem:[#allocation26_spill] sm:$0xff] }
 0x466   : > { %v7693_v35 = vmax.f32 %v7673_v54, 0.0  ;;  %v7453_v11 = vpop.f32.mrf.mxu1  ;;  %v6743_v34 = vadd.f32 %v12771_v40, %v12181_v7  ;;  %v7158_v58 = vadd.f32 %v12198_v45, %v6741_v16  ;;  %v6365_v55 = vadd.f32 %v12774_v14, %v12773_v33  ;;  %v12314_v16 = vld [vmem:[%s9921_s6 + $0x98] sm:$0xff] }
 0x467   : > { %v7694_v13 = vmax.f32 %v7674_v39, 0.0  ;;  %v7675_v49 = vadd.f32 %v12157_v19, %v7548_v48  ;;  %v7549_v17 = vadd.f32 %v12108_v37, %v7518_v22  ;;  %v7519_v56 = vmul.f32 %v12081_v23, %v7488_v12  ;;  %v12776_v54 = vld [vmem:[#allocation42_spill] sm:$0xff]  ;;  %v7138_v22 = vpop.f32.mrf.mxu0 }
 0x468   : > { %7713 = vst [vmem:[%s12236_s20 + $0x20] sm:$0xff] %v7693_v35  ;;  %v7489_v26 = vadd.f32 %v7453_v11, %v7156_v60  ;;  %v7455_v51 = vpop.f32.mrf.mxu1  ;;  %v12300_v19 = vsel %vm12772_vm6, %v7631_v62, %v7635_v25  ;;  %v7159_v28 = vadd.f32 %v12222_v61, %v6742_v9  ;;  %v7637_v62 = vrot.slane %v12289_v3, 3  ;;  %v12777_v35 = vld [vmem:[#allocation46_spill] sm:$0xff] }
 0x469   : > { %7714 = vst [vmem:[%s12236_s20 + $0x28] sm:$0xff] %v7694_v13  ;;  %v7695_v24 = vmax.f32 %v7675_v49, 0.0  ;;  %v7676_v47 = vadd.f32 %v12173_v10, %v7549_v17  ;;  %v7550_v7 = vadd.f32 %v12091_v2, %v7519_v56  ;;  %v7490_v8 = vadd.f32 %v7455_v51, %v7157_v53 }
 0x46a   : > { %v7520_v45 = vmul.f32 %v12105_v44, %v7489_v26  ;;  %v7457_v29 = vpop.f32.mrf.mxu1  ;;  %v6744_v57 = vadd.f32 %v12775_v4, %v12192_v0  ;;  %v6745_v15 = vadd.f32 %v12776_v54, %v12209_v43  ;;  %v7160_v48 = vadd.f32 %v12252_v21, %v6743_v34  ;;  %v7140_v34 = vpop.f32.mrf.mxu0 }
 0x46b   : > { %7715 = vst [vmem:[%s12236_s20 + $0x30] sm:$0xff] %v7695_v24  ;;  %v7696_v27 = vmax.f32 %v7676_v47, 0.0  ;;  %v7677_v41 = vadd.f32 %v12176_v59, %v7550_v7  ;;  %v7521_v10 = vmul.f32 %v12081_v23, %v7490_v8  ;;  %v7491_v1 = vadd.f32 %v7457_v29, %v7158_v58  ;;  %v7580_v24 = vld [vmem:[%s9921_s6 + $0xa0] sm:$0xff]  ;;  %v12780_v7 = vld [vmem:[#allocation22_spill] sm:$0xff]  ;;  %v12781_v8 = vld [vmem:[#allocation28_spill] sm:$0xff] }
 0x46c   : > { %v7551_v61 = vadd.f32 %v12108_v37, %v7520_v45  ;;  %v7461_v39 = vpop.f32.mrf.mxu1  ;;  %v6746_v0 = vadd.f32 %v12777_v35, %v12243_v42  ;;  %v7638_v43 = vsel %vm12778_vm9, %v7633_v38, %v7637_v62  ;;  %v7639_v21 = vrot.slane %v12314_v16, 3 }
 0x46d   : > { %7716 = vst [vmem:[%s12236_s20 + $0x38] sm:$0xff] %v7696_v27  ;;  %v7697_v59 = vmax.f32 %v7677_v41, 0.0  ;;  %v7552_v12 = vadd.f32 %v12091_v2, %v7521_v10  ;;  %v7522_v31 = vmul.f32 %v12105_v44, %v7491_v1  ;;  %v7492_v9 = vadd.f32 %v7461_v39, %v7159_v28  ;;  %v7581_v28 = vld [vmem:[%s9921_s6 + $0xa8] sm:$0xff]  ;;  %v7142_v1 = vpop.f32.mrf.mxu0 }
 0x46e   : > { %v7678_v60 = vadd.f32 %v12196_v32, %v7551_v61  ;;  %v7463_v11 = vpop.f32.mrf.mxu1  ;;  %v12779_v32 = vld [vmem:[#allocation49_spill] sm:$0xff]  ;;  %v7161_v46 = vadd.f32 %v7132_v30, %v6744_v57  ;;  %v7162_v38 = vadd.f32 %v7134_v20, %v6745_v15  ;;  %v6748_v47 = vadd.f32 %v12099_v50, %v6365_v55 }
 0x46f   : > { %7717 = vst [vmem:[%s12236_s20 + $0x40] sm:$0xff] %v7697_v59  ;;  %v7679_v53 = vadd.f32 %v12212_v18, %v7552_v12  ;;  %v7553_v13 = vadd.f32 %v12108_v37, %v7522_v31  ;;  %v7523_v42 = vmul.f32 %v12081_v23, %v7492_v9  ;;  %v7493_v49 = vadd.f32 %v7463_v11, %v7160_v48  ;;  %v7582_v15 = vld [vmem:[%s9921_s6 + $0xb0] sm:$0x7] }
 0x470   : > { %v6747_v17 = vadd.f32 %v12779_v32, %v12273_v6  ;;  %v7698_v56 = vmax.f32 %v7678_v60, 0.0  ;;  %v7465_v40 = vpop.f32.mrf.mxu1  ;;  %v6366_v6 = vadd.f32 %v12781_v8, %v12780_v7  ;;  %v7163_v20 = vadd.f32 %v7138_v22, %v6746_v0  ;;  %v7144_v60 = vpop.f32.mrf.mxu0 }
 0x471   : > { %v7699_v26 = vmax.f32 %v7679_v53, 0.0  ;;  %v7680_v51 = vadd.f32 %v12232_v63, %v7553_v13  ;;  %v7554_v18 = vadd.f32 %v12091_v2, %v7523_v42  ;;  %v7524_v58 = vmul.f32 %v12105_v44, %v7493_v49 }
 0x472   : > { %7718 = vst [vmem:[%s12236_s20 + $0x48] sm:$0xff] %v7698_v56  ;;  %v7494_v30 = vadd.f32 %v7465_v40, %v7161_v46  ;;  %v7467_v33 = vpop.f32.mrf.mxu1  ;;  %v7640_v50 = vsel %vm12782_vm10, %v7635_v25, %v7639_v21  ;;  %v7641_v41 = vrot.slane %v7580_v24, 3  ;;  %v7164_v10 = vadd.f32 %v7140_v34, %v6747_v17 }
 0x473   : > { %7719 = vst [vmem:[%s12236_s20 + $0x50] sm:$0xff] %v7699_v26  ;;  %v7700_v14 = vmax.f32 %v7680_v51, 0.0  ;;  %v7681_v63 = vadd.f32 %v12250_v36, %v7554_v18  ;;  %v7555_v45 = vadd.f32 %v12108_v37, %v7524_v58  ;;  %v7495_v29 = vadd.f32 %v7467_v33, %v7162_v38 }
 0x474   : > { %v7525_v27 = vmul.f32 %v12081_v23, %v7494_v30  ;;  %v7471_v55 = vpop.f32.mrf.mxu1  ;;  %v6749_v61 = vadd.f32 %v12132_v5, %v6366_v6  ;;  %v7643_v39 = vrot.slane %v7581_v28, 3  ;;  %v7165_v48 = vadd.f32 %v7142_v1, %v6748_v47 }
 0x475   : > { %7720 = vst [vmem:[%s12236_s20 + $0x58] sm:$0xff] %v7700_v14  ;;  %v7701_v36 = vmax.f32 %v7681_v63, 0.0  ;;  %v7682_v4 = vadd.f32 %v12300_v19, %v7555_v45  ;;  %v7526_v57 = vmul.f32 %v12105_v44, %v7495_v29  ;;  %v7496_v54 = vadd.f32 %v7471_v55, %v7163_v20  ;;  %v7583_v19 = vld [vmem:[%s9921_s6 + $0xb8] sm:$0x7] }
 0x476   : > { %v7556_v52 = vadd.f32 %v12091_v2, %v7525_v27  ;;  %v7473_v25 = vpop.f32.mrf.mxu1  ;;  %v7642_v35 = vsel %vm12783_vm14, %v7637_v62, %v7641_v41  ;;  %v7645_v0 = vrot.slane %v7582_v15, 3  ;;  %v7166_v3 = vadd.f32 %v7144_v60, %v6749_v61 }
 0x477   : > { %7721 = vst [vmem:[%s12236_s20 + $0x60] sm:$0xff] %v7701_v36  ;;  %v7702_v22 = vmax.f32 %v7682_v4, 0.0  ;;  %v7557_v59 = vadd.f32 %v12108_v37, %v7526_v57  ;;  %v7527_v12 = vmul.f32 %v12081_v23, %v7496_v54  ;;  %v7497_v31 = vadd.f32 %v7473_v25, %v7164_v10 }
 0x478   : > { %v7683_v9 = vadd.f32 %v7638_v43, %v7556_v52  ;;  %v7475_v5 = vpop.f32.mrf.mxu1  ;;  %v7644_v43 = vsel %vm12784_vm3, %v7639_v21, %v7643_v39  ;;  %v7647_v32 = vrot.slane %v7583_v19, 3  ;;  %v7646_v38 = vsel %vm12785_vm5, %v7641_v41, %v7645_v0 }
 0x479   : > { %7722 = vst [vmem:[%s12236_s20 + $0x68] sm:$0xff] %v7702_v22  ;;  %v7684_v11 = vadd.f32 %v7640_v50, %v7557_v59  ;;  %v7558_v53 = vadd.f32 %v12091_v2, %v7527_v12  ;;  %v7528_v13 = vmul.f32 %v12105_v44, %v7497_v31  ;;  %v7498_v42 = vadd.f32 %v7475_v5, %v7165_v48 }
 0x47a   : > { %v7703_v49 = vmax.f32 %v7683_v9, 0.0  ;;  %v7477_v62 = vpop.f32.mrf.mxu1 }
 0x47b   : > { %v7704_v17 = vmax.f32 %v7684_v11, 0.0  ;;  %v7685_v56 = vadd.f32 %v7642_v35, %v7558_v53  ;;  %v7559_v46 = vadd.f32 %v12108_v37, %v7528_v13  ;;  %v7529_v40 = vmul.f32 %v12081_v23, %v7498_v42 }
 0x47c   : > { %7723 = vst [vmem:[%s12236_s20 + $0x70] sm:$0xff] %v7703_v49  ;;  %v7499_v34 = vadd.f32 %v7477_v62, %v7166_v3  ;;  %v7648_v23 = vsel %vm12786_vm11, %v7643_v39, %v7647_v32 }
 0x47d   : > { %7724 = vst [vmem:[%s12236_s20 + $0x78] sm:$0xff] %v7704_v17  ;;  %v7705_v16 = vmax.f32 %v7685_v56, 0.0  ;;  %v7686_v21 = vadd.f32 %v7644_v43, %v7559_v46  ;;  %v7560_v26 = vadd.f32 %v12091_v2, %v7529_v40 }
 0x47e   : > { %v7530_v51 = vmul.f32 %v12105_v44, %v7499_v34 }
 0x47f   : > { %7725 = vst [vmem:[%s12236_s20 + $0x80] sm:$0xff] %v7705_v16  ;;  %v7706_v18 = vmax.f32 %v7686_v21, 0.0  ;;  %v7687_v58 = vadd.f32 %v7646_v38, %v7560_v26 }
 0x480   : > { %v7561_v24 = vadd.f32 %v12108_v37, %v7530_v51 }
 0x481   : > { %7726 = vst [vmem:[%s12236_s20 + $0x88] sm:$0xff] %v7706_v18  ;;  %v7707_v47 = vmax.f32 %v7687_v58, 0.0 }
 0x482   : > { %v7688_v7 = vadd.f32 %v7648_v23, %v7561_v24 }
 0x483   : > { %7727 = vst [vmem:[%s12236_s20 + $0x90] sm:$0xff] %v7707_v47 }
 0x484   : > { %v7708_v2 = vmax.f32 %v7688_v7, 0.0 }
 0x486   : > { %7728 = vst [vmem:[%s12236_s20 + $0x98] sm:$0xff] %v7708_v2 }
 0x487   : > { %9701 = shalt.err (!%p9698_p9)
}
 0x488   : > { %s9702_s24 = scalar_lea.hbm %s12394_s8, 2560  ;;  %s9706_s4 = scalar_lea.hbm %s12443_s3, 5120 }
 0x489   : > { %p9703_p13 = scmp.ne.s32.totalorder %s12394_s8, %s9702_s24  ;;  %p9707_p4 = scmp.lt.s32.totalorder %s12394_s8, %s12443_s3 }
 0x48a   : > { %p9708_p8 = scmp.lt.s32.totalorder %s9706_s4, %s9702_s24 }
 0x48b   : > { %p9704_p5 = pnand %p9703_p13, %p12787_p10 }
 0x48c   : > { %p9709_p3 = por %p9708_p8, %p9707_p4 }
 0x48d   : > { %p9705_p0 = pneg %p9704_p5 }
 0x48f   : > { %p9710_p11 = pnand %p9709_p3, %p9705_p0 }
 0x491   : > { %9713 = shalt.err (!%p9710_p11)
}
 0x492   : > { %s9768_s18 = smov 256   ;;  %s9769_s20 = smov 16  }
 0x493   : > { %8613 = dma.vmem_to_hbm [thread:$0]  (%p12787_p10), %s12396_s26, 2560, %s12394_s8, %s7730_s16, %s9768_s18, %s9768_s18, %s9769_s20  }
 0x494 PF: > { %s7759_s23 = sand.u32 1, %s9744_s12   ;;  %p12788_p1 = scmp.ne.s32.totalorder %s12479_s19, 0 }
 0x495   : > { %p12789_p2 = scmp.ge.s32.totalorder %s9756_s15, 2  ;;  %s7760_s28 = scalar_lea.sflag [#allocation6], %s7759_s23 }
 0x497   : > { %p8627_p6 = pnand %p12789_p2, %p12788_p1 }
 0x499   : > { %p8628_p12 = pneg %p8627_p6 }
 0x49b   : > { %9739 = dma.done.wait (%p8628_p12), %s7760_s28, 2560  }
 0x49c   : > { %9741 = vsyncadd (%p8628_p12), %s7760_s28, 4294964736  ;;  %p17_p7 = scmp.ge.s32.totalorder %s9862_s7, 4   ;;  %s12790_s12 = smov %s9748_s13 }
 0x49d   : > { %s12791_s13 = smov %s9752_s14  ;;  %s12792_s14 = smov %s9878_s11 }
 0x49e   : > { %s12793_s15 = smov %s9862_s7  ;;  %19 = sbr.rel (!%p17_p7) target bundleno = 6 (0x6), region = 89 }
 0x4a3   :  { %7765 = vsyncpa [#allocation5], 1 }
 0x4a4   :  { %7767 = vsyncpa [#allocation5 + $0x1], 1 }
 0x4a5   :  { %7768 = vsyncpa [#allocation8], 1 }
 0x4a6   :  { %7769 = vsyncpa [#allocation6], 1 }
 0x4a7   :  { %7771 = vsyncpa [#allocation6 + $0x1], 1 }

</bundles_post_ra>
